<compile_context>
chip_gen: v5e
topology: v5e:2x2
jax: 0.10.0
libtpu: 0.0.40
codegen_flags: <defaults>
</compile_context>

<pallas_src>
import functools

import jax
import jax.numpy as jnp
from jax.experimental import pallas as pl
from jax.experimental.pallas import tpu as pltpu


def _scale_pred_kernel(x_ref, w1_ref, bnb_ref, w2_ref, b2_ref, o_ref):
    # x_ref  : (1, H+2, W+2, Cin)  bf16, spatially pre-padded in the wrapper
    # w1_ref : (9, Cin, C2)        bf16, 3x3 taps (index = dy*3+dx), BN scale folded in
    # bnb_ref: (1, C2)             f32 folded BatchNorm bias
    # w2_ref : (C2, Cout_p)        bf16 1x1 conv weight, Cout padded to a 128-multiple
    # b2_ref : (1, Cout_p)         f32 1x1 conv bias (padded)
    # o_ref  : (1, th*W, Cout_p)   th output rows, flattened over (y, x)
    _, _, wp2, cin = x_ref.shape
    W = wp2 - 2
    thw, _ = o_ref.shape[1], o_ref.shape[2]
    th = thw // W

    row0 = pl.multiple_of(pl.program_id(1) * th, th)

    # 3x3 conv as 9 accumulating K=Cin matmuls into an f32 accumulator
    # (no lane-axis concat, no 9*Cin patch temporary).
    acc = None
    for dy in range(3):
        for dx in range(3):
            tap = x_ref[0, pl.ds(row0 + dy, th), pl.ds(dx, W), :]   # (th, W, Cin)
            tap = tap.reshape(th * W, cin)                          # no-op when W % 8 == 0
            part = jnp.dot(tap, w1_ref[dy * 3 + dx],
                           preferred_element_type=jnp.float32)      # (th*W, C2) f32
            acc = part if acc is None else acc + part

    # Folded BatchNorm bias + LeakyReLU(0.2) tail in f32.
    y = acc + bnb_ref[...]
    y = jnp.maximum(y, 0.2 * y)

    # 1x1 conv (bf16 MXU, f32 accumulate) + bias.
    out = jnp.dot(y.astype(w2_ref.dtype), w2_ref[...],
                  preferred_element_type=jnp.float32) + b2_ref[...]
    o_ref[0] = out.astype(o_ref.dtype)


def _pick_row_block(H, W, row_block=None):
    """Divisor of H with (th*W) % 8 == 0 (keeps the flattened out block 8-aligned);
    falls back to th = H (single block) when no such divisor exists (e.g. H=13)."""
    if row_block is not None:
        th = row_block
    else:
        th = H
        for cand in range(min(8, H - 1), 1, -1):
            if H % cand == 0 and (cand * W) % 8 == 0:
                th = cand
                break
    if H % th != 0 or (th != H and (th * W) % 8 != 0):
        th = H
    return th


def scale_prediction_nhwc(x_nhwc, w1, bn_bias, w2, b2, *, row_block=None,
                          compute_dtype=jnp.bfloat16, single_buffer_weights=True):
    """x_nhwc: (N, H, W, Cin). Returns (N, H, W, (num_classes+5)*3), dtype of x."""
    N, H, W, Cin = x_nhwc.shape
    C2 = w1.shape[-1]
    Cout = w2.shape[-1]
    Cout_p = ((Cout + 127) // 128) * 128          # lane-dense output stores

    th = _pick_row_block(H, W, row_block)

    # Cast once + pad the halo once in HBM; the per-step DMA brings it in for free.
    x_pad = jnp.pad(x_nhwc.astype(compute_dtype), ((0, 0), (1, 1), (1, 1), (0, 0)))
    w1c = w1.astype(compute_dtype)
    w2c = w2.astype(compute_dtype)
    b2p = b2.astype(jnp.float32)
    if Cout_p != Cout:
        w2c = jnp.pad(w2c, ((0, 0), (0, Cout_p - Cout)))
        b2p = jnp.pad(b2p, ((0, 0), (0, Cout_p - Cout)))
    bnb = bn_bias.astype(jnp.float32)

    # Constant-index operands: single-buffer so they are resident once in VMEM.
    const = dict(pipeline_mode=pl.Buffered(1)) if single_buffer_weights else {}

    out_flat = pl.pallas_call(
        _scale_pred_kernel,
        out_shape=jax.ShapeDtypeStruct((N, H * W, Cout_p), x_nhwc.dtype),
        grid=(N, H // th),
        in_specs=[
            pl.BlockSpec((1, H + 2, W + 2, Cin), lambda n, h: (n, 0, 0, 0)),
            pl.BlockSpec((9, Cin, C2), lambda n, h: (0, 0, 0), **const),
            pl.BlockSpec((1, C2), lambda n, h: (0, 0), **const),
            pl.BlockSpec((C2, Cout_p), lambda n, h: (0, 0), **const),
            pl.BlockSpec((1, Cout_p), lambda n, h: (0, 0), **const),
        ],
        out_specs=pl.BlockSpec((1, th * W, Cout_p), lambda n, h: (n, h, 0)),
        compiler_params=pltpu.CompilerParams(
            dimension_semantics=("parallel", "parallel"),
            # Re-derive per generation for real YOLO shapes (v7x physical is 64 MiB).
            vmem_limit_bytes=64 * 1024 * 1024),
    )(x_pad, w1c, bnb, w2c, b2p)

    out = out_flat.reshape(N, H, W, Cout_p)        # metadata-only reshape
    if Cout_p != Cout:
        out = out[..., :Cout]
    return out


def scale_prediction(x_nchw, w1, bn_bias, w2, b2, *, row_block=None,
                     compute_dtype=jnp.bfloat16, single_buffer_weights=True):
    """Torch-compatible interface: x (N, Cin, H, W) -> (N, (num_classes+5)*3, H, W).

    The two transposes are full HBM passes outside the kernel; keep the model in
    NHWC and call scale_prediction_nhwc to avoid them."""
    x = jnp.transpose(x_nchw, (0, 2, 3, 1))
    out = scale_prediction_nhwc(x, w1, bn_bias, w2, b2, row_block=row_block,
                                compute_dtype=compute_dtype,
                                single_buffer_weights=single_buffer_weights)
    return jnp.transpose(out, (0, 3, 1, 2))


def init_params(key, in_channels, num_classes, *, weight_dtype=jnp.bfloat16):
    """Deterministic synthetic parameters matching the torch module's shapes,
    pre-laid-out for the kernel: (9, Cin, C2) taps, BN scale folded into the 3x3
    weight, weights stored in bf16 (cast once, not per-step)."""
    c_in = in_channels
    c_mid = 2 * in_channels
    c_out = (num_classes + 5) * 3
    k1, k2, k3, k4, k5, k6, k7 = jax.random.split(key, 7)

    # Conv2d(c_in, c_mid, k=3, padding=1, bias=False): torch weight (c_mid, c_in, 3, 3)
    w1_torch = jax.random.normal(k1, (c_mid, c_in, 3, 3), jnp.float32) * 0.1
    w1 = jnp.transpose(w1_torch, (2, 3, 1, 0)).reshape(9, c_in, c_mid)  # tap = dy*3+dx

    # BatchNorm2d(c_mid), inference semantics folded to per-channel scale/bias.
    gamma = 1.0 + 0.1 * jax.random.normal(k2, (c_mid,), jnp.float32)
    beta = 0.1 * jax.random.normal(k3, (c_mid,), jnp.float32)
    running_mean = 0.1 * jax.random.normal(k4, (c_mid,), jnp.float32)
    running_var = jnp.abs(1.0 + 0.1 * jax.random.normal(k5, (c_mid,), jnp.float32))
    eps = 1e-5
    bn_scale = gamma / jnp.sqrt(running_var + eps)
    bn_bias = (beta - running_mean * bn_scale).reshape(1, c_mid).astype(jnp.float32)
    w1 = (w1 * bn_scale[None, None, :]).astype(weight_dtype)  # fold BN scale (conv is linear)

    # Conv2d(c_mid, c_out, k=1, bias=True): torch weight (c_out, c_mid, 1, 1)
    w2_torch = jax.random.normal(k6, (c_out, c_mid, 1, 1), jnp.float32) * 0.1
    w2 = jnp.transpose(w2_torch[:, :, 0, 0], (1, 0)).astype(weight_dtype)  # (c_mid, c_out)
    b2 = (0.1 * jax.random.normal(k7, (c_out,), jnp.float32)).reshape(1, c_out)

    return w1, bn_bias, w2, b2


def _reference_nchw(x_nchw, w1, bn_bias, w2, b2):
    """Pure-XLA reference with identical math (folded bf16 weights, f32 accum)."""
    x = jnp.transpose(x_nchw, (0, 2, 3, 1))
    Cin = x.shape[-1]
    C2 = w1.shape[-1]
    Cout = w2.shape[-1]
    xb = x.astype(w1.dtype)
    w_hwio = w1.reshape(3, 3, Cin, C2)
    y = jax.lax.conv_general_dilated(
        xb, w_hwio, window_strides=(1, 1), padding=((1, 1), (1, 1)),
        dimension_numbers=("NHWC", "HWIO", "NHWC"),
        preferred_element_type=jnp.float32)
    y = y + bn_bias.reshape(1, 1, 1, C2)
    y = jnp.maximum(y, 0.2 * y)
    out = jnp.einsum("nhwc,cd->nhwd", y.astype(w2.dtype), w2,
                     preferred_element_type=jnp.float32) + b2.reshape(1, 1, 1, Cout)
    out = out.astype(x_nchw.dtype)
    return jnp.transpose(out, (0, 3, 1, 2))


if __name__ == "__main__":
    in_channels = 4
    num_classes = 3                      # -> out channels = (3+5)*3 = 24
    N, H, W = 2, 16, 16

    key = jax.random.PRNGKey(0)
    kx, kp = jax.random.split(key)
    x = jax.random.normal(kx, (N, in_channels, H, W), jnp.float32)
    params = init_params(kp, in_channels, num_classes)

    try:
        out = jax.block_until_ready(jax.jit(scale_prediction)(x, *params))
    except Exception:
        # Fallback if this jax build rejects pipeline_mode=pl.Buffered(1) in pallas_call.
        fn = jax.jit(functools.partial(scale_prediction, single_buffer_weights=False))
        out = jax.block_until_ready(fn(x, *params))

    expected_shape = (N, (num_classes + 5) * 3, H, W)
    assert out.shape == expected_shape, (out.shape, expected_shape)
    assert jnp.all(jnp.isfinite(out))

    ref = _reference_nchw(x, *params)
    assert jnp.allclose(out, ref, atol=5e-3, rtol=5e-3), float(
        jnp.max(jnp.abs(out - ref)))

    print("KERNEL_OK")
</pallas_src>

<mosaic_0001>
module attributes {stable_mosaic.version = 11 : i64} {
  func.func @_scale_pred_kernel(%arg0: i32, %arg1: i32, %arg2: memref<1x18x18x4xbf16, #tpu.memory_space<vmem>>, %arg3: memref<9x4x8xbf16, #tpu.memory_space<vmem>>, %arg4: memref<1x8xf32, #tpu.memory_space<vmem>>, %arg5: memref<8x128xbf16, #tpu.memory_space<vmem>>, %arg6: memref<1x128xf32, #tpu.memory_space<vmem>>, %arg7: memref<1x128x128xf32, #tpu.memory_space<vmem>>) attributes {dimension_semantics = [#tpu.dimension_semantics<parallel>, #tpu.dimension_semantics<parallel>], iteration_bounds = array<i64: 2, 2>, scalar_prefetch = 0 : i64, scratch_operands = 0 : i64, tpu.core_type = #tpu.core_type<tc>, window_params = [{transform_indices = @transform_0, window_bounds = array<i64: 1, 18, 18, 4>}, {pipeline_mode = #tpu.pipeline_mode<synchronous>, transform_indices = @transform_1, window_bounds = array<i64: 9, 4, 8>}, {pipeline_mode = #tpu.pipeline_mode<synchronous>, transform_indices = @transform_2, window_bounds = array<i64: 1, 8>}, {pipeline_mode = #tpu.pipeline_mode<synchronous>, transform_indices = @transform_3, window_bounds = array<i64: 8, 128>}, {pipeline_mode = #tpu.pipeline_mode<synchronous>, transform_indices = @transform_4, window_bounds = array<i64: 1, 128>}, {transform_indices = @transform_5, window_bounds = array<i64: 1, 128, 128>}]} {
    %c8_i32 = arith.constant 8 : i32
    %0 = arith.muli %arg1, %c8_i32 : i32
    %1 = tpu.assume_multiple %0, 8 : i32
    %c0_i32 = arith.constant 0 : i32
    %2 = arith.addi %1, %c0_i32 : i32
    %c0 = arith.constant 0 : index
    %3 = arith.index_cast %2 : i32 to index
    %c0_0 = arith.constant 0 : index
    %c0_1 = arith.constant 0 : index
    %4 = vector.load %arg2[%c0, %3, %c0_0, %c0_1] : memref<1x18x18x4xbf16, #tpu.memory_space<vmem>>, vector<1x8x16x4xbf16>
    %5 = vector.shape_cast %4 : vector<1x8x16x4xbf16> to vector<8x16x4xbf16>
    %6 = vector.shape_cast %5 : vector<8x16x4xbf16> to vector<128x4xbf16>
    %c0_2 = arith.constant 0 : index
    %c0_3 = arith.constant 0 : index
    %c0_4 = arith.constant 0 : index
    %7 = vector.load %arg3[%c0_2, %c0_3, %c0_4] : memref<9x4x8xbf16, #tpu.memory_space<vmem>>, vector<1x4x8xbf16>
    %8 = vector.shape_cast %7 : vector<1x4x8xbf16> to vector<4x8xbf16>
    %cst = arith.constant dense<0.000000e+00> : vector<128x8xf32>
    %9 = tpu.matmul %6, %8, %cst {dimension_numbers = #tpu.dot_dimension_numbers<[1], [0], [0], [1], [0, 0, 1, 1], [], []>} : vector<128x4xbf16>, vector<4x8xbf16>, vector<128x8xf32> -> vector<128x8xf32>
    %c0_i32_5 = arith.constant 0 : i32
    %10 = arith.addi %1, %c0_i32_5 : i32
    %c0_6 = arith.constant 0 : index
    %11 = arith.index_cast %10 : i32 to index
    %c1 = arith.constant 1 : index
    %c0_7 = arith.constant 0 : index
    %12 = vector.load %arg2[%c0_6, %11, %c1, %c0_7] : memref<1x18x18x4xbf16, #tpu.memory_space<vmem>>, vector<1x8x16x4xbf16>
    %13 = vector.shape_cast %12 : vector<1x8x16x4xbf16> to vector<8x16x4xbf16>
    %14 = vector.shape_cast %13 : vector<8x16x4xbf16> to vector<128x4xbf16>
    %c1_8 = arith.constant 1 : index
    %c0_9 = arith.constant 0 : index
    %c0_10 = arith.constant 0 : index
    %15 = vector.load %arg3[%c1_8, %c0_9, %c0_10] : memref<9x4x8xbf16, #tpu.memory_space<vmem>>, vector<1x4x8xbf16>
    %16 = vector.shape_cast %15 : vector<1x4x8xbf16> to vector<4x8xbf16>
    %cst_11 = arith.constant dense<0.000000e+00> : vector<128x8xf32>
    %17 = tpu.matmul %14, %16, %cst_11 {dimension_numbers = #tpu.dot_dimension_numbers<[1], [0], [0], [1], [0, 0, 1, 1], [], []>} : vector<128x4xbf16>, vector<4x8xbf16>, vector<128x8xf32> -> vector<128x8xf32>
    %18 = arith.addf %9, %17 : vector<128x8xf32>
    %c0_i32_12 = arith.constant 0 : i32
    %19 = arith.addi %1, %c0_i32_12 : i32
    %c0_13 = arith.constant 0 : index
    %20 = arith.index_cast %19 : i32 to index
    %c2 = arith.constant 2 : index
    %c0_14 = arith.constant 0 : index
    %21 = vector.load %arg2[%c0_13, %20, %c2, %c0_14] : memref<1x18x18x4xbf16, #tpu.memory_space<vmem>>, vector<1x8x16x4xbf16>
    %22 = vector.shape_cast %21 : vector<1x8x16x4xbf16> to vector<8x16x4xbf16>
    %23 = vector.shape_cast %22 : vector<8x16x4xbf16> to vector<128x4xbf16>
    %c2_15 = arith.constant 2 : index
    %c0_16 = arith.constant 0 : index
    %c0_17 = arith.constant 0 : index
    %24 = vector.load %arg3[%c2_15, %c0_16, %c0_17] : memref<9x4x8xbf16, #tpu.memory_space<vmem>>, vector<1x4x8xbf16>
    %25 = vector.shape_cast %24 : vector<1x4x8xbf16> to vector<4x8xbf16>
    %cst_18 = arith.constant dense<0.000000e+00> : vector<128x8xf32>
    %26 = tpu.matmul %23, %25, %cst_18 {dimension_numbers = #tpu.dot_dimension_numbers<[1], [0], [0], [1], [0, 0, 1, 1], [], []>} : vector<128x4xbf16>, vector<4x8xbf16>, vector<128x8xf32> -> vector<128x8xf32>
    %27 = arith.addf %18, %26 : vector<128x8xf32>
    %c1_i32 = arith.constant 1 : i32
    %28 = arith.addi %1, %c1_i32 : i32
    %c0_19 = arith.constant 0 : index
    %29 = arith.index_cast %28 : i32 to index
    %c0_20 = arith.constant 0 : index
    %c0_21 = arith.constant 0 : index
    %30 = vector.load %arg2[%c0_19, %29, %c0_20, %c0_21] : memref<1x18x18x4xbf16, #tpu.memory_space<vmem>>, vector<1x8x16x4xbf16>
    %31 = vector.shape_cast %30 : vector<1x8x16x4xbf16> to vector<8x16x4xbf16>
    %32 = vector.shape_cast %31 : vector<8x16x4xbf16> to vector<128x4xbf16>
    %c3 = arith.constant 3 : index
    %c0_22 = arith.constant 0 : index
    %c0_23 = arith.constant 0 : index
    %33 = vector.load %arg3[%c3, %c0_22, %c0_23] : memref<9x4x8xbf16, #tpu.memory_space<vmem>>, vector<1x4x8xbf16>
    %34 = vector.shape_cast %33 : vector<1x4x8xbf16> to vector<4x8xbf16>
    %cst_24 = arith.constant dense<0.000000e+00> : vector<128x8xf32>
    %35 = tpu.matmul %32, %34, %cst_24 {dimension_numbers = #tpu.dot_dimension_numbers<[1], [0], [0], [1], [0, 0, 1, 1], [], []>} : vector<128x4xbf16>, vector<4x8xbf16>, vector<128x8xf32> -> vector<128x8xf32>
    %36 = arith.addf %27, %35 : vector<128x8xf32>
    %c1_i32_25 = arith.constant 1 : i32
    %37 = arith.addi %1, %c1_i32_25 : i32
    %c0_26 = arith.constant 0 : index
    %38 = arith.index_cast %37 : i32 to index
    %c1_27 = arith.constant 1 : index
    %c0_28 = arith.constant 0 : index
    %39 = vector.load %arg2[%c0_26, %38, %c1_27, %c0_28] : memref<1x18x18x4xbf16, #tpu.memory_space<vmem>>, vector<1x8x16x4xbf16>
    %40 = vector.shape_cast %39 : vector<1x8x16x4xbf16> to vector<8x16x4xbf16>
    %41 = vector.shape_cast %40 : vector<8x16x4xbf16> to vector<128x4xbf16>
    %c4 = arith.constant 4 : index
    %c0_29 = arith.constant 0 : index
    %c0_30 = arith.constant 0 : index
    %42 = vector.load %arg3[%c4, %c0_29, %c0_30] : memref<9x4x8xbf16, #tpu.memory_space<vmem>>, vector<1x4x8xbf16>
    %43 = vector.shape_cast %42 : vector<1x4x8xbf16> to vector<4x8xbf16>
    %cst_31 = arith.constant dense<0.000000e+00> : vector<128x8xf32>
    %44 = tpu.matmul %41, %43, %cst_31 {dimension_numbers = #tpu.dot_dimension_numbers<[1], [0], [0], [1], [0, 0, 1, 1], [], []>} : vector<128x4xbf16>, vector<4x8xbf16>, vector<128x8xf32> -> vector<128x8xf32>
    %45 = arith.addf %36, %44 : vector<128x8xf32>
    %c1_i32_32 = arith.constant 1 : i32
    %46 = arith.addi %1, %c1_i32_32 : i32
    %c0_33 = arith.constant 0 : index
    %47 = arith.index_cast %46 : i32 to index
    %c2_34 = arith.constant 2 : index
    %c0_35 = arith.constant 0 : index
    %48 = vector.load %arg2[%c0_33, %47, %c2_34, %c0_35] : memref<1x18x18x4xbf16, #tpu.memory_space<vmem>>, vector<1x8x16x4xbf16>
    %49 = vector.shape_cast %48 : vector<1x8x16x4xbf16> to vector<8x16x4xbf16>
    %50 = vector.shape_cast %49 : vector<8x16x4xbf16> to vector<128x4xbf16>
    %c5 = arith.constant 5 : index
    %c0_36 = arith.constant 0 : index
    %c0_37 = arith.constant 0 : index
    %51 = vector.load %arg3[%c5, %c0_36, %c0_37] : memref<9x4x8xbf16, #tpu.memory_space<vmem>>, vector<1x4x8xbf16>
    %52 = vector.shape_cast %51 : vector<1x4x8xbf16> to vector<4x8xbf16>
    %cst_38 = arith.constant dense<0.000000e+00> : vector<128x8xf32>
    %53 = tpu.matmul %50, %52, %cst_38 {dimension_numbers = #tpu.dot_dimension_numbers<[1], [0], [0], [1], [0, 0, 1, 1], [], []>} : vector<128x4xbf16>, vector<4x8xbf16>, vector<128x8xf32> -> vector<128x8xf32>
    %54 = arith.addf %45, %53 : vector<128x8xf32>
    %c2_i32 = arith.constant 2 : i32
    %55 = arith.addi %1, %c2_i32 : i32
    %c0_39 = arith.constant 0 : index
    %56 = arith.index_cast %55 : i32 to index
    %c0_40 = arith.constant 0 : index
    %c0_41 = arith.constant 0 : index
    %57 = vector.load %arg2[%c0_39, %56, %c0_40, %c0_41] : memref<1x18x18x4xbf16, #tpu.memory_space<vmem>>, vector<1x8x16x4xbf16>
    %58 = vector.shape_cast %57 : vector<1x8x16x4xbf16> to vector<8x16x4xbf16>
    %59 = vector.shape_cast %58 : vector<8x16x4xbf16> to vector<128x4xbf16>
    %c6 = arith.constant 6 : index
    %c0_42 = arith.constant 0 : index
    %c0_43 = arith.constant 0 : index
    %60 = vector.load %arg3[%c6, %c0_42, %c0_43] : memref<9x4x8xbf16, #tpu.memory_space<vmem>>, vector<1x4x8xbf16>
    %61 = vector.shape_cast %60 : vector<1x4x8xbf16> to vector<4x8xbf16>
    %cst_44 = arith.constant dense<0.000000e+00> : vector<128x8xf32>
    %62 = tpu.matmul %59, %61, %cst_44 {dimension_numbers = #tpu.dot_dimension_numbers<[1], [0], [0], [1], [0, 0, 1, 1], [], []>} : vector<128x4xbf16>, vector<4x8xbf16>, vector<128x8xf32> -> vector<128x8xf32>
    %63 = arith.addf %54, %62 : vector<128x8xf32>
    %c2_i32_45 = arith.constant 2 : i32
    %64 = arith.addi %1, %c2_i32_45 : i32
    %c0_46 = arith.constant 0 : index
    %65 = arith.index_cast %64 : i32 to index
    %c1_47 = arith.constant 1 : index
    %c0_48 = arith.constant 0 : index
    %66 = vector.load %arg2[%c0_46, %65, %c1_47, %c0_48] : memref<1x18x18x4xbf16, #tpu.memory_space<vmem>>, vector<1x8x16x4xbf16>
    %67 = vector.shape_cast %66 : vector<1x8x16x4xbf16> to vector<8x16x4xbf16>
    %68 = vector.shape_cast %67 : vector<8x16x4xbf16> to vector<128x4xbf16>
    %c7 = arith.constant 7 : index
    %c0_49 = arith.constant 0 : index
    %c0_50 = arith.constant 0 : index
    %69 = vector.load %arg3[%c7, %c0_49, %c0_50] : memref<9x4x8xbf16, #tpu.memory_space<vmem>>, vector<1x4x8xbf16>
    %70 = vector.shape_cast %69 : vector<1x4x8xbf16> to vector<4x8xbf16>
    %cst_51 = arith.constant dense<0.000000e+00> : vector<128x8xf32>
    %71 = tpu.matmul %68, %70, %cst_51 {dimension_numbers = #tpu.dot_dimension_numbers<[1], [0], [0], [1], [0, 0, 1, 1], [], []>} : vector<128x4xbf16>, vector<4x8xbf16>, vector<128x8xf32> -> vector<128x8xf32>
    %72 = arith.addf %63, %71 : vector<128x8xf32>
    %c2_i32_52 = arith.constant 2 : i32
    %73 = arith.addi %1, %c2_i32_52 : i32
    %c0_53 = arith.constant 0 : index
    %74 = arith.index_cast %73 : i32 to index
    %c2_54 = arith.constant 2 : index
    %c0_55 = arith.constant 0 : index
    %75 = vector.load %arg2[%c0_53, %74, %c2_54, %c0_55] : memref<1x18x18x4xbf16, #tpu.memory_space<vmem>>, vector<1x8x16x4xbf16>
    %76 = vector.shape_cast %75 : vector<1x8x16x4xbf16> to vector<8x16x4xbf16>
    %77 = vector.shape_cast %76 : vector<8x16x4xbf16> to vector<128x4xbf16>
    %c8 = arith.constant 8 : index
    %c0_56 = arith.constant 0 : index
    %c0_57 = arith.constant 0 : index
    %78 = vector.load %arg3[%c8, %c0_56, %c0_57] : memref<9x4x8xbf16, #tpu.memory_space<vmem>>, vector<1x4x8xbf16>
    %79 = vector.shape_cast %78 : vector<1x4x8xbf16> to vector<4x8xbf16>
    %cst_58 = arith.constant dense<0.000000e+00> : vector<128x8xf32>
    %80 = tpu.matmul %77, %79, %cst_58 {dimension_numbers = #tpu.dot_dimension_numbers<[1], [0], [0], [1], [0, 0, 1, 1], [], []>} : vector<128x4xbf16>, vector<4x8xbf16>, vector<128x8xf32> -> vector<128x8xf32>
    %81 = arith.addf %72, %80 : vector<128x8xf32>
    %c0_59 = arith.constant 0 : index
    %c0_60 = arith.constant 0 : index
    %82 = vector.load %arg4[%c0_59, %c0_60] : memref<1x8xf32, #tpu.memory_space<vmem>>, vector<1x8xf32>
    %83 = vector.broadcast %82 : vector<1x8xf32> to vector<128x8xf32>
    %84 = arith.addf %81, %83 : vector<128x8xf32>
    %cst_61 = arith.constant 2.000000e-01 : f32
    %85 = vector.broadcast %cst_61 : f32 to vector<128x8xf32>
    %86 = arith.mulf %85, %84 : vector<128x8xf32>
    %87 = arith.maximumf %84, %86 : vector<128x8xf32>
    %88 = arith.truncf %87 : vector<128x8xf32> to vector<128x8xbf16>
    %c0_62 = arith.constant 0 : index
    %c0_63 = arith.constant 0 : index
    %89 = vector.load %arg5[%c0_62, %c0_63] : memref<8x128xbf16, #tpu.memory_space<vmem>>, vector<8x128xbf16>
    %cst_64 = arith.constant dense<0.000000e+00> : vector<128x128xf32>
    %90 = tpu.matmul %88, %89, %cst_64 {dimension_numbers = #tpu.dot_dimension_numbers<[1], [0], [0], [1], [0, 0, 1, 1], [], []>} : vector<128x8xbf16>, vector<8x128xbf16>, vector<128x128xf32> -> vector<128x128xf32>
    %c0_65 = arith.constant 0 : index
    %c0_66 = arith.constant 0 : index
    %91 = vector.load %arg6[%c0_65, %c0_66] : memref<1x128xf32, #tpu.memory_space<vmem>>, vector<1x128xf32>
    %92 = vector.broadcast %91 : vector<1x128xf32> to vector<128x128xf32>
    %93 = arith.addf %90, %92 : vector<128x128xf32>
    %c0_67 = arith.constant 0 : index
    %c0_68 = arith.constant 0 : index
    %c0_69 = arith.constant 0 : index
    %94 = vector.load %arg7[%c0_67, %c0_68, %c0_69] : memref<1x128x128xf32, #tpu.memory_space<vmem>>, vector<1x128x128xf32>
    %95 = vector.shape_cast %94 : vector<1x128x128xf32> to vector<128x128xf32>
    %96 = vector.shape_cast %93 : vector<128x128xf32> to vector<1x128x128xf32>
    tpu.vector_store %arg7[%c0_67, %c0_68, %c0_69], %96 {strides = array<i32>} : memref<1x128x128xf32, #tpu.memory_space<vmem>>, vector<1x128x128xf32>,
    return
  }
  func.func @transform_0(%arg0: i32, %arg1: i32) -> (i32, i32, i32, i32) {
    %c0_i32 = arith.constant 0 : i32
    %c0_i32_0 = arith.constant 0 : i32
    %c0_i32_1 = arith.constant 0 : i32
    %c0_i32_2 = arith.constant 0 : i32
    return %arg0, %c0_i32, %c0_i32_0, %c0_i32_1 : i32, i32, i32, i32
  }
  func.func @transform_1(%arg0: i32, %arg1: i32) -> (i32, i32, i32) {
    %c0_i32 = arith.constant 0 : i32
    %c0_i32_0 = arith.constant 0 : i32
    %c0_i32_1 = arith.constant 0 : i32
    %c0_i32_2 = arith.constant 0 : i32
    return %c0_i32, %c0_i32_0, %c0_i32_1 : i32, i32, i32
  }
  func.func @transform_2(%arg0: i32, %arg1: i32) -> (i32, i32) {
    %c0_i32 = arith.constant 0 : i32
    %c0_i32_0 = arith.constant 0 : i32
    %c0_i32_1 = arith.constant 0 : i32
    return %c0_i32, %c0_i32_0 : i32, i32
  }
  func.func @transform_3(%arg0: i32, %arg1: i32) -> (i32, i32) {
    %c0_i32 = arith.constant 0 : i32
    %c0_i32_0 = arith.constant 0 : i32
    %c0_i32_1 = arith.constant 0 : i32
    return %c0_i32, %c0_i32_0 : i32, i32
  }
  func.func @transform_4(%arg0: i32, %arg1: i32) -> (i32, i32) {
    %c0_i32 = arith.constant 0 : i32
    %c0_i32_0 = arith.constant 0 : i32
    %c0_i32_1 = arith.constant 0 : i32
    return %c0_i32, %c0_i32_0 : i32, i32
  }
  func.func @transform_5(%arg0: i32, %arg1: i32) -> (i32, i32, i32) {
    %c0_i32 = arith.constant 0 : i32
    %c0_i32_0 = arith.constant 0 : i32
    return %arg0, %arg1, %c0_i32 : i32, i32, i32
  }
}

module attributes {stable_mosaic.version = 11 : i64} {
  func.func @_scale_pred_kernel(%arg0: i32, %arg1: i32, %arg2: memref<1x18x18x4xbf16, #tpu.memory_space<vmem>>, %arg3: memref<9x4x8xbf16, #tpu.memory_space<vmem>>, %arg4: memref<1x8xf32, #tpu.memory_space<vmem>>, %arg5: memref<8x128xbf16, #tpu.memory_space<vmem>>, %arg6: memref<1x128xf32, #tpu.memory_space<vmem>>, %arg7: memref<1x128x128xf32, #tpu.memory_space<vmem>>) attributes {dimension_semantics = [#tpu.dimension_semantics<parallel>, #tpu.dimension_semantics<parallel>], iteration_bounds = array<i64: 2, 2>, scalar_prefetch = 0 : i64, scratch_operands = 0 : i64, tpu.core_type = #tpu.core_type<tc>, window_params = [{transform_indices = @transform_0, window_bounds = array<i64: 1, 18, 18, 4>}, {pipeline_mode = #tpu.pipeline_mode<synchronous>, transform_indices = @transform_1, window_bounds = array<i64: 9, 4, 8>}, {pipeline_mode = #tpu.pipeline_mode<synchronous>, transform_indices = @transform_2, window_bounds = array<i64: 1, 8>}, {pipeline_mode = #tpu.pipeline_mode<synchronous>, transform_indices = @transform_3, window_bounds = array<i64: 8, 128>}, {pipeline_mode = #tpu.pipeline_mode<synchronous>, transform_indices = @transform_4, window_bounds = array<i64: 1, 128>}, {transform_indices = @transform_5, window_bounds = array<i64: 1, 128, 128>}]} {
    %c8_i32 = arith.constant 8 : i32
    %0 = arith.muli %arg1, %c8_i32 : i32
    %1 = tpu.assume_multiple %0, 8 : i32
    %c0_i32 = arith.constant 0 : i32
    %2 = arith.addi %1, %c0_i32 : i32
    %c0 = arith.constant 0 : index
    %3 = arith.index_cast %2 : i32 to index
    %c0_0 = arith.constant 0 : index
    %c0_1 = arith.constant 0 : index
    %4 = vector.load %arg2[%c0, %3, %c0_0, %c0_1] : memref<1x18x18x4xbf16, #tpu.memory_space<vmem>>, vector<1x8x16x4xbf16>
    %5 = vector.shape_cast %4 : vector<1x8x16x4xbf16> to vector<8x16x4xbf16>
    %6 = vector.shape_cast %5 : vector<8x16x4xbf16> to vector<128x4xbf16>
    %c0_2 = arith.constant 0 : index
    %c0_3 = arith.constant 0 : index
    %c0_4 = arith.constant 0 : index
    %7 = vector.load %arg3[%c0_2, %c0_3, %c0_4] : memref<9x4x8xbf16, #tpu.memory_space<vmem>>, vector<1x4x8xbf16>
    %8 = vector.shape_cast %7 : vector<1x4x8xbf16> to vector<4x8xbf16>
    %cst = arith.constant dense<0.000000e+00> : vector<128x8xf32>
    %9 = tpu.matmul %6, %8, %cst {dimension_numbers = #tpu.dot_dimension_numbers<[1], [0], [0], [1], [0, 0, 1, 1], [], []>} : vector<128x4xbf16>, vector<4x8xbf16>, vector<128x8xf32> -> vector<128x8xf32>
    %c0_i32_5 = arith.constant 0 : i32
    %10 = arith.addi %1, %c0_i32_5 : i32
    %c0_6 = arith.constant 0 : index
    %11 = arith.index_cast %10 : i32 to index
    %c1 = arith.constant 1 : index
    %c0_7 = arith.constant 0 : index
    %12 = vector.load %arg2[%c0_6, %11, %c1, %c0_7] : memref<1x18x18x4xbf16, #tpu.memory_space<vmem>>, vector<1x8x16x4xbf16>
    %13 = vector.shape_cast %12 : vector<1x8x16x4xbf16> to vector<8x16x4xbf16>
    %14 = vector.shape_cast %13 : vector<8x16x4xbf16> to vector<128x4xbf16>
    %c1_8 = arith.constant 1 : index
    %c0_9 = arith.constant 0 : index
    %c0_10 = arith.constant 0 : index
    %15 = vector.load %arg3[%c1_8, %c0_9, %c0_10] : memref<9x4x8xbf16, #tpu.memory_space<vmem>>, vector<1x4x8xbf16>
    %16 = vector.shape_cast %15 : vector<1x4x8xbf16> to vector<4x8xbf16>
    %cst_11 = arith.constant dense<0.000000e+00> : vector<128x8xf32>
    %17 = tpu.matmul %14, %16, %cst_11 {dimension_numbers = #tpu.dot_dimension_numbers<[1], [0], [0], [1], [0, 0, 1, 1], [], []>} : vector<128x4xbf16>, vector<4x8xbf16>, vector<128x8xf32> -> vector<128x8xf32>
    %18 = arith.addf %9, %17 : vector<128x8xf32>
    %c0_i32_12 = arith.constant 0 : i32
    %19 = arith.addi %1, %c0_i32_12 : i32
    %c0_13 = arith.constant 0 : index
    %20 = arith.index_cast %19 : i32 to index
    %c2 = arith.constant 2 : index
    %c0_14 = arith.constant 0 : index
    %21 = vector.load %arg2[%c0_13, %20, %c2, %c0_14] : memref<1x18x18x4xbf16, #tpu.memory_space<vmem>>, vector<1x8x16x4xbf16>
    %22 = vector.shape_cast %21 : vector<1x8x16x4xbf16> to vector<8x16x4xbf16>
    %23 = vector.shape_cast %22 : vector<8x16x4xbf16> to vector<128x4xbf16>
    %c2_15 = arith.constant 2 : index
    %c0_16 = arith.constant 0 : index
    %c0_17 = arith.constant 0 : index
    %24 = vector.load %arg3[%c2_15, %c0_16, %c0_17] : memref<9x4x8xbf16, #tpu.memory_space<vmem>>, vector<1x4x8xbf16>
    %25 = vector.shape_cast %24 : vector<1x4x8xbf16> to vector<4x8xbf16>
    %cst_18 = arith.constant dense<0.000000e+00> : vector<128x8xf32>
    %26 = tpu.matmul %23, %25, %cst_18 {dimension_numbers = #tpu.dot_dimension_numbers<[1], [0], [0], [1], [0, 0, 1, 1], [], []>} : vector<128x4xbf16>, vector<4x8xbf16>, vector<128x8xf32> -> vector<128x8xf32>
    %27 = arith.addf %18, %26 : vector<128x8xf32>
    %c1_i32 = arith.constant 1 : i32
    %28 = arith.addi %1, %c1_i32 : i32
    %c0_19 = arith.constant 0 : index
    %29 = arith.index_cast %28 : i32 to index
    %c0_20 = arith.constant 0 : index
    %c0_21 = arith.constant 0 : index
    %30 = vector.load %arg2[%c0_19, %29, %c0_20, %c0_21] : memref<1x18x18x4xbf16, #tpu.memory_space<vmem>>, vector<1x8x16x4xbf16>
    %31 = vector.shape_cast %30 : vector<1x8x16x4xbf16> to vector<8x16x4xbf16>
    %32 = vector.shape_cast %31 : vector<8x16x4xbf16> to vector<128x4xbf16>
    %c3 = arith.constant 3 : index
    %c0_22 = arith.constant 0 : index
    %c0_23 = arith.constant 0 : index
    %33 = vector.load %arg3[%c3, %c0_22, %c0_23] : memref<9x4x8xbf16, #tpu.memory_space<vmem>>, vector<1x4x8xbf16>
    %34 = vector.shape_cast %33 : vector<1x4x8xbf16> to vector<4x8xbf16>
    %cst_24 = arith.constant dense<0.000000e+00> : vector<128x8xf32>
    %35 = tpu.matmul %32, %34, %cst_24 {dimension_numbers = #tpu.dot_dimension_numbers<[1], [0], [0], [1], [0, 0, 1, 1], [], []>} : vector<128x4xbf16>, vector<4x8xbf16>, vector<128x8xf32> -> vector<128x8xf32>
    %36 = arith.addf %27, %35 : vector<128x8xf32>
    %c1_i32_25 = arith.constant 1 : i32
    %37 = arith.addi %1, %c1_i32_25 : i32
    %c0_26 = arith.constant 0 : index
    %38 = arith.index_cast %37 : i32 to index
    %c1_27 = arith.constant 1 : index
    %c0_28 = arith.constant 0 : index
    %39 = vector.load %arg2[%c0_26, %38, %c1_27, %c0_28] : memref<1x18x18x4xbf16, #tpu.memory_space<vmem>>, vector<1x8x16x4xbf16>
    %40 = vector.shape_cast %39 : vector<1x8x16x4xbf16> to vector<8x16x4xbf16>
    %41 = vector.shape_cast %40 : vector<8x16x4xbf16> to vector<128x4xbf16>
    %c4 = arith.constant 4 : index
    %c0_29 = arith.constant 0 : index
    %c0_30 = arith.constant 0 : index
    %42 = vector.load %arg3[%c4, %c0_29, %c0_30] : memref<9x4x8xbf16, #tpu.memory_space<vmem>>, vector<1x4x8xbf16>
    %43 = vector.shape_cast %42 : vector<1x4x8xbf16> to vector<4x8xbf16>
    %cst_31 = arith.constant dense<0.000000e+00> : vector<128x8xf32>
    %44 = tpu.matmul %41, %43, %cst_31 {dimension_numbers = #tpu.dot_dimension_numbers<[1], [0], [0], [1], [0, 0, 1, 1], [], []>} : vector<128x4xbf16>, vector<4x8xbf16>, vector<128x8xf32> -> vector<128x8xf32>
    %45 = arith.addf %36, %44 : vector<128x8xf32>
    %c1_i32_32 = arith.constant 1 : i32
    %46 = arith.addi %1, %c1_i32_32 : i32
    %c0_33 = arith.constant 0 : index
    %47 = arith.index_cast %46 : i32 to index
    %c2_34 = arith.constant 2 : index
    %c0_35 = arith.constant 0 : index
    %48 = vector.load %arg2[%c0_33, %47, %c2_34, %c0_35] : memref<1x18x18x4xbf16, #tpu.memory_space<vmem>>, vector<1x8x16x4xbf16>
    %49 = vector.shape_cast %48 : vector<1x8x16x4xbf16> to vector<8x16x4xbf16>
    %50 = vector.shape_cast %49 : vector<8x16x4xbf16> to vector<128x4xbf16>
    %c5 = arith.constant 5 : index
    %c0_36 = arith.constant 0 : index
    %c0_37 = arith.constant 0 : index
    %51 = vector.load %arg3[%c5, %c0_36, %c0_37] : memref<9x4x8xbf16, #tpu.memory_space<vmem>>, vector<1x4x8xbf16>
    %52 = vector.shape_cast %51 : vector<1x4x8xbf16> to vector<4x8xbf16>
    %cst_38 = arith.constant dense<0.000000e+00> : vector<128x8xf32>
    %53 = tpu.matmul %50, %52, %cst_38 {dimension_numbers = #tpu.dot_dimension_numbers<[1], [0], [0], [1], [0, 0, 1, 1], [], []>} : vector<128x4xbf16>, vector<4x8xbf16>, vector<128x8xf32> -> vector<128x8xf32>
    %54 = arith.addf %45, %53 : vector<128x8xf32>
    %c2_i32 = arith.constant 2 : i32
    %55 = arith.addi %1, %c2_i32 : i32
    %c0_39 = arith.constant 0 : index
    %56 = arith.index_cast %55 : i32 to index
    %c0_40 = arith.constant 0 : index
    %c0_41 = arith.constant 0 : index
    %57 = vector.load %arg2[%c0_39, %56, %c0_40, %c0_41] : memref<1x18x18x4xbf16, #tpu.memory_space<vmem>>, vector<1x8x16x4xbf16>
    %58 = vector.shape_cast %57 : vector<1x8x16x4xbf16> to vector<8x16x4xbf16>
    %59 = vector.shape_cast %58 : vector<8x16x4xbf16> to vector<128x4xbf16>
    %c6 = arith.constant 6 : index
    %c0_42 = arith.constant 0 : index
    %c0_43 = arith.constant 0 : index
    %60 = vector.load %arg3[%c6, %c0_42, %c0_43] : memref<9x4x8xbf16, #tpu.memory_space<vmem>>, vector<1x4x8xbf16>
    %61 = vector.shape_cast %60 : vector<1x4x8xbf16> to vector<4x8xbf16>
    %cst_44 = arith.constant dense<0.000000e+00> : vector<128x8xf32>
    %62 = tpu.matmul %59, %61, %cst_44 {dimension_numbers = #tpu.dot_dimension_numbers<[1], [0], [0], [1], [0, 0, 1, 1], [], []>} : vector<128x4xbf16>, vector<4x8xbf16>, vector<128x8xf32> -> vector<128x8xf32>
    %63 = arith.addf %54, %62 : vector<128x8xf32>
    %c2_i32_45 = arith.constant 2 : i32
    %64 = arith.addi %1, %c2_i32_45 : i32
    %c0_46 = arith.constant 0 : index
    %65 = arith.index_cast %64 : i32 to index
    %c1_47 = arith.constant 1 : index
    %c0_48 = arith.constant 0 : index
    %66 = vector.load %arg2[%c0_46, %65, %c1_47, %c0_48] : memref<1x18x18x4xbf16, #tpu.memory_space<vmem>>, vector<1x8x16x4xbf16>
    %67 = vector.shape_cast %66 : vector<1x8x16x4xbf16> to vector<8x16x4xbf16>
    %68 = vector.shape_cast %67 : vector<8x16x4xbf16> to vector<128x4xbf16>
    %c7 = arith.constant 7 : index
    %c0_49 = arith.constant 0 : index
    %c0_50 = arith.constant 0 : index
    %69 = vector.load %arg3[%c7, %c0_49, %c0_50] : memref<9x4x8xbf16, #tpu.memory_space<vmem>>, vector<1x4x8xbf16>
    %70 = vector.shape_cast %69 : vector<1x4x8xbf16> to vector<4x8xbf16>
    %cst_51 = arith.constant dense<0.000000e+00> : vector<128x8xf32>
    %71 = tpu.matmul %68, %70, %cst_51 {dimension_numbers = #tpu.dot_dimension_numbers<[1], [0], [0], [1], [0, 0, 1, 1], [], []>} : vector<128x4xbf16>, vector<4x8xbf16>, vector<128x8xf32> -> vector<128x8xf32>
    %72 = arith.addf %63, %71 : vector<128x8xf32>
    %c2_i32_52 = arith.constant 2 : i32
    %73 = arith.addi %1, %c2_i32_52 : i32
    %c0_53 = arith.constant 0 : index
    %74 = arith.index_cast %73 : i32 to index
    %c2_54 = arith.constant 2 : index
    %c0_55 = arith.constant 0 : index
    %75 = vector.load %arg2[%c0_53, %74, %c2_54, %c0_55] : memref<1x18x18x4xbf16, #tpu.memory_space<vmem>>, vector<1x8x16x4xbf16>
    %76 = vector.shape_cast %75 : vector<1x8x16x4xbf16> to vector<8x16x4xbf16>
    %77 = vector.shape_cast %76 : vector<8x16x4xbf16> to vector<128x4xbf16>
    %c8 = arith.constant 8 : index
    %c0_56 = arith.constant 0 : index
    %c0_57 = arith.constant 0 : index
    %78 = vector.load %arg3[%c8, %c0_56, %c0_57] : memref<9x4x8xbf16, #tpu.memory_space<vmem>>, vector<1x4x8xbf16>
    %79 = vector.shape_cast %78 : vector<1x4x8xbf16> to vector<4x8xbf16>
    %cst_58 = arith.constant dense<0.000000e+00> : vector<128x8xf32>
    %80 = tpu.matmul %77, %79, %cst_58 {dimension_numbers = #tpu.dot_dimension_numbers<[1], [0], [0], [1], [0, 0, 1, 1], [], []>} : vector<128x4xbf16>, vector<4x8xbf16>, vector<128x8xf32> -> vector<128x8xf32>
    %81 = arith.addf %72, %80 : vector<128x8xf32>
    %c0_59 = arith.constant 0 : index
    %c0_60 = arith.constant 0 : index
    %82 = vector.load %arg4[%c0_59, %c0_60] : memref<1x8xf32, #tpu.memory_space<vmem>>, vector<1x8xf32>
    %83 = vector.broadcast %82 : vector<1x8xf32> to vector<128x8xf32>
    %84 = arith.addf %81, %83 : vector<128x8xf32>
    %cst_61 = arith.constant 2.000000e-01 : f32
    %85 = vector.broadcast %cst_61 : f32 to vector<128x8xf32>
    %86 = arith.mulf %85, %84 : vector<128x8xf32>
    %87 = arith.maximumf %84, %86 : vector<128x8xf32>
    %88 = arith.truncf %87 : vector<128x8xf32> to vector<128x8xbf16>
    %c0_62 = arith.constant 0 : index
    %c0_63 = arith.constant 0 : index
    %89 = vector.load %arg5[%c0_62, %c0_63] : memref<8x128xbf16, #tpu.memory_space<vmem>>, vector<8x128xbf16>
    %cst_64 = arith.constant dense<0.000000e+00> : vector<128x128xf32>
    %90 = tpu.matmul %88, %89, %cst_64 {dimension_numbers = #tpu.dot_dimension_numbers<[1], [0], [0], [1], [0, 0, 1, 1], [], []>} : vector<128x8xbf16>, vector<8x128xbf16>, vector<128x128xf32> -> vector<128x128xf32>
    %c0_65 = arith.constant 0 : index
    %c0_66 = arith.constant 0 : index
    %91 = vector.load %arg6[%c0_65, %c0_66] : memref<1x128xf32, #tpu.memory_space<vmem>>, vector<1x128xf32>
    %92 = vector.broadcast %91 : vector<1x128xf32> to vector<128x128xf32>
    %93 = arith.addf %90, %92 : vector<128x128xf32>
    %c0_67 = arith.constant 0 : index
    %c0_68 = arith.constant 0 : index
    %c0_69 = arith.constant 0 : index
    %94 = vector.load %arg7[%c0_67, %c0_68, %c0_69] : memref<1x128x128xf32, #tpu.memory_space<vmem>>, vector<1x128x128xf32>
    %95 = vector.shape_cast %94 : vector<1x128x128xf32> to vector<128x128xf32>
    %96 = vector.shape_cast %93 : vector<128x128xf32> to vector<1x128x128xf32>
    tpu.vector_store %arg7[%c0_67, %c0_68, %c0_69], %96 {strides = array<i32>} : memref<1x128x128xf32, #tpu.memory_space<vmem>>, vector<1x128x128xf32>,
    return
  }
  func.func @transform_0(%arg0: i32, %arg1: i32) -> (i32, i32, i32, i32) {
    %c0_i32 = arith.constant 0 : i32
    %c0_i32_0 = arith.constant 0 : i32
    %c0_i32_1 = arith.constant 0 : i32
    %c0_i32_2 = arith.constant 0 : i32
    return %arg0, %c0_i32, %c0_i32_0, %c0_i32_1 : i32, i32, i32, i32
  }
  func.func @transform_1(%arg0: i32, %arg1: i32) -> (i32, i32, i32) {
    %c0_i32 = arith.constant 0 : i32
    %c0_i32_0 = arith.constant 0 : i32
    %c0_i32_1 = arith.constant 0 : i32
    %c0_i32_2 = arith.constant 0 : i32
    return %c0_i32, %c0_i32_0, %c0_i32_1 : i32, i32, i32
  }
  func.func @transform_2(%arg0: i32, %arg1: i32) -> (i32, i32) {
    %c0_i32 = arith.constant 0 : i32
    %c0_i32_0 = arith.constant 0 : i32
    %c0_i32_1 = arith.constant 0 : i32
    return %c0_i32, %c0_i32_0 : i32, i32
  }
  func.func @transform_3(%arg0: i32, %arg1: i32) -> (i32, i32) {
    %c0_i32 = arith.constant 0 : i32
    %c0_i32_0 = arith.constant 0 : i32
    %c0_i32_1 = arith.constant 0 : i32
    return %c0_i32, %c0_i32_0 : i32, i32
  }
  func.func @transform_4(%arg0: i32, %arg1: i32) -> (i32, i32) {
    %c0_i32 = arith.constant 0 : i32
    %c0_i32_0 = arith.constant 0 : i32
    %c0_i32_1 = arith.constant 0 : i32
    return %c0_i32, %c0_i32_0 : i32, i32
  }
  func.func @transform_5(%arg0: i32, %arg1: i32) -> (i32, i32, i32) {
    %c0_i32 = arith.constant 0 : i32
    %c0_i32_0 = arith.constant 0 : i32
    return %arg0, %arg1, %c0_i32 : i32, i32, i32
  }
}

</mosaic_0001>

<bundles_post_ra>
// kernel: scale_prediction.1
= control target key start
LH: loop header
LB: loop body
LE: loop exit
PB: predicated region body
PF: predicated region fallthrough
CT: control target
= control target key end

     0   :  { %s2997_s18 = smov 0   ;;  %s2999_s19 = smov 0   ;;  %s3788_s0 = inlined_call_operand.vmem [shape: bf16[2,18,18,4], index: 0, kind: input, shape index: {}]   ;;  %s3789_s1 = inlined_call_operand.vmem [shape: bf16[9,4,8], index: 1, kind: input, shape index: {}]   ;;  %s3790_s2 = inlined_call_operand.vmem [shape: f32[1,8], index: 2, kind: input, shape index: {}]   ;;  %s3791_s3 = inlined_call_operand.vmem [shape: bf16[8,128], index: 3, kind: input, shape index: {}]   ;;  %s3792_s4 = inlined_call_operand.vmem [shape: f32[1,128], index: 4, kind: input, shape index: {}]   ;;  %s3793_s5 = inlined_call_operand.vmem [shape: f32[2,256,128], index: 5, kind: output, shape index: {}]  }
   0x1   :  { %s3001_s20 = smov 0   ;;  %s3003_s21 = smov 0  }
   0x2   :  { %s3005_s22 = smov 0  }
   0x3 LB: > { %s24_s23 = sadd.s32 1, %s2957_s20  ;;  %s27_s24 = sadd.s32 1, %s2961_s21  ;;  %s2965_s22 = sphi %s3005_s22, %s15_s22   ;;  %s2961_s21 = sphi %s3003_s21, %s3801_s21   ;;  %s2957_s20 = sphi %s3001_s20, %s3800_s20   ;;  %s2953_s19 = sphi %s2999_s19, %s3799_s19   ;;  %s2949_s18 = sphi %s2997_s18, %s3798_s18  }
   0x4   : > { %p25_p0 = scmp.ge.s32.totalorder %s24_s23, 2  ;;  %p2539_p1 = scmp.ge.s32.totalorder %s2965_s22, 1 }
   0x5   : > { %p201_p2 = scmp.lt.s32.totalorder %s2965_s22, 5 }
   0x6   : > { %s3803_s23 = smov (%p25_p0, %s24_s23), 0  ;;  %s3805_s24 = smov (!%p25_p0, %s27_s24), %s2961_s21 }
   0x7   : > { %p202_p3 = pnand %p2539_p1, %p201_p2  ;;  %p29_p4 = scmp.ge.s32.totalorder %s3805_s24, 2 }
   0x8   : > { %p233_p5 = scmp.lt.s32.totalorder (!%p202_p3), %s2953_s19, 1  ;;  %s2857_s6 = smul.u32 (!%p202_p3), 96, %s2949_s18 }
   0x9   : > { %s3807_s24 = smov (%p29_p4, %s3805_s24), 0  ;;  %205 = sbr.rel (%p202_p3) target bundleno = 630 (0x276), region = 40 }
   0xa   : > { %s2541_s10 = sshll.u32 (!%p202_p3), %s2949_s18, 4 }
   0xb   : > { %p241_p6 = scmp.lt.s32.totalorder (!%p202_p3), %s2541_s10, 31 }
   0xe   : > { %v269_v0 = vld [vmem:[%s3789_s1] sm:$0x3]  ;;  %vm524_vm0 = vcmask 1041408   ;;  %v2547_v2 = vld [vmem:[%s3789_s1 + $0x2] sm:$0x3]  ;;  %s3809_s19 = smov (!%p233_p5, %s2953_s19), 1 }
   0xf   : > { %v642_v1 = vsel %vm524_vm0, %v269_v0, 0  ;;  %v526_v3 = vsel %vm524_vm0, %v2547_v2, 0  ;;  %v2604_v4 = vld [vmem:[%s3789_s1 + $0x4] sm:$0x3]  ;;  %v2631_v6 = vld [vmem:[%s3789_s1 + $0x6] sm:$0x3] }
  0x10   : > { %2883 = vmatpush.bf16.msra.mxu3 %v642_v1  ;;  %651 = vmatpush.bf16.msra.mxu1 %v642_v1  ;;  %v827_v5 = vsel %vm524_vm0, %v2604_v4, 0  ;;  %v2696_v7 = vld [vmem:[%s3789_s1 + $0x8] sm:$0x3]  ;;  %s2884_s11 = smul.u32 216, %s3809_s19  ;;  %v981_v8 = vsel %vm524_vm0, %v2631_v6, 0  ;;  %vm499_vm1 = vcmask 31744  }
  0x11   : > { %2882 = vmatpush.bf16.msra.mxu2 %v526_v3  ;;  %535 = vmatpush.bf16.msra.mxu0 %v526_v3  ;;  %v1315_v9 = vsel %vm524_vm0, %v2696_v7, 0  ;;  %vm278_vm2 = vsmask.f32 3328  ;;  %vm279_vm3 = vsmask.f32 7440  ;;  %vm717_vm5 = vcmask 1042432  }
  0x12   : > { %s237_s14 = scalar_lea.vmem %s3788_s0, %s2884_s11  ;;  %vm3088_vm4 = vmor %vm278_vm2, %vm279_vm3  ;;  %vm718_vm6 = vcmask 1046532   ;;  %vm2372_vm8 = vcmask 1043456   ;;  %vm2347_vm9 = vcmask 64512   ;;  %s3811_s10 = smov (!%p241_p6, %s2541_s10), 31 }
  0x13   : > { %s3056_s15 = scalar_lea.vmem %s237_s14, %s2857_s6  ;;  %vm3220_vm7 = vmor %vm717_vm5, %vm718_vm6  ;;  %s2542_s11 = sshll.u32 %s3809_s19, 5 }
  0x14   : > { %990 = vmatpush.bf16.msrb.mxu3 %v981_v8  ;;  %v2862_v10 = vld [vmem:[%s3056_s15 + $0x30] sm:$0xff]  ;;  %v3064_v13 = vld [vmem:[%s3056_s15 + $0x38] sm:$0x1]  ;;  %v253_v19 = vld [vmem:[%s3056_s15] sm:$0xf]  ;;  %s244_s12 = sadd.s32 %s2542_s11, %s3811_s10 }
  0x15   : > { %836 = vmatpush.bf16.msrb.mxu2 %v827_v5  ;;  %1324 = vmatpush.bf16.msrb.mxu0 %v1315_v9  ;;  %v261_v11 = vld [vmem:[%s3056_s15 + $0x30] sm:$0xf]  ;;  %v3061_v12 = vld [vmem:[%s3056_s15 + $0x34] sm:$0xf]  ;;  %v397_v18 = vshll.u32 %v3064_v13, 16  ;;  %v2858_v21 = vld [vmem:[%s3056_s15] sm:$0xff] }
  0x16   : > { %v378_v14 = vshrl.u32 %v261_v11, 16  ;;  %v381_v15 = vshll.u32 %v261_v11, 16  ;;  %v387_v16 = vshll.u32 %v3061_v12, 16  ;;  %v391_v17 = vshrl.u32 %v3061_v12, 16  ;;  %2592 = vmatmul.msk.bf16.vlgmr.msra.gmra.mxu3 %vm499_vm1, %v2862_v10  ;;  %v3072_v20 = vld [vmem:[%s3056_s15 + $0x4] sm:$0xf]  ;;  %2588 = vmatmul.msk.bf16.vlgmr.msra.gmra.mxu1 %vm499_vm1, %v2858_v21 }
  0x17   : > { %v3076_v26 = vld [vmem:[%s3056_s15 + $0x8] sm:$0x1]  ;;  %v399_v27 = vrot.slane %v397_v18, 5  ;;  %v282_v28 = vshrl.u32 %v253_v19, 16  ;;  %v285_v29 = vshll.u32 %v253_v19, 16  ;;  %v291_v30 = vshll.u32 %v3072_v20, 16 }
  0x18   : > { %v380_v22 = vrot.slane %v378_v14, 4  ;;  %v383_v23 = vrot.slane %v381_v15, 5  ;;  %v389_v24 = vrot.slane %v387_v16, 5  ;;  %v393_v25 = vrot.slane %v391_v17, 4  ;;  %v263_v35 = vld [vmem:[%s3056_s15 + $0x3c] sm:$0xf] }
  0x19   : > { %v295_v33 = vshrl.u32 %v3072_v20, 16  ;;  %v301_v34 = vshll.u32 %v3076_v26, 16  ;;  %v3084_v36 = vld [vmem:[%s3056_s15 + $0x40] sm:$0xf]  ;;  %v284_v38 = vrot.slane %v282_v28, 4  ;;  %v287_v39 = vrot.slane %v285_v29, 5 }
  0x1a   : > { %v384_v31 = vor.u32 %v383_v23, %v380_v22  ;;  %v394_v32 = vor.u32 %v393_v25, %v389_v24  ;;  %v293_v40 = vrot.slane %v291_v30, 5  ;;  %v402_v46 = vshrl.u32 %v263_v35, 16  ;;  %v3098_v52 = vld [vmem:[%s3056_s15 + $0x44] sm:$0x1]  ;;  %v255_v54 = vld [vmem:[%s3056_s15 + $0xc] sm:$0xf] }
  0x1b   : > { %v297_v43 = vrot.slane %v295_v33, 4  ;;  %v303_v44 = vrot.slane %v301_v34, 5  ;;  %v288_v45 = vor.u32 %v287_v39, %v284_v38  ;;  %v405_v47 = vshll.u32 %v263_v35, 16  ;;  %v3106_v2 = vld [vmem:[%s3056_s15 + $0x10] sm:$0xf]  ;;  %v2863_v11 = vld [vmem:[%s3056_s15 + $0x3c] sm:$0xff] }
  0x1c   : > { %v385_v41 = vrot.slane %v384_v31, 4  ;;  %v395_v42 = vrot.slane %v394_v32, 4  ;;  %v411_v48 = vshll.u32 %v3084_v36, 16  ;;  %v415_v53 = vshrl.u32 %v3084_v36, 16  ;;  %v3111_v8 = vld [vmem:[%s3056_s15 + $0x14] sm:$0x1] }
  0x1d   : > { %v298_v51 = vor.u32 %v297_v43, %v293_v40  ;;  %v289_v57 = vrot.slane %v288_v45, 4  ;;  %v404_v58 = vrot.slane %v402_v46, 4  ;;  %v407_v60 = vrot.slane %v405_v47, 5  ;;  %v265_v9 = vld [vmem:[%s3056_s15 + $0x48] sm:$0xf]  ;;  %v2859_v25 = vld [vmem:[%s3056_s15 + $0xc] sm:$0xff] }
  0x1e   : > { %v390_v49 = vsel %vm3088_vm4, %v385_v41, %v389_v24  ;;  %v400_v50 = vsel %vm3088_vm4, %v395_v42, %v399_v27  ;;  %v413_v61 = vrot.slane %v411_v48, 5  ;;  %v417_v62 = vrot.slane %v415_v53, 4  ;;  %v3121_v27 = vld [vmem:[%s3056_s15 + $0x4c] sm:$0xf]  ;;  %s2543_s13 = sshll.u32 %s244_s12, 3 }
  0x1f   : > { %v483_v55 = vunpack.c.l.b16 %v390_v49  ;;  %v484_v56 = vunpack.c.l.b16 %v400_v50  ;;  %v299_v59 = vrot.slane %v298_v51, 4  ;;  %v294_v0 = vsel %vm3088_vm4, %v289_v57, %v293_v40  ;;  %v257_v40 = vld [vmem:[%s3056_s15 + $0x18] sm:$0xf]  ;;  %v3134_v49 = vld [vmem:[%s3056_s15 + $0x1c] sm:$0xf]  ;;  %s3755_s25 = scalar_lea.vmem %s3793_s5, %s2543_s13 }
  0x20   : > { %v421_v1 = vshll.u32 %v3098_v52, 16  ;;  %v306_v3 = vshrl.u32 %v255_v54, 16  ;;  %v475_v5 = vunpack.c.l.b16 %v294_v0  ;;  %v408_v6 = vor.u32 %v407_v60, %v404_v58  ;;  %v3139_v51 = vld [vmem:[%s3056_s15 + $0x50] sm:$0x1] }
  0x21   : > { %v495_v63 = vpack.c.b16 %v484_v56, %v483_v55  ;;  %v304_v4 = vsel %vm3088_vm4, %v299_v59, %v303_v44  ;;  %v418_v7 = vor.u32 %v417_v62, %v413_v61  ;;  %v309_v16 = vshll.u32 %v255_v54, 16 }
  0x22   : > { %v476_v10 = vunpack.c.l.b16 %v304_v4  ;;  %v423_v14 = vrot.slane %v421_v1, 5  ;;  %v308_v15 = vrot.slane %v306_v3, 4  ;;  %v409_v17 = vrot.slane %v408_v6, 4  ;;  %v3147_v4 = vld [vmem:[%s3056_s15 + $0x20] sm:$0x1] }
  0x23   : > { %2552 = vmatmul.msk.bf16.vlgmr.msra.gmra.mxu2 %vm499_vm1, %v495_v63  ;;  %v419_v18 = vrot.slane %v418_v7, 4  ;;  %v315_v19 = vshll.u32 %v3106_v2, 16  ;;  %v319_v21 = vshrl.u32 %v3106_v2, 16  ;;  %v311_v23 = vrot.slane %v309_v16, 5 }
  0x24   : > { %v491_v22 = vpack.c.b16 %v476_v10, %v475_v5  ;;  %v325_v24 = vshll.u32 %v3111_v8, 16  ;;  %v426_v28 = vshrl.u32 %v265_v9, 16  ;;  %v414_v29 = vsel %vm3088_vm4, %v409_v17, %v413_v61  ;;  %v267_v17 = vld [vmem:[%s3056_s15 + $0x54] sm:$0xf] }
  0x25   : > { %v424_v30 = vsel %vm3088_vm4, %v419_v18, %v423_v14  ;;  %v317_v31 = vrot.slane %v315_v19, 5  ;;  %v321_v32 = vrot.slane %v319_v21, 4  ;;  %v312_v33 = vor.u32 %v311_v23, %v308_v15  ;;  %v2860_v19 = vld [vmem:[%s3056_s15 + $0x18] sm:$0xff] }
  0x26   : > { %2548 = vmatmul.msk.bf16.vlgmr.msra.gmra.mxu0 %vm499_vm1, %v491_v22  ;;  %2593 = vmatmul.msk.bf16.gmra.mxu3 %vm499_vm1, %v2863_v11  ;;  %v327_v35 = vrot.slane %v325_v24, 5  ;;  %v429_v38 = vshll.u32 %v265_v9, 16  ;;  %v435_v39 = vshll.u32 %v3121_v27, 16  ;;  %v485_v41 = vunpack.c.l.b16 %v414_v29  ;;  %v2864_v11 = vld [vmem:[%s3056_s15 + $0x48] sm:$0xff]  ;;  %v3155_v21 = vld [vmem:[%s3056_s15 + $0x58] sm:$0xf] }
  0x27   : > { %v322_v34 = vor.u32 %v321_v32, %v317_v31  ;;  %v486_v42 = vunpack.c.l.b16 %v424_v30  ;;  %v313_v43 = vrot.slane %v312_v33, 4  ;;  %2589 = vmatmul.msk.bf16.gmra.mxu1 %vm499_vm1, %v2859_v25  ;;  %v439_v44 = vshrl.u32 %v3121_v27, 16  ;;  %v259_v29 = vld [vmem:[%s3056_s15 + $0x24] sm:$0xf] }
  0x28   : > { %v428_v46 = vrot.slane %v426_v28, 4  ;;  %v431_v47 = vrot.slane %v429_v38, 5  ;;  %v437_v48 = vrot.slane %v435_v39, 5  ;;  %v330_v54 = vshrl.u32 %v257_v40, 16 }
  0x29   : > { %v323_v45 = vrot.slane %v322_v34, 4  ;;  %v318_v50 = vsel %vm3088_vm4, %v313_v43, %v317_v31  ;;  %v441_v53 = vrot.slane %v439_v44, 4  ;;  %v333_v55 = vshll.u32 %v257_v40, 16  ;;  %v3167_v34 = vld [vmem:[%s3056_s15 + $0x28] sm:$0xf] }
  0x2a   : > { %v496_v57 = vpack.c.b16 %v486_v42, %v485_v41  ;;  %v339_v58 = vshll.u32 %v3134_v49, 16  ;;  %v477_v59 = vunpack.c.l.b16 %v318_v50  ;;  %v432_v60 = vor.u32 %v431_v47, %v428_v46  ;;  %v3177_v50 = vld [vmem:[%s3056_s15 + $0x5c] sm:$0x1] }
  0x2b   : > { %v328_v56 = vsel %vm3088_vm4, %v323_v45, %v327_v35  ;;  %v445_v61 = vshll.u32 %v3139_v51, 16  ;;  %v343_v62 = vshrl.u32 %v3134_v49, 16  ;;  %v442_v0 = vor.u32 %v441_v53, %v437_v48 }
  0x2c   : > { %v478_v63 = vunpack.c.l.b16 %v328_v56  ;;  %v332_v1 = vrot.slane %v330_v54, 4  ;;  %v335_v3 = vrot.slane %v333_v55, 5  ;;  %v341_v5 = vrot.slane %v339_v58, 5  ;;  %v3180_v54 = vld [vmem:[%s3056_s15 + $0x2c] sm:$0x1] }
  0x2d   : > { %v345_v6 = vrot.slane %v343_v62, 4  ;;  %v433_v7 = vrot.slane %v432_v60, 4  ;;  %v447_v9 = vrot.slane %v445_v61, 5  ;;  %v443_v14 = vrot.slane %v442_v0, 4 }
  0x2e   : > { %v492_v10 = vpack.c.b16 %v478_v63, %v477_v59  ;;  %v336_v15 = vor.u32 %v335_v3, %v332_v1  ;;  %v349_v16 = vshll.u32 %v3147_v4, 16  ;;  %v450_v22 = vshrl.u32 %v267_v17, 16 }
  0x2f   : > { %v346_v18 = vor.u32 %v345_v6, %v341_v5  ;;  %v438_v23 = vsel %vm3088_vm4, %v433_v7, %v437_v48  ;;  %v448_v24 = vsel %vm3088_vm4, %v443_v14, %v447_v9  ;;  %v453_v31 = vshll.u32 %v267_v17, 16  ;;  %v2748_v7 = vld [vmem:[%s3789_s1 + $0xc] sm:$0x3] }
  0x30   : > { %v337_v25 = vrot.slane %v336_v15, 4  ;;  %v351_v28 = vrot.slane %v349_v16, 5  ;;  %v459_v32 = vshll.u32 %v3155_v21, 16  ;;  %v463_v33 = vshrl.u32 %v3155_v21, 16  ;;  %v2861_v16 = vld [vmem:[%s3056_s15 + $0x24] sm:$0xff] }
  0x31   : > { %v347_v30 = vrot.slane %v346_v18, 4  ;;  %v487_v35 = vunpack.c.l.b16 %v438_v23  ;;  %v488_v38 = vunpack.c.l.b16 %v448_v24  ;;  %v354_v39 = vshrl.u32 %v259_v29, 16  ;;  %v2672_v18 = vld [vmem:[%s3056_s15 + $0xc] sm:$0xf]  ;;  %v2721_v24 = vld [vmem:[%s3789_s1 + $0xa] sm:$0x3] }
  0x32   : > { %v357_v40 = vshll.u32 %v259_v29, 16  ;;  %v342_v41 = vsel %vm3088_vm4, %v337_v25, %v341_v5  ;;  %v452_v42 = vrot.slane %v450_v22, 4  ;;  %v363_v43 = vshll.u32 %v3167_v34, 16  ;;  %v2865_v5 = vld [vmem:[%s3056_s15 + $0x54] sm:$0xff]  ;;  %v2813_v23 = vld [vmem:[%s3789_s1 + $0xe] sm:$0x3] }
  0x33   : > { %2553 = vmatmul.msk.bf16.gmra.mxu2 %vm499_vm1, %v496_v57  ;;  %v367_v44 = vshrl.u32 %v3167_v34, 16  ;;  %v352_v45 = vsel %vm3088_vm4, %v347_v30, %v351_v28  ;;  %v455_v46 = vrot.slane %v453_v31, 5  ;;  %v461_v47 = vrot.slane %v459_v32, 5  ;;  %v2838_v32 = vld [vmem:[%s3789_s1 + $0x10] sm:$0x3] }
  0x34   : > { %v465_v48 = vrot.slane %v463_v33, 4  ;;  %v497_v53 = vpack.c.b16 %v488_v38, %v487_v35  ;;  %v356_v55 = vrot.slane %v354_v39, 4  ;;  %v359_v56 = vrot.slane %v357_v40, 5  ;;  %v2705_v33 = vld [vmem:[%s3056_s15 + $0xc] sm:$0xe] }
  0x35   : > { %v479_v57 = vunpack.c.l.b16 %v342_v41  ;;  %v480_v58 = vunpack.c.l.b16 %v352_v45  ;;  %v365_v59 = vrot.slane %v363_v43, 5  ;;  %v369_v60 = vrot.slane %v367_v44, 4  ;;  %v2674_v35 = vld [vmem:[%s3056_s15 + $0x14] sm:$0x1] }
  0x36   : > { %2549 = vmatmul.msk.bf16.gmra.mxu0 %vm499_vm1, %v492_v10  ;;  %2594 = vmatmul.msk.bf16.gmra.mxu3 %vm499_vm1, %v2864_v11  ;;  %v456_v61 = vor.u32 %v455_v46, %v452_v42  ;;  %v466_v62 = vor.u32 %v465_v48, %v461_v47  ;;  %v469_v63 = vshll.u32 %v3177_v50, 16  ;;  %v373_v0 = vshll.u32 %v3180_v54, 16 }
  0x37   : > { %2590 = vmatmul.msk.bf16.gmra.mxu1 %vm499_vm1, %v2860_v19  ;;  %v360_v1 = vor.u32 %v359_v56, %v356_v55  ;;  %v493_v3 = vpack.c.b16 %v480_v58, %v479_v57  ;;  %v370_v6 = vor.u32 %v369_v60, %v365_v59  ;;  %v1675_v14 = vsel %vm524_vm0, %v2748_v7, 0  ;;  %v2673_v19 = vld [vmem:[%s3056_s15 + $0x10] sm:$0xf] }
  0x38   : > { %v457_v9 = vrot.slane %v456_v61, 4  ;;  %v467_v10 = vrot.slane %v466_v62, 4  ;;  %v471_v11 = vrot.slane %v469_v63, 5  ;;  %v375_v15 = vrot.slane %v373_v0, 5  ;;  %1684 = vmatpush.bf16.msra.mxu2 %v1675_v14 }
  0x39   : > { %v361_v17 = vrot.slane %v360_v1, 4  ;;  %v371_v22 = vrot.slane %v370_v6, 4  ;;  %v1416_v25 = vrot.slane %v2673_v19, 5  ;;  %v2009_v30 = vsel %vm524_vm0, %v2813_v23, 0 }
  0x3a   : > { %v462_v28 = vsel %vm3088_vm4, %v457_v9, %v461_v47  ;;  %v472_v29 = vsel %vm3088_vm4, %v467_v10, %v471_v11  ;;  %v1521_v31 = vsel %vm524_vm0, %v2721_v24, 0  ;;  %v1073_v38 = vshrl.u32 %v2672_v18, 16  ;;  %2018 = vmatpush.bf16.msra.mxu3 %v2009_v30  ;;  %v2676_v24 = vld [vmem:[%s3056_s15 + $0x1c] sm:$0xf] }
  0x3b   : > { %v1076_v39 = vshll.u32 %v2672_v18, 16  ;;  %v1082_v40 = vshll.u32 %v2673_v19, 16  ;;  %v2215_v41 = vsel %vm524_vm0, %v2838_v32, 0  ;;  %v1086_v42 = vshrl.u32 %v2673_v19, 16  ;;  %1530 = vmatpush.bf16.msrb.mxu1 %v1521_v31 }
  0x3c   : > { %2224 = vmatpush.bf16.msra.mxu0 %v2215_v41  ;;  %v2713_v43 = vrot.slane %v2705_v33, 9  ;;  %v1418_v44 = vrot.slane %v1416_v25, 4  ;;  %v1419_v45 = vrot.slane %v2674_v35, 5  ;;  %v489_v46 = vunpack.c.l.b16 %v462_v28  ;;  %v2677_v33 = vld [vmem:[%s3056_s15 + $0x20] sm:$0x1] }
  0x3d   : > { %v490_v47 = vunpack.c.l.b16 %v472_v29  ;;  %v366_v48 = vsel %vm3088_vm4, %v361_v17, %v365_v59  ;;  %v722_v56 = vrot.slane %v3072_v20, 5  ;;  %v1075_v57 = vrot.slane %v1073_v38, 4  ;;  %v2675_v29 = vld [vmem:[%s3056_s15 + $0x18] sm:$0xf] }
  0x3e   : > { %v1078_v58 = vrot.slane %v1076_v39, 5  ;;  %v1084_v60 = vrot.slane %v1082_v40, 5  ;;  %v1088_v61 = vrot.slane %v1086_v42, 4  ;;  %v1417_v62 = vsel %vm3220_vm7, %v2713_v43, %v1416_v25  ;;  %v2706_v25 = vld [vmem:[%s3056_s15 + $0x18] sm:$0xe] }
  0x3f   : > { %v1420_v59 = vsel %vm3220_vm7, %v1418_v44, %v1419_v45  ;;  %v498_v63 = vpack.c.b16 %v490_v47, %v489_v46  ;;  %v481_v0 = vunpack.c.l.b16 %v366_v48  ;;  %v1472_v20 = vunpack.c.l.b16 %v1417_v62  ;;  %v694_v62 = vld [vmem:[%s3056_s15 + $0xc] sm:$0xe] }
  0x40   : > { %v1079_v6 = vor.u32 %v1078_v58, %v1075_v57  ;;  %v1473_v7 = vunpack.c.l.b16 %v1420_v59  ;;  %v724_v10 = vrot.slane %v722_v56, 4  ;;  %v1089_v11 = vor.u32 %v1088_v61, %v1084_v60 }
  0x41   : > { %v1092_v14 = vshll.u32 %v2674_v35, 16  ;;  %v1423_v28 = vrot.slane %v2676_v24, 5  ;;  %v2714_v38 = vrot.slane %v2706_v25, 9  ;;  %v1426_v40 = vrot.slane %v2677_v33, 5 }
  0x42   : > { %v1080_v17 = vrot.slane %v1079_v6, 4  ;;  %v1488_v18 = vpack.c.b16 %v1473_v7, %v1472_v20  ;;  %v1097_v41 = vshrl.u32 %v2675_v29, 16  ;;  %v1100_v42 = vshll.u32 %v2675_v29, 16 }
  0x43   : > { %2554 = vmatmul.msk.bf16.gmra.mxu2 %vm499_vm1, %v497_v53  ;;  %v376_v53 = vsel %vm3088_vm4, %v371_v22, %v375_v15  ;;  %v1090_v22 = vrot.slane %v1089_v11, 4  ;;  %v1094_v23 = vrot.slane %v1092_v14, 5  ;;  %v1425_v39 = vrot.slane %v1423_v28, 4  ;;  %v2679_v11 = vld [vmem:[%s3056_s15 + $0x28] sm:$0xf] }
  0x44   : > { %v482_v1 = vunpack.c.l.b16 %v376_v53  ;;  %v1085_v32 = vsel %vm3088_vm4, %v1080_v17, %v1084_v60  ;;  %v1106_v43 = vshll.u32 %v2676_v24, 16  ;;  %v1110_v44 = vshrl.u32 %v2676_v24, 16 }
  0x45   : > { %v1095_v35 = vsel %vm3088_vm4, %v1090_v22, %v1094_v23  ;;  %v1266_v46 = vunpack.c.l.b16 %v1085_v32  ;;  %v1424_v48 = vsel %vm3220_vm7, %v2714_v38, %v1423_v28  ;;  %v1427_v53 = vsel %vm3220_vm7, %v1425_v39, %v1426_v40 }
  0x46   : > { %2550 = vmatmul.msk.bf16.gmra.mxu0 %vm499_vm1, %v493_v3  ;;  %2595 = vmatmul.msk.bf16.gmra.mxu3 %vm499_vm1, %v2865_v5  ;;  %v693_v3 = vld [vmem:[%s3056_s15] sm:$0xe]  ;;  %v725_v5 = vrot.slane %v3076_v26, 5  ;;  %v494_v15 = vpack.c.b16 %v482_v1, %v481_v0  ;;  %v1267_v47 = vunpack.c.l.b16 %v1095_v35  ;;  %v1102_v57 = vrot.slane %v1100_v42, 5  ;;  %v2867_v1 = vld [vmem:[%s3056_s15 + $0x18] sm:$0xff] }
  0x47   : > { %2591 = vmatmul.msk.bf16.gmra.mxu1 %vm499_vm1, %v2861_v16  ;;  %v2596_v9 = vrot.slane %v693_v3, 9  ;;  %v2866_v16 = vld [vmem:[%s3056_s15 + $0xc] sm:$0xff]  ;;  %v1108_v58 = vrot.slane %v1106_v43, 5  ;;  %v1112_v60 = vrot.slane %v1110_v44, 4  ;;  %v729_v61 = vrot.slane %v3106_v2, 5 }
  0x48   : > { %v726_v19 = vsel %vm3220_vm7, %v724_v10, %v725_v5  ;;  %v1474_v59 = vunpack.c.l.b16 %v1424_v48  ;;  %v1282_v0 = vpack.c.b16 %v1267_v47, %v1266_v46  ;;  %v1116_v6 = vshll.u32 %v2677_v33, 16  ;;  %v695_v44 = vld [vmem:[%s3056_s15 + $0x18] sm:$0xe] }
  0x49   : > { %v723_v26 = vsel %vm3220_vm7, %v2596_v9, %v722_v56  ;;  %v779_v31 = vunpack.c.l.b16 %v726_v19  ;;  %v1099_v56 = vrot.slane %v1097_v41, 4  ;;  %v1113_v5 = vor.u32 %v1112_v60, %v1108_v58  ;;  %v2680_v19 = vld [vmem:[%s3056_s15 + $0x2c] sm:$0x1] }
  0x4a   : > { %v778_v30 = vunpack.c.l.b16 %v723_v26  ;;  %v2597_v20 = vrot.slane %v694_v62, 9  ;;  %v731_v7 = vrot.slane %v729_v61, 4  ;;  %v732_v9 = vrot.slane %v3111_v8, 5  ;;  %v2678_v8 = vld [vmem:[%s3056_s15 + $0x24] sm:$0xf] }
  0x4b   : > { %v1103_v3 = vor.u32 %v1102_v57, %v1099_v56  ;;  %v1114_v14 = vrot.slane %v1113_v5, 4  ;;  %v1430_v17 = vrot.slane %v2679_v11, 5  ;;  %v1433_v24 = vrot.slane %v2680_v19, 5 }
  0x4c   : > { %v794_v45 = vpack.c.b16 %v779_v31, %v778_v30  ;;  %v733_v26 = vsel %vm3220_vm7, %v731_v7, %v732_v9  ;;  %v1121_v31 = vshrl.u32 %v2678_v8, 16  ;;  %v1124_v32 = vshll.u32 %v2678_v8, 16 }
  0x4d   : > { %v1104_v2 = vrot.slane %v1103_v3, 4  ;;  %v1432_v23 = vrot.slane %v1430_v17, 4  ;;  %v781_v28 = vunpack.c.l.b16 %v733_v26  ;;  %v1130_v33 = vshll.u32 %v2679_v11, 16  ;;  %v2682_v3 = vld [vmem:[%s3056_s15 + $0x34] sm:$0xf] }
  0x4e   : > { %v1134_v35 = vshrl.u32 %v2679_v11, 16  ;;  %v736_v43 = vrot.slane %v3134_v49, 5  ;;  %v1126_v46 = vrot.slane %v1124_v32, 5  ;;  %v2598_v60 = vrot.slane %v695_v44, 9  ;;  %v2683_v11 = vld [vmem:[%s3056_s15 + $0x38] sm:$0x1] }
  0x4f   : > { %v1109_v29 = vsel %vm3088_vm4, %v1104_v2, %v1108_v58  ;;  %v1434_v39 = vsel %vm3220_vm7, %v1432_v23, %v1433_v24  ;;  %v1132_v47 = vrot.slane %v1130_v33, 5  ;;  %v2868_v58 = vld [vmem:[%s3056_s15 + $0x24] sm:$0xff]  ;;  %v1440_v26 = vrot.slane %v2683_v11, 5 }
  0x50   : > { %v1268_v41 = vunpack.c.l.b16 %v1109_v29  ;;  %v1136_v48 = vrot.slane %v1134_v35, 4  ;;  %v1477_v56 = vunpack.c.l.b16 %v1434_v39  ;;  %v738_v62 = vrot.slane %v736_v43, 4  ;;  %v696_v39 = vld [vmem:[%s3056_s15 + $0x24] sm:$0xe] }
  0x51   : > { %v737_v5 = vsel %vm3220_vm7, %v2598_v60, %v736_v43  ;;  %v743_v24 = vrot.slane %v3167_v34, 5  ;;  %v2599_v43 = vrot.slane %v696_v39, 9 }
  0x52   : > { %v1137_v49 = vor.u32 %v1136_v48, %v1132_v47  ;;  %v782_v8 = vunpack.c.l.b16 %v737_v5  ;;  %v2869_v48 = vld [vmem:[%s3056_s15 + $0x30] sm:$0xff] }
  0x53   : > { %2555 = vmatmul.msk.bf16.gmra.mxu2 %vm499_vm1, %v498_v63  ;;  %v1475_v63 = vunpack.c.l.b16 %v1427_v53  ;;  %v745_v44 = vrot.slane %v743_v24, 4 }
  0x54   : > { %v1138_v9 = vrot.slane %v1137_v49, 4 }
  0x55   : > { %v1489_v10 = vpack.c.b16 %v1475_v63, %v1474_v59  ;;  %v1140_v63 = vshll.u32 %v2680_v19, 16 }
  0x56   : > { %2551 = vmatmul.msk.bf16.gmra.mxu0 %vm499_vm1, %v494_v15  ;;  %2664 = vmatmul.msk.bf16.vlgmr.msrb.gmra.mxu3 %vm499_vm1, %v2866_v16  ;;  %v1118_v15 = vrot.slane %v1116_v6, 5  ;;  %v2707_v16 = vld [vmem:[%s3056_s15 + $0x24] sm:$0xe]  ;;  %v2708_v6 = vld [vmem:[%s3056_s15 + $0x30] sm:$0xe] }
  0x57   : > { %2722 = vmatmul.msk.bf16.vlgmr.msrb.gmra.mxu1 %vm499_vm1, %v1488_v18  ;;  %v730_v18 = vsel %vm3220_vm7, %v2597_v20, %v729_v61  ;;  %v2715_v22 = vrot.slane %v2707_v16, 9  ;;  %v739_v61 = vrot.slane %v3147_v4, 5  ;;  %v1437_v20 = vrot.slane %v2682_v3, 5 }
  0x58   : > { %v780_v25 = vunpack.c.l.b16 %v730_v18  ;;  %v1119_v30 = vsel %vm3088_vm4, %v1114_v14, %v1118_v15  ;;  %v1154_v15 = vshll.u32 %v2682_v3, 16  ;;  %v1158_v16 = vshrl.u32 %v2682_v3, 16  ;;  %v2709_v3 = vld [vmem:[%s3056_s15 + $0x3c] sm:$0xe] }
  0x59   : > { %v1431_v38 = vsel %vm3220_vm7, %v2715_v22, %v1430_v17  ;;  %v1269_v42 = vunpack.c.l.b16 %v1119_v30  ;;  %v740_v4 = vsel %vm3220_vm7, %v738_v62, %v739_v61  ;;  %v2716_v17 = vrot.slane %v2708_v6, 9  ;;  %v2685_v61 = vld [vmem:[%s3056_s15 + $0x40] sm:$0xf]  ;;  %v2684_v62 = vld [vmem:[%s3056_s15 + $0x3c] sm:$0xf] }
  0x5a   : > { %v795_v40 = vpack.c.b16 %v781_v28, %v780_v25  ;;  %v1476_v53 = vunpack.c.l.b16 %v1431_v38  ;;  %v1439_v18 = vrot.slane %v1437_v20, 4  ;;  %v783_v19 = vunpack.c.l.b16 %v740_v4 }
  0x5b   : > { %v1283_v57 = vpack.c.b16 %v1269_v42, %v1268_v41  ;;  %v1156_v29 = vrot.slane %v1154_v15, 5  ;;  %v1160_v30 = vrot.slane %v1158_v16, 4  ;;  %v2717_v6 = vrot.slane %v2709_v3, 9 }
  0x5c   : > { %v1441_v32 = vsel %vm3220_vm7, %v1439_v18, %v1440_v26  ;;  %v796_v33 = vpack.c.b16 %v783_v19, %v782_v8  ;;  %v750_v16 = vrot.slane %v3061_v12, 5  ;;  %v697_v26 = vld [vmem:[%s3056_s15 + $0x30] sm:$0xe]  ;;  %v2870_v12 = vld [vmem:[%s3056_s15 + $0x3c] sm:$0xff] }
  0x5d   : > { %v1479_v34 = vunpack.c.l.b16 %v1441_v32 }
  0x63   : > { %2605 = vmatmul.msk.bf16.vlgmr.msrb.gmra.mxu2 %vm499_vm1, %v794_v45  ;;  %v1123_v45 = vrot.slane %v1121_v31, 4  ;;  %v1438_v31 = vsel %vm3220_vm7, %v2716_v17, %v1437_v20 }
  0x64   : > { %v1478_v42 = vunpack.c.l.b16 %v1438_v31  ;;  %v753_v31 = vrot.slane %v3064_v13, 5  ;;  %v2688_v13 = vld [vmem:[%s3056_s15 + $0x4c] sm:$0xf] }
  0x65   : > { %v1127_v59 = vor.u32 %v1126_v46, %v1123_v45  ;;  %v1161_v45 = vor.u32 %v1160_v30, %v1156_v29  ;;  %v1164_v46 = vshll.u32 %v2683_v11, 16  ;;  %v1182_v11 = vshrl.u32 %v2685_v61, 16 }
  0x66   : > { %2697 = vmatmul.msk.bf16.vlgmr.msrb.gmra.mxu0 %vm499_vm1, %v1282_v0  ;;  %2665 = vmatmul.msk.bf16.gmra.mxu3 %vm499_vm1, %v2867_v1  ;;  %v1490_v0 = vpack.c.b16 %v1477_v56, %v1476_v53  ;;  %v2681_v1 = vld [vmem:[%s3056_s15 + $0x30] sm:$0xf]  ;;  %v1491_v56 = vpack.c.b16 %v1479_v34, %v1478_v42  ;;  %v752_v30 = vrot.slane %v750_v16, 4 }
  0x67   : > { %2723 = vmatmul.msk.bf16.gmra.mxu1 %vm499_vm1, %v1489_v10  ;;  %v1128_v7 = vrot.slane %v1127_v59, 4  ;;  %v1142_v10 = vrot.slane %v1140_v63, 5  ;;  %v1145_v2 = vshrl.u32 %v2681_v1, 16  ;;  %v1148_v14 = vshll.u32 %v2681_v1, 16  ;;  %v2686_v1 = vld [vmem:[%s3056_s15 + $0x44] sm:$0x1] }
  0x68   : > { %v1166_v60 = vrot.slane %v1164_v46, 5  ;;  %v1444_v59 = vrot.slane %v2685_v61, 5  ;;  %v1447_v4 = vrot.slane %v2686_v1, 5 }
  0x69   : > { %v1133_v22 = vsel %vm3088_vm4, %v1128_v7, %v1132_v47  ;;  %v1143_v23 = vsel %vm3088_vm4, %v1138_v9, %v1142_v10  ;;  %v1147_v25 = vrot.slane %v1145_v2, 4  ;;  %v1150_v28 = vrot.slane %v1148_v14, 5 }
  0x6a   : > { %v1270_v35 = vunpack.c.l.b16 %v1133_v22  ;;  %v1271_v38 = vunpack.c.l.b16 %v1143_v23  ;;  %v1446_v20 = vrot.slane %v1444_v59, 4  ;;  %v1169_v7 = vshrl.u32 %v2684_v62, 16 }
  0x6b   : > { %v1151_v41 = vor.u32 %v1150_v28, %v1147_v25  ;;  %v1172_v9 = vshll.u32 %v2684_v62, 16  ;;  %v1178_v10 = vshll.u32 %v2685_v61, 16  ;;  %v1445_v17 = vsel %vm3220_vm7, %v2717_v6, %v1444_v59 }
  0x6c   : > { %v1284_v47 = vpack.c.b16 %v1271_v38, %v1270_v35  ;;  %v1448_v18 = vsel %vm3220_vm7, %v1446_v20, %v1447_v4  ;;  %v1171_v8 = vrot.slane %v1169_v7, 4  ;;  %v1184_v23 = vrot.slane %v1182_v11, 4  ;;  %v698_v20 = vld [vmem:[%s3056_s15 + $0x3c] sm:$0xe] }
  0x6d   : > { %v1152_v53 = vrot.slane %v1151_v41, 4  ;;  %v1174_v19 = vrot.slane %v1172_v9, 5  ;;  %v1180_v22 = vrot.slane %v1178_v10, 5  ;;  %v1481_v25 = vunpack.c.l.b16 %v1448_v18 }
  0x6e   : > { %v1188_v35 = vshll.u32 %v2686_v1, 16  ;;  %v757_v4 = vrot.slane %v3084_v36, 5  ;;  %v2601_v18 = vrot.slane %v698_v20, 9 }
  0x6f   : > { %v1175_v32 = vor.u32 %v1174_v19, %v1171_v8  ;;  %v760_v19 = vrot.slane %v3098_v52, 5 }
  0x70   : > { %v1190_v34 = vrot.slane %v1188_v35, 5  ;;  %v759_v8 = vrot.slane %v757_v4, 4 }
  0x71   : > { %v1176_v41 = vrot.slane %v1175_v32, 4 }
  0x72   : > { %v761_v52 = vsel %vm3220_vm7, %v759_v8, %v760_v19 }
  0x73   : > { %2606 = vmatmul.msk.bf16.gmra.mxu2 %vm499_vm1, %v795_v40  ;;  %v746_v40 = vrot.slane %v3180_v54, 5  ;;  %v744_v54 = vsel %vm3220_vm7, %v2599_v43, %v743_v24  ;;  %v1480_v24 = vunpack.c.l.b16 %v1445_v17 }
  0x74   : > { %v784_v49 = vunpack.c.l.b16 %v744_v54 }
  0x75   : > { %v1492_v38 = vpack.c.b16 %v1481_v25, %v1480_v24 }
  0x76   : > { %2698 = vmatmul.msk.bf16.gmra.mxu0 %vm499_vm1, %v1283_v57  ;;  %2666 = vmatmul.msk.bf16.gmra.mxu3 %vm499_vm1, %v2868_v58  ;;  %v747_v57 = vsel %vm3220_vm7, %v745_v44, %v746_v40  ;;  %v1162_v58 = vrot.slane %v1161_v45, 4  ;;  %v754_v40 = vsel %vm3220_vm7, %v752_v30, %v753_v31  ;;  %v2687_v44 = vld [vmem:[%s3056_s15 + $0x48] sm:$0xf]  ;;  %v1451_v45 = vrot.slane %v2688_v13, 5  ;;  %v2691_v31 = vld [vmem:[%s3056_s15 + $0x58] sm:$0xf] }
  0x77   : > { %2724 = vmatmul.msk.bf16.gmra.mxu1 %vm499_vm1, %v1490_v0  ;;  %v785_v63 = vunpack.c.l.b16 %v747_v57  ;;  %v1157_v0 = vsel %vm3088_vm4, %v1152_v53, %v1156_v29  ;;  %v2600_v29 = vrot.slane %v697_v26, 9  ;;  %v1193_v62 = vshrl.u32 %v2687_v44, 16  ;;  %v2871_v26 = vld [vmem:[%s3056_s15 + $0x48] sm:$0xff] }
  0x78   : > { %v1167_v5 = vsel %vm3088_vm4, %v1162_v58, %v1166_v60  ;;  %v1272_v14 = vunpack.c.l.b16 %v1157_v0  ;;  %v1453_v57 = vrot.slane %v1451_v45, 4  ;;  %v1181_v60 = vsel %vm3088_vm4, %v1176_v41, %v1180_v22 }
  0x79   : > { %v797_v2 = vpack.c.b16 %v785_v63, %v784_v49  ;;  %v1273_v15 = vunpack.c.l.b16 %v1167_v5  ;;  %v751_v39 = vsel %vm3220_vm7, %v2600_v29, %v750_v16  ;;  %v1196_v59 = vshll.u32 %v2687_v44, 16  ;;  %v2690_v29 = vld [vmem:[%s3056_s15 + $0x54] sm:$0xf] }
  0x7a   : > { %v786_v46 = vunpack.c.l.b16 %v751_v39  ;;  %v1202_v49 = vshll.u32 %v2688_v13, 16  ;;  %v1206_v63 = vshrl.u32 %v2688_v13, 16  ;;  %v1274_v0 = vunpack.c.l.b16 %v1181_v60 }
  0x7b   : > { %v1285_v28 = vpack.c.b16 %v1273_v15, %v1272_v14  ;;  %v1195_v7 = vrot.slane %v1193_v62, 4  ;;  %v1198_v9 = vrot.slane %v1196_v59, 5  ;;  %v1217_v39 = vshrl.u32 %v2690_v29, 16  ;;  %v699_v59 = vld [vmem:[%s3056_s15 + $0x48] sm:$0xe] }
  0x7c   : > { %v1204_v10 = vrot.slane %v1202_v49, 5  ;;  %v1208_v11 = vrot.slane %v1206_v63, 4  ;;  %v1458_v41 = vrot.slane %v2691_v31, 5  ;;  %v1230_v13 = vshrl.u32 %v2691_v31, 16 }
  0x7d   : > { %v1199_v36 = vor.u32 %v1198_v9, %v1195_v7  ;;  %v764_v60 = vrot.slane %v3121_v27, 5  ;;  %v2602_v7 = vrot.slane %v699_v59, 9  ;;  %v767_v9 = vrot.slane %v3139_v51, 5 }
  0x7e   : > { %v1209_v24 = vor.u32 %v1208_v11, %v1204_v10  ;;  %v1232_v63 = vrot.slane %v1230_v13, 4 }
  0x7f   : > { %v766_v27 = vrot.slane %v764_v60, 4  ;;  %v765_v19 = vsel %vm3220_vm7, %v2602_v7, %v764_v60 }
  0x81   : > { %v768_v51 = vsel %vm3220_vm7, %v766_v27, %v767_v9 }
  0x83   : > { %2607 = vmatmul.msk.bf16.gmra.mxu2 %vm499_vm1, %v796_v33  ;;  %v1185_v33 = vor.u32 %v1184_v23, %v1180_v22 }
  0x85   : > { %v1186_v42 = vrot.slane %v1185_v33, 4  ;;  %v1200_v33 = vrot.slane %v1199_v36, 4 }
  0x86   : > { %2699 = vmatmul.msk.bf16.gmra.mxu0 %vm499_vm1, %v1284_v47  ;;  %2667 = vmatmul.msk.bf16.gmra.mxu3 %vm499_vm1, %v2869_v48  ;;  %v2689_v47 = vld [vmem:[%s3056_s15 + $0x50] sm:$0x1]  ;;  %v2710_v48 = vld [vmem:[%s3056_s15 + $0x48] sm:$0xe] }
  0x87   : > { %2725 = vmatmul.msk.bf16.gmra.mxu1 %vm499_vm1, %v1491_v56  ;;  %v787_v56 = vunpack.c.l.b16 %v754_v40  ;;  %v2718_v54 = vrot.slane %v2710_v48, 9  ;;  %v1454_v58 = vrot.slane %v2689_v47, 5  ;;  %v1191_v61 = vsel %vm3088_vm4, %v1186_v42, %v1190_v34  ;;  %v2692_v42 = vld [vmem:[%s3056_s15 + $0x5c] sm:$0x1] }
  0x88   : > { %v1275_v1 = vunpack.c.l.b16 %v1191_v61  ;;  %v1212_v22 = vshll.u32 %v2689_v47, 16  ;;  %v1220_v40 = vshll.u32 %v2690_v29, 16  ;;  %v1226_v34 = vshll.u32 %v2691_v31, 16  ;;  %v2693_v29 = vld [vmem:[%s3056_s15 + $0x60] sm:$0xf] }
  0x89   : > { %v1452_v3 = vsel %vm3220_vm7, %v2718_v54, %v1451_v45  ;;  %v1455_v5 = vsel %vm3220_vm7, %v1453_v57, %v1454_v58  ;;  %v798_v6 = vpack.c.b16 %v787_v56, %v786_v46  ;;  %v1460_v46 = vrot.slane %v1458_v41, 4  ;;  %v2694_v31 = vld [vmem:[%s3056_s15 + $0x64] sm:$0xf] }
  0x8a   : > { %v1483_v14 = vunpack.c.l.b16 %v1455_v5  ;;  %v1286_v15 = vpack.c.b16 %v1275_v1, %v1274_v0  ;;  %v1214_v35 = vrot.slane %v1212_v22, 5  ;;  %v1461_v47 = vrot.slane %v2692_v42, 5 }
  0x8b   : > { %v1205_v56 = vsel %vm3088_vm4, %v1200_v33, %v1204_v10  ;;  %v1219_v61 = vrot.slane %v1217_v39, 4  ;;  %v1222_v62 = vrot.slane %v1220_v40, 5  ;;  %v1228_v49 = vrot.slane %v1226_v34, 5 }
  0x8c   : > { %v1276_v20 = vunpack.c.l.b16 %v1205_v56  ;;  %v790_v33 = vunpack.c.l.b16 %v765_v19  ;;  %v1241_v39 = vshrl.u32 %v2693_v29, 16  ;;  %v1244_v40 = vshll.u32 %v2693_v29, 16 }
  0x8d   : > { %v1223_v10 = vor.u32 %v1222_v62, %v1219_v61  ;;  %v1233_v11 = vor.u32 %v1232_v63, %v1228_v49 }
  0x8f   : > { %v1224_v36 = vrot.slane %v1223_v10, 4 }
  0x91   : > { %v1229_v34 = vsel %vm3088_vm4, %v1224_v36, %v1228_v49 }
  0x92   : > { %v1278_v49 = vunpack.c.l.b16 %v1229_v34 }
  0x93   : > { %2608 = vmatmul.msk.bf16.gmra.mxu2 %vm499_vm1, %v797_v2  ;;  %v653_v43 = vpop.f32.mrf.mxu1  ;;  %v1482_v2 = vunpack.c.l.b16 %v1452_v3  ;;  %v1462_v3 = vsel %vm3220_vm7, %v1460_v46, %v1461_v47  ;;  %v2712_v46 = vld [vmem:[%s3056_s15 + $0x60] sm:$0xe] }
  0x96   : > { %2700 = vmatmul.msk.bf16.gmra.mxu0 %vm499_vm1, %v1285_v28  ;;  %2668 = vmatmul.msk.bf16.gmra.mxu3 %vm499_vm1, %v2870_v12  ;;  %v1493_v28 = vpack.c.b16 %v1483_v14, %v1482_v2  ;;  %v758_v12 = vsel %vm3220_vm7, %v2601_v18, %v757_v4  ;;  %v1236_v2 = vshll.u32 %v2692_v42, 16  ;;  %v1465_v42 = vrot.slane %v2694_v31, 5 }
  0x97   : > { %2726 = vmatmul.msk.bf16.gmra.mxu1 %vm499_vm1, %v1492_v38  ;;  %v1210_v38 = vrot.slane %v1209_v24, 4  ;;  %v788_v48 = vunpack.c.l.b16 %v758_v12 }
  0x98   : > { %v1238_v24 = vrot.slane %v1236_v2, 5  ;;  %v1467_v56 = vrot.slane %v1465_v42, 4 }
  0x99   : > { %v673_v53 = vpop.f32.mrf.mxu3  ;;  %v1215_v58 = vsel %vm3088_vm4, %v1210_v38, %v1214_v35  ;;  %v2789_v35 = vld [vmem:[%s3056_s15 + $0x18] sm:$0xf]  ;;  %v791_v38 = vunpack.c.l.b16 %v768_v51 }
  0x9a   : > { %v1277_v4 = vunpack.c.l.b16 %v1215_v58  ;;  %v1770_v58 = vshll.u32 %v2789_v35, 16 }
  0x9b   : > { %v3350_v17 = vpop.f32.mrf.mxu1  ;;  %v800_v59 = vpack.c.b16 %v791_v38, %v790_v33 }
  0x9c   : > { %v1772_v2 = vrot.slane %v1770_v58, 5 }
  0xa1   : > { %v675_v16 = vpop.f32.mrf.mxu3 }
  0xa3   : > { %2609 = vmatmul.msk.bf16.gmra.mxu2 %vm499_vm1, %v798_v6  ;;  %v537_v23 = vpop.f32.mrf.mxu0 }
  0xa4   : > { %v3355_v25 = vadd.f32 %v653_v43, %v537_v23  ;;  %v2711_v43 = vld [vmem:[%s3056_s15 + $0x54] sm:$0xe]  ;;  %v658_v57 = vpop.f32.mrf.mxu1  ;;  %v1234_v23 = vrot.slane %v1233_v11, 4 }
  0xa5   : > { %v2719_v45 = vrot.slane %v2711_v43, 9  ;;  %v2695_v43 = vld [vmem:[%s3056_s15 + $0x68] sm:$0x1] }
  0xa6   : > { %v557_v30 = vpop.f32.mrf.mxu2  ;;  %2701 = vmatmul.msk.bf16.gmra.mxu0 %vm499_vm1, %v1286_v15  ;;  %2669 = vmatmul.msk.bf16.gmra.mxu3 %vm499_vm1, %v2871_v26  ;;  %v1485_v15 = vunpack.c.l.b16 %v1462_v3  ;;  %v1287_v26 = vpack.c.b16 %v1277_v4, %v1276_v20  ;;  %v1239_v13 = vsel %vm3088_vm4, %v1234_v23, %v1238_v24  ;;  %v1246_v3 = vrot.slane %v1244_v40, 5  ;;  %v700_v4 = vld [vmem:[%s3056_s15 + $0x54] sm:$0xe] }
  0xa7   : > { %v3362_v32 = vadd.f32 %v673_v53, %v557_v30  ;;  %2727 = vmatmul.msk.bf16.gmra.mxu1 %vm499_vm1, %v1493_v28  ;;  %v789_v53 = vunpack.c.l.b16 %v761_v52  ;;  %v1459_v1 = vsel %vm3220_vm7, %v2719_v45, %v1458_v41  ;;  %v3403_v41 = vld [vmem:[%s3056_s15 + $0x1c] sm:$0xf]  ;;  %v1254_v45 = vshrl.u32 %v2694_v31, 16 }
  0xa8   : > { %v1484_v14 = vunpack.c.l.b16 %v1459_v1  ;;  %v1776_v60 = vshll.u32 %v3403_v41, 16  ;;  %v1780_v61 = vshrl.u32 %v3403_v41, 16  ;;  %v1279_v63 = vunpack.c.l.b16 %v1239_v13 }
  0xa9   : > { %v678_v44 = vpop.f32.mrf.mxu3  ;;  %v799_v6 = vpack.c.b16 %v789_v53, %v788_v48  ;;  %v1767_v48 = vshrl.u32 %v2789_v35, 16  ;;  %v2720_v53 = vrot.slane %v2712_v46, 9  ;;  %v1243_v1 = vrot.slane %v1241_v39, 4 }
  0xaa   : > { %v1494_v28 = vpack.c.b16 %v1485_v15, %v1484_v14  ;;  %v1256_v7 = vrot.slane %v1254_v45, 4  ;;  %v1778_v14 = vrot.slane %v1776_v60, 5  ;;  %v1782_v15 = vrot.slane %v1780_v61, 4 }
  0xab   : > { %v3372_v54 = vpop.f32.mrf.mxu0  ;;  %v1769_v27 = vrot.slane %v1767_v48, 4  ;;  %v1466_v9 = vsel %vm3220_vm7, %v2720_v53, %v1465_v42  ;;  %v774_v23 = vrot.slane %v3177_v50, 5  ;;  %v1247_v24 = vor.u32 %v1246_v3, %v1243_v1 }
  0xac   : > { %v3394_v12 = vpop.f32.mrf.mxu1  ;;  %v1486_v19 = vunpack.c.l.b16 %v1466_v9  ;;  %v1260_v29 = vshll.u32 %v2695_v43, 16  ;;  %v1783_v33 = vor.u32 %v1782_v15, %v1778_v14 }
  0xad   : > { %v1248_v13 = vrot.slane %v1247_v24, 4 }
  0xae   : > { %v559_v0 = vpop.f32.mrf.mxu2  ;;  %v1784_v48 = vrot.slane %v1783_v33, 4 }
  0xaf   : > { %v3382_v5 = vadd.f32 %v675_v16, %v559_v0  ;;  %v2872_v16 = vld [vmem:[%s3056_s15 + $0x54] sm:$0xff]  ;;  %v771_v0 = vrot.slane %v3155_v21, 5 }
  0xb1   : > { %v680_v18 = vpop.f32.mrf.mxu3 }
  0xb3   : > { %2610 = vmatmul.msk.bf16.gmra.mxu2 %vm499_vm1, %v799_v6  ;;  %v542_v8 = vpop.f32.mrf.mxu0 }
  0xb4   : > { %v3391_v22 = vadd.f32 %v658_v57, %v542_v8  ;;  %v1468_v57 = vrot.slane %v2695_v43, 5  ;;  %v663_v21 = vpop.f32.mrf.mxu1  ;;  %v773_v8 = vrot.slane %v771_v0, 4 }
  0xb6   : > { %v562_v30 = vpop.f32.mrf.mxu2  ;;  %2702 = vmatmul.msk.bf16.gmra.mxu0 %vm499_vm1, %v1287_v26  ;;  %2670 = vmatmul.msk.bf16.gmra.mxu3 %vm499_vm1, %v2872_v16  ;;  %v1469_v10 = vsel %vm3220_vm7, %v1467_v56, %v1468_v57  ;;  %v3425_v26 = vld [vmem:[%s3056_s15 + $0x20] sm:$0x1]  ;;  %v2603_v16 = vrot.slane %v700_v4, 9  ;;  %v775_v34 = vsel %vm3220_vm7, %v773_v8, %v774_v23  ;;  %v2792_v56 = vld [vmem:[%s3056_s15 + $0x24] sm:$0xf] }
  0xb7   : > { %v3398_v52 = vadd.f32 %v678_v44, %v562_v30  ;;  %2728 = vmatmul.msk.bf16.gmra.mxu1 %vm499_vm1, %v1494_v28  ;;  %v1250_v44 = vshll.u32 %v2694_v31, 16  ;;  %v1487_v51 = vunpack.c.l.b16 %v1469_v10  ;;  %v2873_v30 = vld [vmem:[%s3056_s15 + $0x60] sm:$0xff]  ;;  %v1773_v31 = vor.u32 %v1772_v2, %v1769_v27  ;;  %v3444_v57 = vld [vmem:[%s3056_s15 + $0x28] sm:$0xf] }
  0xb8   : > { %v1786_v35 = vshll.u32 %v3425_v26, 16  ;;  %v772_v40 = vsel %vm3220_vm7, %v2603_v16, %v771_v0  ;;  %v1791_v3 = vshrl.u32 %v2792_v56, 16  ;;  %v1800_v4 = vshll.u32 %v3444_v57, 16 }
  0xb9   : > { %v683_v47 = vpop.f32.mrf.mxu3  ;;  %v1252_v6 = vrot.slane %v1250_v44, 5  ;;  %v1495_v50 = vpack.c.b16 %v1487_v51, %v1486_v19  ;;  %v1262_v44 = vrot.slane %v1260_v29, 5  ;;  %v1774_v46 = vrot.slane %v1773_v31, 4  ;;  %v3463_v51 = vld [vmem:[%s3056_s15 + $0x2c] sm:$0x1] }
  0xba   : > { %v1788_v53 = vrot.slane %v1786_v35, 5  ;;  %v792_v61 = vunpack.c.l.b16 %v772_v40  ;;  %v1802_v8 = vrot.slane %v1800_v4, 5  ;;  %v2822_v29 = vld [vmem:[%s3056_s15 + $0x18] sm:$0xe]  ;;  %v1810_v35 = vshll.u32 %v3463_v51, 16 }
  0xbb   : > { %v3414_v62 = vpop.f32.mrf.mxu0  ;;  %v1257_v28 = vor.u32 %v1256_v7, %v1252_v6  ;;  %v1804_v7 = vshrl.u32 %v3444_v57, 16  ;;  %v2342_v4 = vld [vmem:[%s3791_s3] sm:$0xf] }
  0xbc   : > { %v3446_v58 = vpop.f32.mrf.mxu1  ;;  %v1789_v0 = vsel %vm3088_vm4, %v1784_v48, %v1788_v53  ;;  %v1812_v48 = vrot.slane %v1810_v35, 5 }
  0xbd   : > { %v1258_v43 = vrot.slane %v1257_v28, 4  ;;  %v1961_v15 = vunpack.c.l.b16 %v1789_v0  ;;  %v1806_v19 = vrot.slane %v1804_v7, 4 }
  0xbe   : > { %v564_v20 = vpop.f32.mrf.mxu2 }
  0xbf   : > { %v3422_v11 = vadd.f32 %v680_v18, %v564_v20  ;;  %v1288_v18 = vpack.c.b16 %v1279_v63, %v1278_v49  ;;  %v1253_v49 = vsel %vm3088_vm4, %v1248_v13, %v1252_v6  ;;  %v1779_v63 = vsel %vm3088_vm4, %v1774_v46, %v1778_v14 }
  0xc0   : > { %v1794_v20 = vshll.u32 %v2792_v56, 16  ;;  %v1280_v9 = vunpack.c.l.b16 %v1253_v49  ;;  %v1960_v14 = vunpack.c.l.b16 %v1779_v63  ;;  %v1807_v33 = vor.u32 %v1806_v19, %v1802_v8  ;;  %v3499_v19 = vld [vmem:[%s3056_s15 + $0x38] sm:$0x1] }
  0xc1   : > { %v685_v36 = vpop.f32.mrf.mxu3 }
  0xc2   : > { %v1796_v16 = vrot.slane %v1794_v20, 5  ;;  %v1976_v28 = vpack.c.b16 %v1961_v15, %v1960_v14  ;;  %v1808_v46 = vrot.slane %v1807_v33, 4  ;;  %v2874_v15 = vld [vmem:[%s3056_s15 + $0x18] sm:$0xff] }
  0xc3   : > { %2611 = vmatmul.msk.bf16.gmra.mxu2 %vm499_vm1, %v800_v59  ;;  %v547_v38 = vpop.f32.mrf.mxu0  ;;  %v793_v59 = vunpack.c.l.b16 %v775_v34 }
  0xc4   : > { %v3431_v39 = vadd.f32 %v663_v21, %v547_v38  ;;  %v1793_v21 = vrot.slane %v1791_v3, 4  ;;  %v1813_v0 = vsel %vm3088_vm4, %v1808_v46, %v1812_v48  ;;  %v2798_v46 = vld [vmem:[%s3056_s15 + $0x3c] sm:$0xf]  ;;  %v3511_v48 = vld [vmem:[%s3056_s15 + $0x40] sm:$0xf] }
  0xc5   : > { %v801_v6 = vpack.c.b16 %v793_v59, %v792_v61 }
  0xc6   : > { %v567_v42 = vpop.f32.mrf.mxu2  ;;  %2703 = vmatmul.msk.bf16.gmra.mxu0 %vm499_vm1, %v1288_v18  ;;  %2671 = vmatmul.msk.bf16.gmra.mxu3 %vm499_vm1, %v2873_v30  ;;  %v668_v30 = vpop.f32.mrf.mxu1  ;;  %v1797_v31 = vor.u32 %v1796_v16, %v1793_v21 }
  0xc7   : > { %v3438_v45 = vadd.f32 %v683_v47, %v567_v42  ;;  %2729 = vmatmul.msk.bf16.gmra.mxu1 %vm499_vm1, %v1495_v50  ;;  %v1263_v47 = vsel %vm3088_vm4, %v1258_v43, %v1262_v44  ;;  %v2830_v50 = vrot.slane %v2822_v29, 9  ;;  %v2795_v42 = vld [vmem:[%s3056_s15 + $0x30] sm:$0xf]  ;;  %v3477_v43 = vld [vmem:[%s3056_s15 + $0x34] sm:$0xf] }
  0xc8   : > { %v1281_v2 = vunpack.c.l.b16 %v1263_v47  ;;  %v1798_v44 = vrot.slane %v1797_v31, 4  ;;  %v1815_v53 = vshrl.u32 %v2795_v42, 16  ;;  %v1818_v59 = vshll.u32 %v2795_v42, 16  ;;  %v2823_v29 = vld [vmem:[%s3056_s15 + $0x24] sm:$0xe] }
  0xc9   : > { %v688_v60 = vpop.f32.mrf.mxu3  ;;  %v1824_v49 = vshll.u32 %v3477_v43, 16  ;;  %v2831_v35 = vrot.slane %v2823_v29, 9  ;;  %v2120_v42 = vrot.slane %v3463_v51, 5  ;;  %v3529_v29 = vld [vmem:[%s3056_s15 + $0x44] sm:$0x1] }
  0xca   : > { %v1289_v24 = vpack.c.b16 %v1281_v2, %v1280_v9  ;;  %v1817_v20 = vrot.slane %v1815_v53, 4  ;;  %v2374_v2 = vsel %vm2372_vm8, %v2342_v4, 0 }
  0xcb   : > { %v3456_v1 = vpop.f32.mrf.mxu0  ;;  %2383 = vmatpush.bf16.msra.mxu1 %v2374_v2 }
  0xce   : > { %v569_v27 = vpop.f32.mrf.mxu2 }
  0xcf   : > { %v3460_v10 = vadd.f32 %v685_v36, %v569_v27  ;;  %v2110_v36 = vrot.slane %v3403_v41, 5  ;;  %v2113_v41 = vrot.slane %v3425_v26, 5  ;;  %v1803_v26 = vsel %vm3088_vm4, %v1798_v44, %v1802_v8 }
  0xd0   : > { %v1820_v27 = vrot.slane %v1818_v59, 5  ;;  %v1962_v16 = vunpack.c.l.b16 %v1803_v26  ;;  %v1963_v8 = vunpack.c.l.b16 %v1813_v0  ;;  %v1842_v26 = vshll.u32 %v2798_v46, 16 }
  0xd1   : > { %v690_v23 = vpop.f32.mrf.mxu3  ;;  %v2112_v13 = vrot.slane %v2110_v36, 4  ;;  %v2111_v61 = vsel %vm3220_vm7, %v2830_v50, %v2110_v36  ;;  %v1852_v0 = vshrl.u32 %v3511_v48, 16 }
  0xd2   : > { %v2166_v3 = vunpack.c.l.b16 %v2111_v61  ;;  %v1821_v36 = vor.u32 %v1820_v27, %v1817_v20  ;;  %v1977_v31 = vpack.c.b16 %v1963_v8, %v1962_v16  ;;  %v656_v20 = vadd.f32 %v3350_v17, %v3372_v54 }
  0xd3   : > { %2612 = vmatmul.msk.bf16.gmra.mxu2 %vm499_vm1, %v801_v6  ;;  %v552_v18 = vpop.f32.mrf.mxu0  ;;  %v2114_v63 = vsel %vm3220_vm7, %v2112_v13, %v2113_v41  ;;  %v1826_v6 = vrot.slane %v1824_v49, 5  ;;  %v1844_v16 = vrot.slane %v1842_v26, 5  ;;  %v2124_v17 = vrot.slane %v3477_v43, 5 }
  0xd4   : > { %v3469_v38 = vadd.f32 %v668_v30, %v552_v18  ;;  %v2167_v21 = vunpack.c.l.b16 %v2114_v63  ;;  %v1834_v30 = vshll.u32 %v3499_v19, 16  ;;  %v1822_v13 = vrot.slane %v1821_v36, 4 }
  0xd6   : > { %v572_v40 = vpop.f32.mrf.mxu2  ;;  %2704 = vmatmul.msk.bf16.gmra.mxu0 %vm499_vm1, %v1289_v24  ;;  %2814 = vmatmul.msk.bf16.vlgmr.msra.gmra.mxu3 %vm499_vm1, %v1976_v28  ;;  %v2117_v24 = vrot.slane %v3444_v57, 5  ;;  %v1836_v41 = vrot.slane %v1834_v30, 5  ;;  %v1827_v49 = vsel %vm3088_vm4, %v1822_v13, %v1826_v6 }
  0xd7   : > { %v3473_v34 = vadd.f32 %v688_v60, %v572_v40  ;;  %v1828_v60 = vshrl.u32 %v3477_v43, 16 }
  0xd8   : > { %v2119_v40 = vrot.slane %v2117_v24, 4  ;;  %v2118_v61 = vsel %vm3220_vm7, %v2831_v35, %v2117_v24  ;;  %v1854_v24 = vrot.slane %v1852_v0, 4 }
  0xd9   : > { %v992_v56 = vpop.f32.mrf.mxu3  ;;  %v1830_v9 = vrot.slane %v1828_v60, 4  ;;  %v1839_v60 = vshrl.u32 %v2798_v46, 16  ;;  %v2168_v4 = vunpack.c.l.b16 %v2118_v61  ;;  %v2801_v61 = vld [vmem:[%s3056_s15 + $0x48] sm:$0xf] }
  0xda   : > { %v2121_v51 = vsel %vm3220_vm7, %v2119_v40, %v2120_v42  ;;  %v1858_v40 = vshll.u32 %v3529_v29, 16  ;;  %v1866_v0 = vshll.u32 %v2801_v61, 16 }
  0xdb   : > { %v3484_v47 = vpop.f32.mrf.mxu0  ;;  %v1831_v18 = vor.u32 %v1830_v9, %v1826_v6  ;;  %v2169_v27 = vunpack.c.l.b16 %v2121_v51  ;;  %v1964_v6 = vunpack.c.l.b16 %v1827_v49  ;;  %v1841_v2 = vrot.slane %v1839_v60, 4  ;;  %v3543_v51 = vld [vmem:[%s3056_s15 + $0x4c] sm:$0xf] }
  0xdc   : > { %v1860_v46 = vrot.slane %v1858_v40, 5 }
  0xdd   : > { %v1832_v57 = vrot.slane %v1831_v18, 4  ;;  %v2183_v18 = vpack.c.b16 %v2169_v27, %v2168_v4  ;;  %v661_v4 = vadd.f32 %v3394_v12, %v3414_v62 }
  0xde   : > { %v574_v7 = vpop.f32.mrf.mxu2 }
  0xdf   : > { %v3495_v14 = vadd.f32 %v690_v23, %v574_v7  ;;  %v2182_v23 = vpack.c.b16 %v2167_v21, %v2166_v3  ;;  %v2875_v21 = vld [vmem:[%s3056_s15 + $0x24] sm:$0xff] }
  0xe1   : > { %v994_v28 = vpop.f32.mrf.mxu3 }
  0xe3   : > { %2781 = vmatmul.msk.bf16.vlgmr.msra.gmra.mxu2 %vm499_vm1, %v2874_v15  ;;  %v1326_v33 = vpop.f32.mrf.mxu0 }
  0xe6   : > { %v838_v50 = vpop.f32.mrf.mxu2  ;;  %2839 = vmatmul.msk.bf16.vlgmr.msra.gmra.mxu0 %vm499_vm1, %v2182_v23  ;;  %2815 = vmatmul.msk.bf16.gmra.mxu3 %vm499_vm1, %v1977_v31  ;;  %v2824_v31 = vld [vmem:[%s3056_s15 + $0x30] sm:$0xe] }
  0xe7   : > { %v878_v44 = vadd.f32 %v838_v50, %v3355_v25  ;;  %v1837_v25 = vsel %vm3088_vm4, %v1832_v57, %v1836_v41  ;;  %v2832_v13 = vrot.slane %v2824_v31, 9  ;;  %v2127_v57 = vrot.slane %v3499_v19, 5  ;;  %v2825_v31 = vld [vmem:[%s3056_s15 + $0x3c] sm:$0xe] }
  0xe8   : > { %v1965_v9 = vunpack.c.l.b16 %v1837_v25 }
  0xe9   : > { %v1032_v53 = vadd.f32 %v992_v56, %v878_v44  ;;  %v997_v59 = vpop.f32.mrf.mxu3  ;;  %v1848_v56 = vshll.u32 %v3511_v48, 16  ;;  %v2125_v25 = vsel %vm3220_vm7, %v2832_v13, %v2124_v17 }
  0xea   : > { %v1978_v23 = vpack.c.b16 %v1965_v9, %v1964_v6  ;;  %v2170_v27 = vunpack.c.l.b16 %v2125_v25  ;;  %v2876_v9 = vld [vmem:[%s3056_s15 + $0x30] sm:$0xff] }
  0xeb   : > { %v3521_v63 = vadd.f32 %v1326_v33, %v1032_v53  ;;  %v1328_v3 = vpop.f32.mrf.mxu0  ;;  %v1850_v8 = vrot.slane %v1848_v56, 5  ;;  %v1845_v33 = vor.u32 %v1844_v16, %v1841_v2  ;;  %v1863_v56 = vshrl.u32 %v2801_v61, 16 }
  0xed   : > { %v1855_v35 = vor.u32 %v1854_v24, %v1850_v8  ;;  %v1846_v41 = vrot.slane %v1845_v33, 4  ;;  %v1865_v16 = vrot.slane %v1863_v56, 4 }
  0xee   : > { %v840_v7 = vpop.f32.mrf.mxu2 }
  0xef   : > { %v879_v15 = vadd.f32 %v840_v7, %v656_v20  ;;  %v1856_v44 = vrot.slane %v1855_v35, 4  ;;  %v1876_v20 = vshrl.u32 %v3543_v51, 16  ;;  %v2131_v35 = vrot.slane %v3511_v48, 5 }
  0xf1   : > { %v1033_v36 = vadd.f32 %v994_v28, %v879_v15  ;;  %v999_v30 = vpop.f32.mrf.mxu3  ;;  %v2126_v28 = vrot.slane %v2124_v17, 4  ;;  %v1861_v26 = vsel %vm3088_vm4, %v1856_v44, %v1860_v46  ;;  %v3574_v44 = vld [vmem:[%s3056_s15 + $0x58] sm:$0xf]  ;;  %v2134_v46 = vrot.slane %v3529_v29, 5 }
  0xf2   : > { %v1900_v56 = vshrl.u32 %v3574_v44, 16 }
  0xf3   : > { %2782 = vmatmul.msk.bf16.gmra.mxu2 %vm499_vm1, %v2875_v21  ;;  %v3533_v54 = vadd.f32 %v1328_v3, %v1033_v36  ;;  %v1331_v50 = vpop.f32.mrf.mxu0  ;;  %v2128_v19 = vsel %vm3220_vm7, %v2126_v28, %v2127_v57  ;;  %v1872_v3 = vshll.u32 %v3543_v51, 16  ;;  %v1967_v21 = vunpack.c.l.b16 %v1861_v26 }
  0xf4   : > { %v2171_v2 = vunpack.c.l.b16 %v2128_v19  ;;  %v1878_v36 = vrot.slane %v1876_v20, 4 }
  0xf5   : > { %v1874_v24 = vrot.slane %v1872_v3, 5 }
  0xf6   : > { %v843_v42 = vpop.f32.mrf.mxu2  ;;  %2840 = vmatmul.msk.bf16.gmra.mxu0 %vm499_vm1, %v2183_v18  ;;  %2816 = vmatmul.msk.bf16.gmra.mxu3 %vm499_vm1, %v1978_v23  ;;  %v3561_v23 = vld [vmem:[%s3056_s15 + $0x50] sm:$0x1]  ;;  %v2184_v62 = vpack.c.b16 %v2171_v2, %v2170_v27 }
  0xf7   : > { %v880_v43 = vadd.f32 %v843_v42, %v3391_v22  ;;  %v1851_v22 = vsel %vm3088_vm4, %v1846_v41, %v1850_v8  ;;  %v1868_v8 = vrot.slane %v1866_v0, 5  ;;  %v1879_v42 = vor.u32 %v1878_v36, %v1874_v24  ;;  %v2804_v41 = vld [vmem:[%s3056_s15 + $0x54] sm:$0xf] }
  0xf8   : > { %v1966_v15 = vunpack.c.l.b16 %v1851_v22  ;;  %v1882_v13 = vshll.u32 %v3561_v23, 16  ;;  %v1887_v26 = vshrl.u32 %v2804_v41, 16 }
  0xf9   : > { %v1034_v53 = vadd.f32 %v997_v59, %v880_v43  ;;  %v1002_v49 = vpop.f32.mrf.mxu3  ;;  %v2133_v43 = vrot.slane %v2131_v35, 4 }
  0xfa   : > { %v1979_v33 = vpack.c.b16 %v1967_v21, %v1966_v15  ;;  %v1884_v61 = vrot.slane %v1882_v13, 5  ;;  %v1902_v15 = vrot.slane %v1900_v56, 4 }
  0xfb   : > { %v3547_v60 = vadd.f32 %v1331_v50, %v1034_v53  ;;  %v1333_v59 = vpop.f32.mrf.mxu0  ;;  %v1869_v50 = vor.u32 %v1868_v8, %v1865_v16  ;;  %v1880_v53 = vrot.slane %v1879_v42, 4  ;;  %v2135_v29 = vsel %vm3220_vm7, %v2133_v43, %v2134_v46  ;;  %v2877_v16 = vld [vmem:[%s3056_s15 + $0x3c] sm:$0xff] }
  0xfc   : > { %v2173_v8 = vunpack.c.l.b16 %v2135_v29 }
  0xfd   : > { %v1870_v48 = vrot.slane %v1869_v50, 4  ;;  %v1885_v20 = vsel %vm3088_vm4, %v1880_v53, %v1884_v61  ;;  %v2807_v53 = vld [vmem:[%s3056_s15 + $0x60] sm:$0xf]  ;;  %v3607_v61 = vld [vmem:[%s3056_s15 + $0x64] sm:$0xf] }
  0xfe   : > { %v845_v7 = vpop.f32.mrf.mxu2  ;;  %v1911_v56 = vshrl.u32 %v2807_v53, 16  ;;  %v1914_v29 = vshll.u32 %v2807_v53, 16 }
  0xff   : > { %v881_v6 = vadd.f32 %v845_v7, %v661_v4  ;;  %v666_v4 = vadd.f32 %v3446_v58, %v3456_v1 }
 0x101   : > { %v1035_v18 = vadd.f32 %v999_v30, %v881_v6  ;;  %v1004_v17 = vpop.f32.mrf.mxu3  ;;  %v2833_v30 = vrot.slane %v2825_v31, 9  ;;  %v1889_v6 = vrot.slane %v1887_v26, 4  ;;  %v3593_v31 = vld [vmem:[%s3056_s15 + $0x5c] sm:$0x1]  ;;  %v670_v26 = vpop.f32.mrf.mxu1 }
 0x103   : > { %2783 = vmatmul.msk.bf16.gmra.mxu2 %vm499_vm1, %v2876_v9  ;;  %v3565_v12 = vadd.f32 %v1333_v59, %v1035_v18  ;;  %v1336_v40 = vpop.f32.mrf.mxu0  ;;  %v2132_v19 = vsel %vm3220_vm7, %v2833_v30, %v2131_v35  ;;  %v1890_v59 = vshll.u32 %v2804_v41, 16  ;;  %v1969_v18 = vunpack.c.l.b16 %v1885_v20  ;;  %v2826_v35 = vld [vmem:[%s3056_s15 + $0x48] sm:$0xe] }
 0x104   : > { %v2172_v7 = vunpack.c.l.b16 %v2132_v19 }
 0x105   : > { %v1892_v9 = vrot.slane %v1890_v59, 5 }
 0x106   : > { %v848_v28 = vpop.f32.mrf.mxu2  ;;  %2841 = vmatmul.msk.bf16.gmra.mxu0 %vm499_vm1, %v2184_v62  ;;  %2817 = vmatmul.msk.bf16.gmra.mxu3 %vm499_vm1, %v1979_v33  ;;  %v2138_v62 = vrot.slane %v3543_v51, 5  ;;  %v2185_v42 = vpack.c.b16 %v2173_v8, %v2172_v7  ;;  %v2141_v51 = vrot.slane %v3561_v23, 5  ;;  %v1916_v8 = vrot.slane %v1914_v29, 5 }
 0x107   : > { %v882_v57 = vadd.f32 %v848_v28, %v3431_v39  ;;  %v1896_v39 = vshll.u32 %v3574_v44, 16  ;;  %v1893_v58 = vor.u32 %v1892_v9, %v1889_v6  ;;  %v2834_v28 = vrot.slane %v2826_v35, 9 }
 0x109   : > { %v1036_v25 = vadd.f32 %v1002_v49, %v882_v57  ;;  %v1007_v22 = vpop.f32.mrf.mxu3  ;;  %v1875_v49 = vsel %vm3088_vm4, %v1870_v48, %v1874_v24  ;;  %v1898_v2 = vrot.slane %v1896_v39, 5  ;;  %v2140_v57 = vrot.slane %v2138_v62, 4 }
 0x10a   : > { %v1968_v36 = vunpack.c.l.b16 %v1875_v49  ;;  %v1894_v43 = vrot.slane %v1893_v58, 4  ;;  %v2139_v19 = vsel %vm3220_vm7, %v2834_v28, %v2138_v62  ;;  %v1924_v49 = vshrl.u32 %v3607_v61, 16 }
 0x10b   : > { %v3581_v0 = vadd.f32 %v1336_v40, %v1036_v25  ;;  %v1338_v3 = vpop.f32.mrf.mxu0  ;;  %v1903_v1 = vor.u32 %v1902_v15, %v1898_v2  ;;  %v1906_v40 = vshll.u32 %v3593_v31, 16  ;;  %v2142_v23 = vsel %vm3220_vm7, %v2140_v57, %v2141_v51 }
 0x10c   : > { %v1980_v13 = vpack.c.b16 %v1969_v18, %v1968_v36  ;;  %v1899_v39 = vsel %vm3088_vm4, %v1894_v43, %v1898_v2  ;;  %v2174_v7 = vunpack.c.l.b16 %v2139_v19  ;;  %v2175_v6 = vunpack.c.l.b16 %v2142_v23  ;;  %v3638_v19 = vld [vmem:[%s3056_s15 + $0x70] sm:$0xf] }
 0x10d   : > { %v1904_v41 = vrot.slane %v1903_v1, 4  ;;  %v1908_v46 = vrot.slane %v1906_v40, 5  ;;  %v1970_v9 = vunpack.c.l.b16 %v1899_v39  ;;  %v1913_v15 = vrot.slane %v1911_v56, 4 }
 0x10e   : > { %v850_v27 = vpop.f32.mrf.mxu2  ;;  %v1926_v18 = vrot.slane %v1924_v49, 4  ;;  %v2186_v35 = vpack.c.b16 %v2175_v6, %v2174_v7  ;;  %v2148_v43 = vrot.slane %v3593_v31, 5  ;;  %v1948_v49 = vshrl.u32 %v3638_v19, 16 }
 0x10f   : > { %v883_v21 = vadd.f32 %v850_v27, %v666_v4  ;;  %v671_v4 = vadd.f32 %v670_v26, %v3484_v47  ;;  %v2145_v47 = vrot.slane %v3574_v44, 5 }
 0x111   : > { %v1037_v24 = vadd.f32 %v1004_v17, %v883_v21  ;;  %v1009_v33 = vpop.f32.mrf.mxu3 }
 0x113   : > { %2784 = vmatmul.msk.bf16.gmra.mxu2 %vm499_vm1, %v2877_v16  ;;  %v3599_v50 = vadd.f32 %v1338_v3, %v1037_v24  ;;  %v1341_v30 = vpop.f32.mrf.mxu0  ;;  %v2878_v16 = vld [vmem:[%s3056_s15 + $0x48] sm:$0xff] }
 0x114   : > { %v3624_v24 = vld [vmem:[%s3056_s15 + $0x68] sm:$0x1] }
 0x115   : > { %v1930_v28 = vshll.u32 %v3624_v24, 16 }
 0x116   : > { %v853_v17 = vpop.f32.mrf.mxu2  ;;  %2842 = vmatmul.msk.bf16.gmra.mxu0 %vm499_vm1, %v2185_v42  ;;  %2818 = vmatmul.msk.bf16.gmra.mxu3 %vm499_vm1, %v1980_v13  ;;  %v2827_v42 = vld [vmem:[%s3056_s15 + $0x54] sm:$0xe]  ;;  %v1917_v13 = vor.u32 %v1916_v8, %v1913_v15  ;;  %v1950_v8 = vrot.slane %v1948_v49, 4 }
 0x117   : > { %v884_v48 = vadd.f32 %v853_v17, %v3469_v38  ;;  %v1909_v38 = vsel %vm3088_vm4, %v1904_v41, %v1908_v46  ;;  %v2835_v51 = vrot.slane %v2827_v42, 9 }
 0x118   : > { %v1971_v2 = vunpack.c.l.b16 %v1909_v38  ;;  %v1918_v41 = vrot.slane %v1917_v13, 4  ;;  %v2828_v13 = vld [vmem:[%s3056_s15 + $0x60] sm:$0xe] }
 0x119   : > { %v1038_v25 = vadd.f32 %v1007_v22, %v884_v48  ;;  %v1012_v59 = vpop.f32.mrf.mxu3  ;;  %v1920_v22 = vshll.u32 %v3607_v61, 16  ;;  %v1932_v48 = vrot.slane %v1930_v28, 5  ;;  %v2146_v23 = vsel %vm3220_vm7, %v2835_v51, %v2145_v47 }
 0x11a   : > { %v1981_v1 = vpack.c.b16 %v1971_v2, %v1970_v9  ;;  %v2836_v51 = vrot.slane %v2828_v13, 9 }
 0x11b   : > { %v3617_v3 = vadd.f32 %v1341_v30, %v1038_v25  ;;  %v1343_v20 = vpop.f32.mrf.mxu0  ;;  %v1922_v36 = vrot.slane %v1920_v22, 5  ;;  %v2810_v25 = vld [vmem:[%s3056_s15 + $0x6c] sm:$0xf]  ;;  %v1944_v22 = vshll.u32 %v3638_v19, 16 }
 0x11c   : > { %v1935_v56 = vshrl.u32 %v2810_v25, 16  ;;  %v1938_v29 = vshll.u32 %v2810_v25, 16 }
 0x11d   : > { %v1927_v30 = vor.u32 %v1926_v18, %v1922_v36  ;;  %v2812_v18 = vld [vmem:[%s3056_s15 + $0x74] sm:$0x1] }
 0x11e   : > { %v855_v27 = vpop.f32.mrf.mxu2  ;;  %v1937_v15 = vrot.slane %v1935_v56, 4 }
 0x11f   : > { %v885_v21 = vadd.f32 %v855_v27, %v671_v4  ;;  %v1928_v46 = vrot.slane %v1927_v30, 4  ;;  %v2176_v4 = vunpack.c.l.b16 %v2146_v23  ;;  %v2879_v27 = vld [vmem:[%s3056_s15 + $0x54] sm:$0xff] }
 0x121   : > { %v1039_v62 = vadd.f32 %v1009_v33, %v885_v21  ;;  %v1014_v58 = vpop.f32.mrf.mxu3  ;;  %v2147_v33 = vrot.slane %v2145_v47, 4  ;;  %v1933_v38 = vsel %vm3088_vm4, %v1928_v46, %v1932_v48  ;;  %v1940_v21 = vrot.slane %v1938_v29, 5 }
 0x122   : > { %v1973_v2 = vunpack.c.l.b16 %v1933_v38 }
 0x123   : > { %2785 = vmatmul.msk.bf16.gmra.mxu2 %vm499_vm1, %v2878_v16  ;;  %v3628_v40 = vadd.f32 %v1343_v20, %v1039_v62  ;;  %v1346_v57 = vpop.f32.mrf.mxu0  ;;  %v2149_v31 = vsel %vm3220_vm7, %v2147_v33, %v2148_v43  ;;  %v1946_v16 = vrot.slane %v1944_v22, 5  ;;  %v1941_v30 = vor.u32 %v1940_v21, %v1937_v15 }
 0x124   : > { %v2177_v6 = vunpack.c.l.b16 %v2149_v31  ;;  %v2155_v43 = vrot.slane %v3624_v24, 5 }
 0x125   : > { %v1951_v28 = vor.u32 %v1950_v8, %v1946_v16  ;;  %v2162_v8 = vrot.slane %v2812_v18, 5 }
 0x126   : > { %v858_v17 = vpop.f32.mrf.mxu2  ;;  %2843 = vmatmul.msk.bf16.gmra.mxu0 %vm499_vm1, %v2186_v35  ;;  %2819 = vmatmul.msk.bf16.gmra.mxu3 %vm499_vm1, %v1981_v1  ;;  %v2187_v1 = vpack.c.b16 %v2177_v6, %v2176_v4  ;;  %v1532_v6 = vpop.f32.mrf.mxu1 }
 0x127   : > { %v886_v44 = vadd.f32 %v858_v17, %v3362_v32  ;;  %v1923_v32 = vsel %vm3088_vm4, %v1918_v41, %v1922_v36  ;;  %v1952_v41 = vrot.slane %v1951_v28, 4 }
 0x128   : > { %v1972_v9 = vunpack.c.l.b16 %v1923_v32 }
 0x129   : > { %v1040_v53 = vadd.f32 %v1012_v59, %v886_v44  ;;  %v1017_v26 = vpop.f32.mrf.mxu3  ;;  %v1942_v44 = vrot.slane %v1941_v30, 4  ;;  %v2881_v30 = vld [vmem:[%s3056_s15 + $0x6c] sm:$0xff] }
 0x12a   : > { %v1982_v47 = vpack.c.b16 %v1973_v2, %v1972_v9  ;;  %v2159_v9 = vrot.slane %v3638_v19, 5  ;;  %v2829_v2 = vld [vmem:[%s3056_s15 + $0x6c] sm:$0xe] }
 0x12b   : > { %v3642_v39 = vadd.f32 %v1346_v57, %v1040_v53  ;;  %v1348_v59 = vpop.f32.mrf.mxu0  ;;  %v1954_v57 = vshll.u32 %v2812_v18, 16  ;;  %v1947_v31 = vsel %vm3088_vm4, %v1942_v44, %v1946_v16  ;;  %v2837_v21 = vrot.slane %v2829_v2, 9 }
 0x12c   : > { %v1974_v29 = vunpack.c.l.b16 %v1947_v31  ;;  %v2161_v16 = vrot.slane %v2159_v9, 4 }
 0x12d   : > { %v2160_v19 = vsel %vm3220_vm7, %v2837_v21, %v2159_v9 }
 0x12e   : > { %v860_v20 = vpop.f32.mrf.mxu2  ;;  %v2180_v28 = vunpack.c.l.b16 %v2160_v19 }
 0x12f   : > { %v887_v7 = vadd.f32 %v860_v20, %v3382_v5  ;;  %v2152_v5 = vrot.slane %v3607_v61, 5  ;;  %v1956_v61 = vrot.slane %v1954_v57, 5 }
 0x131   : > { %v1041_v36 = vadd.f32 %v1014_v58, %v887_v7  ;;  %v1019_v62 = vpop.f32.mrf.mxu3  ;;  %v2154_v33 = vrot.slane %v2152_v5, 4  ;;  %v2153_v25 = vsel %vm3220_vm7, %v2836_v51, %v2152_v5  ;;  %v1957_v24 = vsel %vm3088_vm4, %v1952_v41, %v1956_v61 }
 0x132   : > { %v2178_v38 = vunpack.c.l.b16 %v2153_v25  ;;  %v1975_v22 = vunpack.c.l.b16 %v1957_v24  ;;  %v2163_v5 = vsel %vm3220_vm7, %v2161_v16, %v2162_v8 }
 0x133   : > { %2786 = vmatmul.msk.bf16.gmra.mxu2 %vm499_vm1, %v2879_v27  ;;  %v3656_v35 = vadd.f32 %v1348_v59, %v1041_v36  ;;  %v1351_v42 = vpop.f32.mrf.mxu0  ;;  %v2880_v59 = vld [vmem:[%s3056_s15 + $0x60] sm:$0xff]  ;;  %v2181_v57 = vunpack.c.l.b16 %v2163_v5 }
 0x134   : > { %v1983_v27 = vpack.c.b16 %v1975_v22, %v1974_v29 }
 0x135   : > { %v2189_v51 = vpack.c.b16 %v2181_v57, %v2180_v28 }
 0x136   : > { %v863_v17 = vpop.f32.mrf.mxu2  ;;  %2844 = vmatmul.msk.bf16.gmra.mxu0 %vm499_vm1, %v2187_v1  ;;  %2820 = vmatmul.msk.bf16.gmra.mxu3 %vm499_vm1, %v1982_v47 }
 0x137   : > { %v888_v58 = vadd.f32 %v863_v17, %v3398_v52  ;;  %v2156_v52 = vsel %vm3220_vm7, %v2154_v33, %v2155_v43 }
 0x138   : > { %v2179_v56 = vunpack.c.l.b16 %v2156_v52 }
 0x139   : > { %v1042_v46 = vadd.f32 %v1017_v26, %v888_v58  ;;  %v1022_v48 = vpop.f32.mrf.mxu3 }
 0x13a   : > { %v2188_v7 = vpack.c.b16 %v2179_v56, %v2178_v38  ;;  %v1572_v38 = vadd.f32 %v1532_v6, %v3521_v63 }
 0x13b   : > { %v3664_v53 = vadd.f32 %v1351_v42, %v1042_v46  ;;  %v1353_v23 = vpop.f32.mrf.mxu0  ;;  %v1534_v42 = vpop.f32.mrf.mxu1 }
 0x13e   : > { %v865_v32 = vpop.f32.mrf.mxu2 }
 0x13f   : > { %v889_v26 = vadd.f32 %v865_v32, %v3422_v11 }
 0x141   : > { %v1043_v49 = vadd.f32 %v1019_v62, %v889_v26  ;;  %v1024_v20 = vpop.f32.mrf.mxu3 }
 0x143   : > { %2787 = vmatmul.msk.bf16.gmra.mxu2 %vm499_vm1, %v2880_v59  ;;  %v3677_v4 = vadd.f32 %v1353_v23, %v1043_v49  ;;  %v1356_v37 = vpop.f32.mrf.mxu0  ;;  %v1537_v44 = vpop.f32.mrf.mxu1  ;;  %v1573_v49 = vadd.f32 %v1534_v42, %v3533_v54 }
 0x146   : > { %v868_v15 = vpop.f32.mrf.mxu2  ;;  %2845 = vmatmul.msk.bf16.gmra.mxu0 %vm499_vm1, %v2188_v7  ;;  %2821 = vmatmul.msk.bf16.gmra.mxu3 %vm499_vm1, %v1983_v27 }
 0x147   : > { %v890_v11 = vadd.f32 %v868_v15, %v3438_v45  ;;  %v1574_v15 = vadd.f32 %v1537_v44, %v3547_v60 }
 0x149   : > { %v1044_v36 = vadd.f32 %v1022_v48, %v890_v11  ;;  %v1027_v62 = vpop.f32.mrf.mxu3 }
 0x14b   : > { %v3684_v1 = vadd.f32 %v1356_v37, %v1044_v36  ;;  %v1358_v47 = vpop.f32.mrf.mxu0  ;;  %v1539_v52 = vpop.f32.mrf.mxu1 }
 0x14e   : > { %v870_v13 = vpop.f32.mrf.mxu2 }
 0x14f   : > { %v891_v45 = vadd.f32 %v870_v13, %v3460_v10 }
 0x151   : > { %v1045_v17 = vadd.f32 %v1024_v20, %v891_v45  ;;  %v1029_v18 = vpop.f32.mrf.mxu3  ;;  %v1575_v45 = vadd.f32 %v1539_v52, %v3565_v12 }
 0x153   : > { %2788 = vmatmul.msk.bf16.gmra.mxu2 %vm499_vm1, %v2881_v30  ;;  %v3693_v58 = vadd.f32 %v1358_v47, %v1045_v17  ;;  %v1361_v33 = vpop.f32.mrf.mxu0  ;;  %v1542_v29 = vpop.f32.mrf.mxu1 }
 0x156   : > { %v873_v43 = vpop.f32.mrf.mxu2  ;;  %2846 = vmatmul.msk.bf16.gmra.mxu0 %vm499_vm1, %v2189_v51 }
 0x157   : > { %v892_v55 = vadd.f32 %v873_v43, %v3473_v34 }
 0x159   : > { %v1046_v41 = vadd.f32 %v1027_v62, %v892_v55  ;;  %v2020_v61 = vpop.f32.mrf.mxu3  ;;  %v1576_v55 = vadd.f32 %v1542_v29, %v3581_v0 }
 0x15b   : > { %v3697_v10 = vadd.f32 %v1361_v33, %v1046_v41  ;;  %v1363_v46 = vpop.f32.mrf.mxu0  ;;  %v1544_v54 = vpop.f32.mrf.mxu1 }
 0x15e   : > { %v875_v48 = vpop.f32.mrf.mxu2 }
 0x15f   : > { %v893_v25 = vadd.f32 %v875_v48, %v3495_v14  ;;  %v3707_v14 = vld [vmem:[%s3790_s2] ss:$0 sm:$0xff] }
 0x161   : > { %v1047_v23 = vadd.f32 %v1029_v18, %v893_v25  ;;  %v2022_v31 = vpop.f32.mrf.mxu3 }
 0x163   : > { %v3700_v24 = vadd.f32 %v1363_v46, %v1047_v23  ;;  %v2226_v32 = vpop.f32.mrf.mxu0  ;;  %v1547_v57 = vpop.f32.mrf.mxu1 }
 0x166   : > { %v1686_v26 = vpop.f32.mrf.mxu2 }
 0x167   : > { %v1726_v59 = vadd.f32 %v1686_v26, %v1572_v38  ;;  %v1577_v26 = vadd.f32 %v1544_v54, %v3599_v50 }
 0x169   : > { %v2060_v34 = vadd.f32 %v2020_v61, %v1726_v59  ;;  %v2025_v56 = vpop.f32.mrf.mxu3 }
 0x16b   : > { %v2228_v22 = vpop.f32.mrf.mxu0  ;;  %v2266_v20 = vadd.f32 %v2226_v32, %v2060_v34  ;;  %v1549_v52 = vpop.f32.mrf.mxu1 }
 0x16d   : > { %v2286_v37 = vadd.f32 %v3707_v14, %v2266_v20 }
 0x16e   : > { %v1688_v7 = vpop.f32.mrf.mxu2 }
 0x16f   : > { %v1727_v27 = vadd.f32 %v1688_v7, %v1573_v49  ;;  %v2302_v11 = vmul.f32 0.2, %v2286_v37 }
 0x171   : > { %v2061_v9 = vadd.f32 %v2022_v31, %v1727_v27  ;;  %v2027_v63 = vpop.f32.mrf.mxu3  ;;  %v2318_v62 = vmax.f32 %v2286_v37, %v2302_v11  ;;  %v1578_v27 = vadd.f32 %v1547_v57, %v3617_v3 }
 0x173   : > { %v2267_v6 = vadd.f32 %v2228_v22, %v2061_v9  ;;  %v2231_v2 = vpop.f32.mrf.mxu0  ;;  %v1552_v20 = vpop.f32.mrf.mxu1 }
 0x175   : > { %v2287_v21 = vadd.f32 %v3707_v14, %v2267_v6 }
 0x176   : > { %v1691_v16 = vpop.f32.mrf.mxu2 }
 0x177   : > { %v2303_v8 = vmul.f32 0.2, %v2287_v21  ;;  %v1728_v36 = vadd.f32 %v1691_v16, %v1574_v15 }
 0x179   : > { %v2319_v47 = vmax.f32 %v2287_v21, %v2303_v8  ;;  %v2062_v19 = vadd.f32 %v2025_v56, %v1728_v36  ;;  %v2030_v5 = vpop.f32.mrf.mxu3  ;;  %v1579_v8 = vadd.f32 %v1549_v52, %v3628_v40 }
 0x17b   : > { %v2334_v42 = vpack.c.bf16 %v2319_v47, %v2318_v62  ;;  %v2233_v13 = vpop.f32.mrf.mxu0  ;;  %v2268_v30 = vadd.f32 %v2231_v2, %v2062_v19  ;;  %v1554_v62 = vpop.f32.mrf.mxu1 }
 0x17d   : > { %2847 = vmatmul.msk.bf16.vlgmr.msra.gmra.mxu1 %vm2347_vm9, %v2334_v42  ;;  %v2288_v17 = vadd.f32 %v3707_v14, %v2268_v30  ;;  %v1580_v30 = vadd.f32 %v1552_v20, %v3642_v39 }
 0x17e   : > { %v1693_v60 = vpop.f32.mrf.mxu2 }
 0x17f   : > { %v1729_v28 = vadd.f32 %v1693_v60, %v1575_v45  ;;  %v2304_v44 = vmul.f32 0.2, %v2288_v17 }
 0x181   : > { %v2063_v18 = vadd.f32 %v2027_v63, %v1729_v28  ;;  %v2032_v51 = vpop.f32.mrf.mxu3  ;;  %v2320_v48 = vmax.f32 %v2288_v17, %v2304_v44 }
 0x183   : > { %v2269_v33 = vadd.f32 %v2233_v13, %v2063_v18  ;;  %v2236_v43 = vpop.f32.mrf.mxu0  ;;  %v1557_v18 = vpop.f32.mrf.mxu1 }
 0x185   : > { %v2289_v41 = vadd.f32 %v3707_v14, %v2269_v33 }
 0x186   : > { %v1696_v61 = vpop.f32.mrf.mxu2 }
 0x187   : > { %v2305_v46 = vmul.f32 0.2, %v2289_v41  ;;  %v1730_v12 = vadd.f32 %v1696_v61, %v1576_v55 }
 0x189   : > { %v2321_v25 = vmax.f32 %v2289_v41, %v2305_v46  ;;  %v2064_v23 = vadd.f32 %v2030_v5, %v1730_v12  ;;  %v2035_v31 = vpop.f32.mrf.mxu3  ;;  %v1581_v41 = vadd.f32 %v1554_v62, %v3656_v35 }
 0x18b   : > { %v2335_v32 = vpack.c.bf16 %v2321_v25, %v2320_v48  ;;  %v2238_v38 = vpop.f32.mrf.mxu0  ;;  %v2270_v59 = vadd.f32 %v2236_v43, %v2064_v23  ;;  %v1559_v23 = vpop.f32.mrf.mxu1 }
 0x18d   : > { %2848 = vmatmul.msk.bf16.gmra.mxu1 %vm2347_vm9, %v2335_v32  ;;  %v2290_v56 = vadd.f32 %v3707_v14, %v2270_v59  ;;  %v1582_v32 = vadd.f32 %v1557_v18, %v3664_v53 }
 0x18e   : > { %v1698_v34 = vpop.f32.mrf.mxu2 }
 0x18f   : > { %v1731_v0 = vadd.f32 %v1698_v34, %v1577_v26  ;;  %v2306_v37 = vmul.f32 0.2, %v2290_v56 }
 0x191   : > { %v2065_v29 = vadd.f32 %v2032_v51, %v1731_v0  ;;  %v2037_v22 = vpop.f32.mrf.mxu3  ;;  %v2322_v2 = vmax.f32 %v2290_v56, %v2306_v37 }
 0x193   : > { %v2271_v49 = vadd.f32 %v2238_v38, %v2065_v29  ;;  %v2241_v7 = vpop.f32.mrf.mxu0  ;;  %v1562_v20 = vpop.f32.mrf.mxu1 }
 0x195   : > { %v2291_v9 = vadd.f32 %v3707_v14, %v2271_v49 }
 0x196   : > { %v1701_v63 = vpop.f32.mrf.mxu2 }
 0x197   : > { %v2307_v6 = vmul.f32 0.2, %v2291_v9  ;;  %v1732_v50 = vadd.f32 %v1701_v63, %v1578_v27  ;;  %v1583_v27 = vadd.f32 %v1559_v23, %v3677_v4 }
 0x199   : > { %v2323_v15 = vmax.f32 %v2291_v9, %v2307_v6  ;;  %v2066_v11 = vadd.f32 %v2035_v31, %v1732_v50  ;;  %v2040_v21 = vpop.f32.mrf.mxu3 }
 0x19b   : > { %v2336_v54 = vpack.c.bf16 %v2323_v15, %v2322_v2  ;;  %v2243_v16 = vpop.f32.mrf.mxu0  ;;  %v2272_v36 = vadd.f32 %v2241_v7, %v2066_v11  ;;  %v1584_v11 = vadd.f32 %v1562_v20, %v3684_v1 }
 0x19d   : > { %2849 = vmatmul.msk.bf16.gmra.mxu1 %vm2347_vm9, %v2336_v54  ;;  %v2292_v19 = vadd.f32 %v3707_v14, %v2272_v36 }
 0x19e   : > { %v1703_v47 = vpop.f32.mrf.mxu2 }
 0x19f   : > { %v1733_v3 = vadd.f32 %v1703_v47, %v1579_v8  ;;  %v2308_v60 = vmul.f32 0.2, %v2292_v19 }
 0x1a1   : > { %v2067_v5 = vadd.f32 %v2037_v22, %v1733_v3  ;;  %v2042_v45 = vpop.f32.mrf.mxu3  ;;  %v2324_v51 = vmax.f32 %v2292_v19, %v2308_v60 }
 0x1a3   : > { %v2273_v42 = vadd.f32 %v2243_v16, %v2067_v5  ;;  %v2246_v13 = vpop.f32.mrf.mxu0  ;;  %v1564_v16 = vpop.f32.mrf.mxu1 }
 0x1a5   : > { %v2293_v28 = vadd.f32 %v3707_v14, %v2273_v42  ;;  %v1585_v42 = vadd.f32 %v1564_v16, %v3693_v58 }
 0x1a6   : > { %v1706_v57 = vpop.f32.mrf.mxu2 }
 0x1a7   : > { %v2309_v17 = vmul.f32 0.2, %v2293_v28  ;;  %v1734_v40 = vadd.f32 %v1706_v57, %v1580_v30 }
 0x1a9   : > { %v2325_v33 = vmax.f32 %v2293_v28, %v2309_v17  ;;  %v2068_v43 = vadd.f32 %v2040_v21, %v1734_v40  ;;  %v2045_v12 = vpop.f32.mrf.mxu3 }
 0x1ab   : > { %v2337_v55 = vpack.c.bf16 %v2325_v33, %v2324_v51  ;;  %v2248_v44 = vpop.f32.mrf.mxu0  ;;  %v2274_v61 = vadd.f32 %v2246_v13, %v2068_v43  ;;  %v1567_v60 = vpop.f32.mrf.mxu1 }
 0x1ac   : > { %v1586_v40 = vadd.f32 %v1567_v60, %v3697_v10 }
 0x1ad   : > { %2850 = vmatmul.msk.bf16.gmra.mxu1 %vm2347_vm9, %v2337_v55  ;;  %v2294_v48 = vadd.f32 %v3707_v14, %v2274_v61 }
 0x1ae   : > { %v1708_v46 = vpop.f32.mrf.mxu2 }
 0x1af   : > { %v1735_v39 = vadd.f32 %v1708_v46, %v1581_v41  ;;  %v2310_v38 = vmul.f32 0.2, %v2294_v48 }
 0x1b1   : > { %v2069_v25 = vadd.f32 %v2042_v45, %v1735_v39  ;;  %v2047_v0 = vpop.f32.mrf.mxu3  ;;  %v2326_v56 = vmax.f32 %v2294_v48, %v2310_v38 }
 0x1b3   : > { %v2275_v52 = vadd.f32 %v2248_v44, %v2069_v25  ;;  %v2251_v31 = vpop.f32.mrf.mxu0 }
 0x1b5   : > { %v2295_v26 = vadd.f32 %v3707_v14, %v2275_v52 }
 0x1b6   : > { %v1711_v59 = vpop.f32.mrf.mxu2 }
 0x1b7   : > { %v2311_v34 = vmul.f32 0.2, %v2295_v26  ;;  %v1736_v35 = vadd.f32 %v1711_v59, %v1582_v32 }
 0x1b9   : > { %v2327_v29 = vmax.f32 %v2295_v26, %v2311_v34  ;;  %v2070_v22 = vadd.f32 %v2045_v12, %v1736_v35  ;;  %v2050_v50 = vpop.f32.mrf.mxu3  ;;  %v1569_v12 = vpop.f32.mrf.mxu1 }
 0x1ba   : > { %v1587_v48 = vadd.f32 %v1569_v12, %v3700_v24 }
 0x1bb   : > { %v2338_v49 = vpack.c.bf16 %v2327_v29, %v2326_v56  ;;  %v2253_v7 = vpop.f32.mrf.mxu0  ;;  %v2276_v37 = vadd.f32 %v2251_v31, %v2070_v22  ;;  %v2926_v29 = vld [vmem:[%s3792_s4] ss:$0 sm:$0xff] }
 0x1bd   : > { %2851 = vmatmul.msk.bf16.gmra.mxu1 %vm2347_vm9, %v2338_v49  ;;  %v2296_v63 = vadd.f32 %v3707_v14, %v2276_v37 }
 0x1be   : > { %v1713_v9 = vpop.f32.mrf.mxu2 }
 0x1bf   : > { %v1737_v53 = vadd.f32 %v1713_v9, %v1583_v27  ;;  %v2312_v21 = vmul.f32 0.2, %v2296_v63 }
 0x1c1   : > { %v2071_v6 = vadd.f32 %v2047_v0, %v1737_v53  ;;  %v2328_v62 = vmax.f32 %v2296_v63, %v2312_v21  ;;  %v2052_v5 = vpop.f32.mrf.mxu3 }
 0x1c3   : > { %v2277_v2 = vadd.f32 %v2253_v7, %v2071_v6  ;;  %v2256_v15 = vpop.f32.mrf.mxu0 }
 0x1c5   : > { %v2297_v54 = vadd.f32 %v3707_v14, %v2277_v2 }
 0x1c6   : > { %v1716_v8 = vpop.f32.mrf.mxu2 }
 0x1c7   : > { %v2313_v36 = vmul.f32 0.2, %v2297_v54  ;;  %v1738_v4 = vadd.f32 %v1716_v8, %v1584_v11 }
 0x1c9   : > { %v2329_v47 = vmax.f32 %v2297_v54, %v2313_v36  ;;  %v2072_v3 = vadd.f32 %v2050_v50, %v1738_v4  ;;  %v2055_v33 = vpop.f32.mrf.mxu3 }
 0x1cb   : > { %v2339_v19 = vpack.c.bf16 %v2329_v47, %v2328_v62  ;;  %v2278_v13 = vadd.f32 %v2256_v15, %v2072_v3  ;;  %v2258_v45 = vpop.f32.mrf.mxu0 }
 0x1cd   : > { %2852 = vmatmul.msk.bf16.gmra.mxu1 %vm2347_vm9, %v2339_v19  ;;  %v2298_v28 = vadd.f32 %v3707_v14, %v2278_v13 }
 0x1ce   : > { %v1718_v30 = vpop.f32.mrf.mxu2 }
 0x1cf   : > { %v1739_v1 = vadd.f32 %v1718_v30, %v1585_v42  ;;  %v2314_v18 = vmul.f32 0.2, %v2298_v28 }
 0x1d1   : > { %v2073_v57 = vadd.f32 %v2052_v5, %v1739_v1  ;;  %v2330_v41 = vmax.f32 %v2298_v28, %v2314_v18  ;;  %v2057_v52 = vpop.f32.mrf.mxu3 }
 0x1d3   : > { %v2279_v17 = vadd.f32 %v2258_v45, %v2073_v57  ;;  %v2261_v44 = vpop.f32.mrf.mxu0 }
 0x1d5   : > { %v2299_v51 = vadd.f32 %v3707_v14, %v2279_v17 }
 0x1d6   : > { %v1721_v43 = vpop.f32.mrf.mxu2 }
 0x1d7   : > { %v2315_v55 = vmul.f32 0.2, %v2299_v51  ;;  %v1740_v58 = vadd.f32 %v1721_v43, %v1586_v40 }
 0x1d9   : > { %v2331_v61 = vmax.f32 %v2299_v51, %v2315_v55  ;;  %v2074_v46 = vadd.f32 %v2055_v33, %v1740_v58 }
 0x1db   : > { %v2340_v39 = vpack.c.bf16 %v2331_v61, %v2330_v41  ;;  %v2280_v25 = vadd.f32 %v2261_v44, %v2074_v46  ;;  %v2263_v38 = vpop.f32.mrf.mxu0 }
 0x1dd   : > { %2853 = vmatmul.msk.bf16.gmra.mxu1 %vm2347_vm9, %v2340_v39  ;;  %v2300_v31 = vadd.f32 %v3707_v14, %v2280_v25 }
 0x1de   : > { %v1723_v10 = vpop.f32.mrf.mxu2 }
 0x1df   : > { %v1741_v23 = vadd.f32 %v1723_v10, %v1587_v48  ;;  %v2316_v59 = vmul.f32 0.2, %v2300_v31 }
 0x1e1   : > { %v2075_v32 = vadd.f32 %v2057_v52, %v1741_v23  ;;  %v2332_v0 = vmax.f32 %v2300_v31, %v2316_v59 }
 0x1e3   : > { %v2281_v26 = vadd.f32 %v2263_v38, %v2075_v32 }
 0x1e5   : > { %v2301_v34 = vadd.f32 %v3707_v14, %v2281_v26 }
 0x1e7   : > { %v2317_v35 = vmul.f32 0.2, %v2301_v34 }
 0x1e9   : > { %v2333_v56 = vmax.f32 %v2301_v34, %v2317_v35 }
 0x1eb   : > { %v2341_v24 = vpack.c.bf16 %v2333_v56, %v2332_v0 }
 0x1ed   : > { %2854 = vmatmul.msk.bf16.gmra.mxu1 %vm2347_vm9, %v2341_v24 }
 0x1fa   : > { %v2385_v14 = vpop.f32.mrf.mxu1 }
 0x1fb   : > { %v2386_v22 = vadd.f32 %v2926_v29, %v2385_v14 }
 0x1fd   : > { %2425 = vst [vmem:[%s3755_s25] sm:$0xff] %v2386_v22 }
 0x202   : > { %v2387_v49 = vpop.f32.mrf.mxu1 }
 0x203   : > { %v2388_v20 = vadd.f32 %v2926_v29, %v2387_v49 }
 0x205   : > { %2426 = vst [vmem:[%s3755_s25 + $0x8] sm:$0xff] %v2388_v20 }
 0x20a   : > { %v2390_v7 = vpop.f32.mrf.mxu1 }
 0x20b   : > { %v2391_v27 = vadd.f32 %v2926_v29, %v2390_v7 }
 0x20d   : > { %2427 = vst [vmem:[%s3755_s25 + $0x10] sm:$0xff] %v2391_v27 }
 0x212   : > { %v2392_v37 = vpop.f32.mrf.mxu1 }
 0x213   : > { %v2393_v9 = vadd.f32 %v2926_v29, %v2392_v37 }
 0x215   : > { %2428 = vst [vmem:[%s3755_s25 + $0x18] sm:$0xff] %v2393_v9 }
 0x21a   : > { %v2395_v53 = vpop.f32.mrf.mxu1 }
 0x21b   : > { %v2396_v63 = vadd.f32 %v2926_v29, %v2395_v53 }
 0x21d   : > { %2429 = vst [vmem:[%s3755_s25 + $0x20] sm:$0xff] %v2396_v63 }
 0x222   : > { %v2397_v6 = vpop.f32.mrf.mxu1 }
 0x223   : > { %v2398_v50 = vadd.f32 %v2926_v29, %v2397_v6 }
 0x225   : > { %2430 = vst [vmem:[%s3755_s25 + $0x28] sm:$0xff] %v2398_v50 }
 0x22a   : > { %v2400_v2 = vpop.f32.mrf.mxu1 }
 0x22b   : > { %v2401_v15 = vadd.f32 %v2926_v29, %v2400_v2 }
 0x22d   : > { %2431 = vst [vmem:[%s3755_s25 + $0x30] sm:$0xff] %v2401_v15 }
 0x232   : > { %v2402_v11 = vpop.f32.mrf.mxu1 }
 0x233   : > { %v2403_v21 = vadd.f32 %v2926_v29, %v2402_v11 }
 0x235   : > { %2432 = vst [vmem:[%s3755_s25 + $0x38] sm:$0xff] %v2403_v21 }
 0x23a   : > { %v2405_v54 = vpop.f32.mrf.mxu1 }
 0x23b   : > { %v2406_v16 = vadd.f32 %v2926_v29, %v2405_v54 }
 0x23d   : > { %2433 = vst [vmem:[%s3755_s25 + $0x40] sm:$0xff] %v2406_v16 }
 0x242   : > { %v2407_v8 = vpop.f32.mrf.mxu1 }
 0x243   : > { %v2408_v36 = vadd.f32 %v2926_v29, %v2407_v8 }
 0x245   : > { %2434 = vst [vmem:[%s3755_s25 + $0x48] sm:$0xff] %v2408_v36 }
 0x24a   : > { %v2410_v4 = vpop.f32.mrf.mxu1 }
 0x24b   : > { %v2411_v62 = vadd.f32 %v2926_v29, %v2410_v4 }
 0x24d   : > { %2435 = vst [vmem:[%s3755_s25 + $0x50] sm:$0xff] %v2411_v62 }
 0x252   : > { %v2412_v47 = vpop.f32.mrf.mxu1 }
 0x253   : > { %v2413_v3 = vadd.f32 %v2926_v29, %v2412_v47 }
 0x255   : > { %2436 = vst [vmem:[%s3755_s25 + $0x58] sm:$0xff] %v2413_v3 }
 0x25a   : > { %v2415_v19 = vpop.f32.mrf.mxu1 }
 0x25b   : > { %v2416_v5 = vadd.f32 %v2926_v29, %v2415_v19 }
 0x25d   : > { %2437 = vst [vmem:[%s3755_s25 + $0x60] sm:$0xff] %v2416_v5 }
 0x262   : > { %v2417_v42 = vpop.f32.mrf.mxu1 }
 0x263   : > { %v2418_v13 = vadd.f32 %v2926_v29, %v2417_v42 }
 0x265   : > { %2438 = vst [vmem:[%s3755_s25 + $0x68] sm:$0xff] %v2418_v13 }
 0x26a   : > { %v2420_v45 = vpop.f32.mrf.mxu1 }
 0x26b   : > { %v2421_v30 = vadd.f32 %v2926_v29, %v2420_v45 }
 0x26d   : > { %2439 = vst [vmem:[%s3755_s25 + $0x70] sm:$0xff] %v2421_v30 }
 0x272   : > { %v2422_v1 = vpop.f32.mrf.mxu1 }
 0x273   : > { %v2423_v60 = vadd.f32 %v2926_v29, %v2422_v1 }
 0x275   : > { %2440 = vst [vmem:[%s3755_s25 + $0x78] sm:$0xff] %v2423_v60 }
 0x276 PF: > { %s15_s22 = sadd.s32 1, %s2965_s22   ;;  %s3798_s18 = smov %s2957_s20 }
 0x277   : > { %p12_p7 = scmp.ge.s32.totalorder %s15_s22, 6   ;;  %s3799_s19 = smov %s2961_s21 }
 0x278   : > { %s3800_s20 = smov %s3803_s23  ;;  %s3801_s21 = smov %s3807_s24 }
 0x279   :  { %14 = sbr.rel (!%p12_p7) target bundleno = 3 (0x3), region = 81 }

// kernel: scale_prediction.1
= control target key start
LH: loop header
LB: loop body
LE: loop exit
PB: predicated region body
PF: predicated region fallthrough
CT: control target
= control target key end

     0   :  { %s2997_s18 = smov 0   ;;  %s2999_s19 = smov 0   ;;  %s3788_s0 = inlined_call_operand.vmem [shape: bf16[2,18,18,4], index: 0, kind: input, shape index: {}]   ;;  %s3789_s1 = inlined_call_operand.vmem [shape: bf16[9,4,8], index: 1, kind: input, shape index: {}]   ;;  %s3790_s2 = inlined_call_operand.vmem [shape: f32[1,8], index: 2, kind: input, shape index: {}]   ;;  %s3791_s3 = inlined_call_operand.vmem [shape: bf16[8,128], index: 3, kind: input, shape index: {}]   ;;  %s3792_s4 = inlined_call_operand.vmem [shape: f32[1,128], index: 4, kind: input, shape index: {}]   ;;  %s3793_s5 = inlined_call_operand.vmem [shape: f32[2,256,128], index: 5, kind: output, shape index: {}]  }
   0x1   :  { %s3001_s20 = smov 0   ;;  %s3003_s21 = smov 0  }
   0x2   :  { %s3005_s22 = smov 0  }
   0x3 LB: > { %s24_s23 = sadd.s32 1, %s2957_s20  ;;  %s27_s24 = sadd.s32 1, %s2961_s21  ;;  %s2965_s22 = sphi %s3005_s22, %s15_s22   ;;  %s2961_s21 = sphi %s3003_s21, %s3801_s21   ;;  %s2957_s20 = sphi %s3001_s20, %s3800_s20   ;;  %s2953_s19 = sphi %s2999_s19, %s3799_s19   ;;  %s2949_s18 = sphi %s2997_s18, %s3798_s18  }
   0x4   : > { %p25_p0 = scmp.ge.s32.totalorder %s24_s23, 2  ;;  %p2539_p1 = scmp.ge.s32.totalorder %s2965_s22, 1 }
   0x5   : > { %p201_p2 = scmp.lt.s32.totalorder %s2965_s22, 5 }
   0x6   : > { %s3803_s23 = smov (%p25_p0, %s24_s23), 0  ;;  %s3805_s24 = smov (!%p25_p0, %s27_s24), %s2961_s21 }
   0x7   : > { %p202_p3 = pnand %p2539_p1, %p201_p2  ;;  %p29_p4 = scmp.ge.s32.totalorder %s3805_s24, 2 }
   0x8   : > { %p233_p5 = scmp.lt.s32.totalorder (!%p202_p3), %s2953_s19, 1  ;;  %s2857_s6 = smul.u32 (!%p202_p3), 96, %s2949_s18 }
   0x9   : > { %s3807_s24 = smov (%p29_p4, %s3805_s24), 0  ;;  %205 = sbr.rel (%p202_p3) target bundleno = 630 (0x276), region = 40 }
   0xa   : > { %s2541_s10 = sshll.u32 (!%p202_p3), %s2949_s18, 4 }
   0xb   : > { %p241_p6 = scmp.lt.s32.totalorder (!%p202_p3), %s2541_s10, 31 }
   0xe   : > { %v269_v0 = vld [vmem:[%s3789_s1] sm:$0x3]  ;;  %vm524_vm0 = vcmask 1041408   ;;  %v2547_v2 = vld [vmem:[%s3789_s1 + $0x2] sm:$0x3]  ;;  %s3809_s19 = smov (!%p233_p5, %s2953_s19), 1 }
   0xf   : > { %v642_v1 = vsel %vm524_vm0, %v269_v0, 0  ;;  %v526_v3 = vsel %vm524_vm0, %v2547_v2, 0  ;;  %v2604_v4 = vld [vmem:[%s3789_s1 + $0x4] sm:$0x3]  ;;  %v2631_v6 = vld [vmem:[%s3789_s1 + $0x6] sm:$0x3] }
  0x10   : > { %2883 = vmatpush.bf16.msra.mxu3 %v642_v1  ;;  %651 = vmatpush.bf16.msra.mxu1 %v642_v1  ;;  %v827_v5 = vsel %vm524_vm0, %v2604_v4, 0  ;;  %v2696_v7 = vld [vmem:[%s3789_s1 + $0x8] sm:$0x3]  ;;  %s2884_s11 = smul.u32 216, %s3809_s19  ;;  %v981_v8 = vsel %vm524_vm0, %v2631_v6, 0  ;;  %vm499_vm1 = vcmask 31744  }
  0x11   : > { %2882 = vmatpush.bf16.msra.mxu2 %v526_v3  ;;  %535 = vmatpush.bf16.msra.mxu0 %v526_v3  ;;  %v1315_v9 = vsel %vm524_vm0, %v2696_v7, 0  ;;  %vm278_vm2 = vsmask.f32 3328  ;;  %vm279_vm3 = vsmask.f32 7440  ;;  %vm717_vm5 = vcmask 1042432  }
  0x12   : > { %s237_s14 = scalar_lea.vmem %s3788_s0, %s2884_s11  ;;  %vm3088_vm4 = vmor %vm278_vm2, %vm279_vm3  ;;  %vm718_vm6 = vcmask 1046532   ;;  %vm2372_vm8 = vcmask 1043456   ;;  %vm2347_vm9 = vcmask 64512   ;;  %s3811_s10 = smov (!%p241_p6, %s2541_s10), 31 }
  0x13   : > { %s3056_s15 = scalar_lea.vmem %s237_s14, %s2857_s6  ;;  %vm3220_vm7 = vmor %vm717_vm5, %vm718_vm6  ;;  %s2542_s11 = sshll.u32 %s3809_s19, 5 }
  0x14   : > { %990 = vmatpush.bf16.msrb.mxu3 %v981_v8  ;;  %v2862_v10 = vld [vmem:[%s3056_s15 + $0x30] sm:$0xff]  ;;  %v3064_v13 = vld [vmem:[%s3056_s15 + $0x38] sm:$0x1]  ;;  %v253_v19 = vld [vmem:[%s3056_s15] sm:$0xf]  ;;  %s244_s12 = sadd.s32 %s2542_s11, %s3811_s10 }
  0x15   : > { %836 = vmatpush.bf16.msrb.mxu2 %v827_v5  ;;  %1324 = vmatpush.bf16.msrb.mxu0 %v1315_v9  ;;  %v261_v11 = vld [vmem:[%s3056_s15 + $0x30] sm:$0xf]  ;;  %v3061_v12 = vld [vmem:[%s3056_s15 + $0x34] sm:$0xf]  ;;  %v397_v18 = vshll.u32 %v3064_v13, 16  ;;  %v2858_v21 = vld [vmem:[%s3056_s15] sm:$0xff] }
  0x16   : > { %v378_v14 = vshrl.u32 %v261_v11, 16  ;;  %v381_v15 = vshll.u32 %v261_v11, 16  ;;  %v387_v16 = vshll.u32 %v3061_v12, 16  ;;  %v391_v17 = vshrl.u32 %v3061_v12, 16  ;;  %2592 = vmatmul.msk.bf16.vlgmr.msra.gmra.mxu3 %vm499_vm1, %v2862_v10  ;;  %v3072_v20 = vld [vmem:[%s3056_s15 + $0x4] sm:$0xf]  ;;  %2588 = vmatmul.msk.bf16.vlgmr.msra.gmra.mxu1 %vm499_vm1, %v2858_v21 }
  0x17   : > { %v3076_v26 = vld [vmem:[%s3056_s15 + $0x8] sm:$0x1]  ;;  %v399_v27 = vrot.slane %v397_v18, 5  ;;  %v282_v28 = vshrl.u32 %v253_v19, 16  ;;  %v285_v29 = vshll.u32 %v253_v19, 16  ;;  %v291_v30 = vshll.u32 %v3072_v20, 16 }
  0x18   : > { %v380_v22 = vrot.slane %v378_v14, 4  ;;  %v383_v23 = vrot.slane %v381_v15, 5  ;;  %v389_v24 = vrot.slane %v387_v16, 5  ;;  %v393_v25 = vrot.slane %v391_v17, 4  ;;  %v263_v35 = vld [vmem:[%s3056_s15 + $0x3c] sm:$0xf] }
  0x19   : > { %v295_v33 = vshrl.u32 %v3072_v20, 16  ;;  %v301_v34 = vshll.u32 %v3076_v26, 16  ;;  %v3084_v36 = vld [vmem:[%s3056_s15 + $0x40] sm:$0xf]  ;;  %v284_v38 = vrot.slane %v282_v28, 4  ;;  %v287_v39 = vrot.slane %v285_v29, 5 }
  0x1a   : > { %v384_v31 = vor.u32 %v383_v23, %v380_v22  ;;  %v394_v32 = vor.u32 %v393_v25, %v389_v24  ;;  %v293_v40 = vrot.slane %v291_v30, 5  ;;  %v402_v46 = vshrl.u32 %v263_v35, 16  ;;  %v3098_v52 = vld [vmem:[%s3056_s15 + $0x44] sm:$0x1]  ;;  %v255_v54 = vld [vmem:[%s3056_s15 + $0xc] sm:$0xf] }
  0x1b   : > { %v297_v43 = vrot.slane %v295_v33, 4  ;;  %v303_v44 = vrot.slane %v301_v34, 5  ;;  %v288_v45 = vor.u32 %v287_v39, %v284_v38  ;;  %v405_v47 = vshll.u32 %v263_v35, 16  ;;  %v3106_v2 = vld [vmem:[%s3056_s15 + $0x10] sm:$0xf]  ;;  %v2863_v11 = vld [vmem:[%s3056_s15 + $0x3c] sm:$0xff] }
  0x1c   : > { %v385_v41 = vrot.slane %v384_v31, 4  ;;  %v395_v42 = vrot.slane %v394_v32, 4  ;;  %v411_v48 = vshll.u32 %v3084_v36, 16  ;;  %v415_v53 = vshrl.u32 %v3084_v36, 16  ;;  %v3111_v8 = vld [vmem:[%s3056_s15 + $0x14] sm:$0x1] }
  0x1d   : > { %v298_v51 = vor.u32 %v297_v43, %v293_v40  ;;  %v289_v57 = vrot.slane %v288_v45, 4  ;;  %v404_v58 = vrot.slane %v402_v46, 4  ;;  %v407_v60 = vrot.slane %v405_v47, 5  ;;  %v265_v9 = vld [vmem:[%s3056_s15 + $0x48] sm:$0xf]  ;;  %v2859_v25 = vld [vmem:[%s3056_s15 + $0xc] sm:$0xff] }
  0x1e   : > { %v390_v49 = vsel %vm3088_vm4, %v385_v41, %v389_v24  ;;  %v400_v50 = vsel %vm3088_vm4, %v395_v42, %v399_v27  ;;  %v413_v61 = vrot.slane %v411_v48, 5  ;;  %v417_v62 = vrot.slane %v415_v53, 4  ;;  %v3121_v27 = vld [vmem:[%s3056_s15 + $0x4c] sm:$0xf]  ;;  %s2543_s13 = sshll.u32 %s244_s12, 3 }
  0x1f   : > { %v483_v55 = vunpack.c.l.b16 %v390_v49  ;;  %v484_v56 = vunpack.c.l.b16 %v400_v50  ;;  %v299_v59 = vrot.slane %v298_v51, 4  ;;  %v294_v0 = vsel %vm3088_vm4, %v289_v57, %v293_v40  ;;  %v257_v40 = vld [vmem:[%s3056_s15 + $0x18] sm:$0xf]  ;;  %v3134_v49 = vld [vmem:[%s3056_s15 + $0x1c] sm:$0xf]  ;;  %s3755_s25 = scalar_lea.vmem %s3793_s5, %s2543_s13 }
  0x20   : > { %v421_v1 = vshll.u32 %v3098_v52, 16  ;;  %v306_v3 = vshrl.u32 %v255_v54, 16  ;;  %v475_v5 = vunpack.c.l.b16 %v294_v0  ;;  %v408_v6 = vor.u32 %v407_v60, %v404_v58  ;;  %v3139_v51 = vld [vmem:[%s3056_s15 + $0x50] sm:$0x1] }
  0x21   : > { %v495_v63 = vpack.c.b16 %v484_v56, %v483_v55  ;;  %v304_v4 = vsel %vm3088_vm4, %v299_v59, %v303_v44  ;;  %v418_v7 = vor.u32 %v417_v62, %v413_v61  ;;  %v309_v16 = vshll.u32 %v255_v54, 16 }
  0x22   : > { %v476_v10 = vunpack.c.l.b16 %v304_v4  ;;  %v423_v14 = vrot.slane %v421_v1, 5  ;;  %v308_v15 = vrot.slane %v306_v3, 4  ;;  %v409_v17 = vrot.slane %v408_v6, 4  ;;  %v3147_v4 = vld [vmem:[%s3056_s15 + $0x20] sm:$0x1] }
  0x23   : > { %2552 = vmatmul.msk.bf16.vlgmr.msra.gmra.mxu2 %vm499_vm1, %v495_v63  ;;  %v419_v18 = vrot.slane %v418_v7, 4  ;;  %v315_v19 = vshll.u32 %v3106_v2, 16  ;;  %v319_v21 = vshrl.u32 %v3106_v2, 16  ;;  %v311_v23 = vrot.slane %v309_v16, 5 }
  0x24   : > { %v491_v22 = vpack.c.b16 %v476_v10, %v475_v5  ;;  %v325_v24 = vshll.u32 %v3111_v8, 16  ;;  %v426_v28 = vshrl.u32 %v265_v9, 16  ;;  %v414_v29 = vsel %vm3088_vm4, %v409_v17, %v413_v61  ;;  %v267_v17 = vld [vmem:[%s3056_s15 + $0x54] sm:$0xf] }
  0x25   : > { %v424_v30 = vsel %vm3088_vm4, %v419_v18, %v423_v14  ;;  %v317_v31 = vrot.slane %v315_v19, 5  ;;  %v321_v32 = vrot.slane %v319_v21, 4  ;;  %v312_v33 = vor.u32 %v311_v23, %v308_v15  ;;  %v2860_v19 = vld [vmem:[%s3056_s15 + $0x18] sm:$0xff] }
  0x26   : > { %2548 = vmatmul.msk.bf16.vlgmr.msra.gmra.mxu0 %vm499_vm1, %v491_v22  ;;  %2593 = vmatmul.msk.bf16.gmra.mxu3 %vm499_vm1, %v2863_v11  ;;  %v327_v35 = vrot.slane %v325_v24, 5  ;;  %v429_v38 = vshll.u32 %v265_v9, 16  ;;  %v435_v39 = vshll.u32 %v3121_v27, 16  ;;  %v485_v41 = vunpack.c.l.b16 %v414_v29  ;;  %v2864_v11 = vld [vmem:[%s3056_s15 + $0x48] sm:$0xff]  ;;  %v3155_v21 = vld [vmem:[%s3056_s15 + $0x58] sm:$0xf] }
  0x27   : > { %v322_v34 = vor.u32 %v321_v32, %v317_v31  ;;  %v486_v42 = vunpack.c.l.b16 %v424_v30  ;;  %v313_v43 = vrot.slane %v312_v33, 4  ;;  %2589 = vmatmul.msk.bf16.gmra.mxu1 %vm499_vm1, %v2859_v25  ;;  %v439_v44 = vshrl.u32 %v3121_v27, 16  ;;  %v259_v29 = vld [vmem:[%s3056_s15 + $0x24] sm:$0xf] }
  0x28   : > { %v428_v46 = vrot.slane %v426_v28, 4  ;;  %v431_v47 = vrot.slane %v429_v38, 5  ;;  %v437_v48 = vrot.slane %v435_v39, 5  ;;  %v330_v54 = vshrl.u32 %v257_v40, 16 }
  0x29   : > { %v323_v45 = vrot.slane %v322_v34, 4  ;;  %v318_v50 = vsel %vm3088_vm4, %v313_v43, %v317_v31  ;;  %v441_v53 = vrot.slane %v439_v44, 4  ;;  %v333_v55 = vshll.u32 %v257_v40, 16  ;;  %v3167_v34 = vld [vmem:[%s3056_s15 + $0x28] sm:$0xf] }
  0x2a   : > { %v496_v57 = vpack.c.b16 %v486_v42, %v485_v41  ;;  %v339_v58 = vshll.u32 %v3134_v49, 16  ;;  %v477_v59 = vunpack.c.l.b16 %v318_v50  ;;  %v432_v60 = vor.u32 %v431_v47, %v428_v46  ;;  %v3177_v50 = vld [vmem:[%s3056_s15 + $0x5c] sm:$0x1] }
  0x2b   : > { %v328_v56 = vsel %vm3088_vm4, %v323_v45, %v327_v35  ;;  %v445_v61 = vshll.u32 %v3139_v51, 16  ;;  %v343_v62 = vshrl.u32 %v3134_v49, 16  ;;  %v442_v0 = vor.u32 %v441_v53, %v437_v48 }
  0x2c   : > { %v478_v63 = vunpack.c.l.b16 %v328_v56  ;;  %v332_v1 = vrot.slane %v330_v54, 4  ;;  %v335_v3 = vrot.slane %v333_v55, 5  ;;  %v341_v5 = vrot.slane %v339_v58, 5  ;;  %v3180_v54 = vld [vmem:[%s3056_s15 + $0x2c] sm:$0x1] }
  0x2d   : > { %v345_v6 = vrot.slane %v343_v62, 4  ;;  %v433_v7 = vrot.slane %v432_v60, 4  ;;  %v447_v9 = vrot.slane %v445_v61, 5  ;;  %v443_v14 = vrot.slane %v442_v0, 4 }
  0x2e   : > { %v492_v10 = vpack.c.b16 %v478_v63, %v477_v59  ;;  %v336_v15 = vor.u32 %v335_v3, %v332_v1  ;;  %v349_v16 = vshll.u32 %v3147_v4, 16  ;;  %v450_v22 = vshrl.u32 %v267_v17, 16 }
  0x2f   : > { %v346_v18 = vor.u32 %v345_v6, %v341_v5  ;;  %v438_v23 = vsel %vm3088_vm4, %v433_v7, %v437_v48  ;;  %v448_v24 = vsel %vm3088_vm4, %v443_v14, %v447_v9  ;;  %v453_v31 = vshll.u32 %v267_v17, 16  ;;  %v2748_v7 = vld [vmem:[%s3789_s1 + $0xc] sm:$0x3] }
  0x30   : > { %v337_v25 = vrot.slane %v336_v15, 4  ;;  %v351_v28 = vrot.slane %v349_v16, 5  ;;  %v459_v32 = vshll.u32 %v3155_v21, 16  ;;  %v463_v33 = vshrl.u32 %v3155_v21, 16  ;;  %v2861_v16 = vld [vmem:[%s3056_s15 + $0x24] sm:$0xff] }
  0x31   : > { %v347_v30 = vrot.slane %v346_v18, 4  ;;  %v487_v35 = vunpack.c.l.b16 %v438_v23  ;;  %v488_v38 = vunpack.c.l.b16 %v448_v24  ;;  %v354_v39 = vshrl.u32 %v259_v29, 16  ;;  %v2672_v18 = vld [vmem:[%s3056_s15 + $0xc] sm:$0xf]  ;;  %v2721_v24 = vld [vmem:[%s3789_s1 + $0xa] sm:$0x3] }
  0x32   : > { %v357_v40 = vshll.u32 %v259_v29, 16  ;;  %v342_v41 = vsel %vm3088_vm4, %v337_v25, %v341_v5  ;;  %v452_v42 = vrot.slane %v450_v22, 4  ;;  %v363_v43 = vshll.u32 %v3167_v34, 16  ;;  %v2865_v5 = vld [vmem:[%s3056_s15 + $0x54] sm:$0xff]  ;;  %v2813_v23 = vld [vmem:[%s3789_s1 + $0xe] sm:$0x3] }
  0x33   : > { %2553 = vmatmul.msk.bf16.gmra.mxu2 %vm499_vm1, %v496_v57  ;;  %v367_v44 = vshrl.u32 %v3167_v34, 16  ;;  %v352_v45 = vsel %vm3088_vm4, %v347_v30, %v351_v28  ;;  %v455_v46 = vrot.slane %v453_v31, 5  ;;  %v461_v47 = vrot.slane %v459_v32, 5  ;;  %v2838_v32 = vld [vmem:[%s3789_s1 + $0x10] sm:$0x3] }
  0x34   : > { %v465_v48 = vrot.slane %v463_v33, 4  ;;  %v497_v53 = vpack.c.b16 %v488_v38, %v487_v35  ;;  %v356_v55 = vrot.slane %v354_v39, 4  ;;  %v359_v56 = vrot.slane %v357_v40, 5  ;;  %v2705_v33 = vld [vmem:[%s3056_s15 + $0xc] sm:$0xe] }
  0x35   : > { %v479_v57 = vunpack.c.l.b16 %v342_v41  ;;  %v480_v58 = vunpack.c.l.b16 %v352_v45  ;;  %v365_v59 = vrot.slane %v363_v43, 5  ;;  %v369_v60 = vrot.slane %v367_v44, 4  ;;  %v2674_v35 = vld [vmem:[%s3056_s15 + $0x14] sm:$0x1] }
  0x36   : > { %2549 = vmatmul.msk.bf16.gmra.mxu0 %vm499_vm1, %v492_v10  ;;  %2594 = vmatmul.msk.bf16.gmra.mxu3 %vm499_vm1, %v2864_v11  ;;  %v456_v61 = vor.u32 %v455_v46, %v452_v42  ;;  %v466_v62 = vor.u32 %v465_v48, %v461_v47  ;;  %v469_v63 = vshll.u32 %v3177_v50, 16  ;;  %v373_v0 = vshll.u32 %v3180_v54, 16 }
  0x37   : > { %2590 = vmatmul.msk.bf16.gmra.mxu1 %vm499_vm1, %v2860_v19  ;;  %v360_v1 = vor.u32 %v359_v56, %v356_v55  ;;  %v493_v3 = vpack.c.b16 %v480_v58, %v479_v57  ;;  %v370_v6 = vor.u32 %v369_v60, %v365_v59  ;;  %v1675_v14 = vsel %vm524_vm0, %v2748_v7, 0  ;;  %v2673_v19 = vld [vmem:[%s3056_s15 + $0x10] sm:$0xf] }
  0x38   : > { %v457_v9 = vrot.slane %v456_v61, 4  ;;  %v467_v10 = vrot.slane %v466_v62, 4  ;;  %v471_v11 = vrot.slane %v469_v63, 5  ;;  %v375_v15 = vrot.slane %v373_v0, 5  ;;  %1684 = vmatpush.bf16.msra.mxu2 %v1675_v14 }
  0x39   : > { %v361_v17 = vrot.slane %v360_v1, 4  ;;  %v371_v22 = vrot.slane %v370_v6, 4  ;;  %v1416_v25 = vrot.slane %v2673_v19, 5  ;;  %v2009_v30 = vsel %vm524_vm0, %v2813_v23, 0 }
  0x3a   : > { %v462_v28 = vsel %vm3088_vm4, %v457_v9, %v461_v47  ;;  %v472_v29 = vsel %vm3088_vm4, %v467_v10, %v471_v11  ;;  %v1521_v31 = vsel %vm524_vm0, %v2721_v24, 0  ;;  %v1073_v38 = vshrl.u32 %v2672_v18, 16  ;;  %2018 = vmatpush.bf16.msra.mxu3 %v2009_v30  ;;  %v2676_v24 = vld [vmem:[%s3056_s15 + $0x1c] sm:$0xf] }
  0x3b   : > { %v1076_v39 = vshll.u32 %v2672_v18, 16  ;;  %v1082_v40 = vshll.u32 %v2673_v19, 16  ;;  %v2215_v41 = vsel %vm524_vm0, %v2838_v32, 0  ;;  %v1086_v42 = vshrl.u32 %v2673_v19, 16  ;;  %1530 = vmatpush.bf16.msrb.mxu1 %v1521_v31 }
  0x3c   : > { %2224 = vmatpush.bf16.msra.mxu0 %v2215_v41  ;;  %v2713_v43 = vrot.slane %v2705_v33, 9  ;;  %v1418_v44 = vrot.slane %v1416_v25, 4  ;;  %v1419_v45 = vrot.slane %v2674_v35, 5  ;;  %v489_v46 = vunpack.c.l.b16 %v462_v28  ;;  %v2677_v33 = vld [vmem:[%s3056_s15 + $0x20] sm:$0x1] }
  0x3d   : > { %v490_v47 = vunpack.c.l.b16 %v472_v29  ;;  %v366_v48 = vsel %vm3088_vm4, %v361_v17, %v365_v59  ;;  %v722_v56 = vrot.slane %v3072_v20, 5  ;;  %v1075_v57 = vrot.slane %v1073_v38, 4  ;;  %v2675_v29 = vld [vmem:[%s3056_s15 + $0x18] sm:$0xf] }
  0x3e   : > { %v1078_v58 = vrot.slane %v1076_v39, 5  ;;  %v1084_v60 = vrot.slane %v1082_v40, 5  ;;  %v1088_v61 = vrot.slane %v1086_v42, 4  ;;  %v1417_v62 = vsel %vm3220_vm7, %v2713_v43, %v1416_v25  ;;  %v2706_v25 = vld [vmem:[%s3056_s15 + $0x18] sm:$0xe] }
  0x3f   : > { %v1420_v59 = vsel %vm3220_vm7, %v1418_v44, %v1419_v45  ;;  %v498_v63 = vpack.c.b16 %v490_v47, %v489_v46  ;;  %v481_v0 = vunpack.c.l.b16 %v366_v48  ;;  %v1472_v20 = vunpack.c.l.b16 %v1417_v62  ;;  %v694_v62 = vld [vmem:[%s3056_s15 + $0xc] sm:$0xe] }
  0x40   : > { %v1079_v6 = vor.u32 %v1078_v58, %v1075_v57  ;;  %v1473_v7 = vunpack.c.l.b16 %v1420_v59  ;;  %v724_v10 = vrot.slane %v722_v56, 4  ;;  %v1089_v11 = vor.u32 %v1088_v61, %v1084_v60 }
  0x41   : > { %v1092_v14 = vshll.u32 %v2674_v35, 16  ;;  %v1423_v28 = vrot.slane %v2676_v24, 5  ;;  %v2714_v38 = vrot.slane %v2706_v25, 9  ;;  %v1426_v40 = vrot.slane %v2677_v33, 5 }
  0x42   : > { %v1080_v17 = vrot.slane %v1079_v6, 4  ;;  %v1488_v18 = vpack.c.b16 %v1473_v7, %v1472_v20  ;;  %v1097_v41 = vshrl.u32 %v2675_v29, 16  ;;  %v1100_v42 = vshll.u32 %v2675_v29, 16 }
  0x43   : > { %2554 = vmatmul.msk.bf16.gmra.mxu2 %vm499_vm1, %v497_v53  ;;  %v376_v53 = vsel %vm3088_vm4, %v371_v22, %v375_v15  ;;  %v1090_v22 = vrot.slane %v1089_v11, 4  ;;  %v1094_v23 = vrot.slane %v1092_v14, 5  ;;  %v1425_v39 = vrot.slane %v1423_v28, 4  ;;  %v2679_v11 = vld [vmem:[%s3056_s15 + $0x28] sm:$0xf] }
  0x44   : > { %v482_v1 = vunpack.c.l.b16 %v376_v53  ;;  %v1085_v32 = vsel %vm3088_vm4, %v1080_v17, %v1084_v60  ;;  %v1106_v43 = vshll.u32 %v2676_v24, 16  ;;  %v1110_v44 = vshrl.u32 %v2676_v24, 16 }
  0x45   : > { %v1095_v35 = vsel %vm3088_vm4, %v1090_v22, %v1094_v23  ;;  %v1266_v46 = vunpack.c.l.b16 %v1085_v32  ;;  %v1424_v48 = vsel %vm3220_vm7, %v2714_v38, %v1423_v28  ;;  %v1427_v53 = vsel %vm3220_vm7, %v1425_v39, %v1426_v40 }
  0x46   : > { %2550 = vmatmul.msk.bf16.gmra.mxu0 %vm499_vm1, %v493_v3  ;;  %2595 = vmatmul.msk.bf16.gmra.mxu3 %vm499_vm1, %v2865_v5  ;;  %v693_v3 = vld [vmem:[%s3056_s15] sm:$0xe]  ;;  %v725_v5 = vrot.slane %v3076_v26, 5  ;;  %v494_v15 = vpack.c.b16 %v482_v1, %v481_v0  ;;  %v1267_v47 = vunpack.c.l.b16 %v1095_v35  ;;  %v1102_v57 = vrot.slane %v1100_v42, 5  ;;  %v2867_v1 = vld [vmem:[%s3056_s15 + $0x18] sm:$0xff] }
  0x47   : > { %2591 = vmatmul.msk.bf16.gmra.mxu1 %vm499_vm1, %v2861_v16  ;;  %v2596_v9 = vrot.slane %v693_v3, 9  ;;  %v2866_v16 = vld [vmem:[%s3056_s15 + $0xc] sm:$0xff]  ;;  %v1108_v58 = vrot.slane %v1106_v43, 5  ;;  %v1112_v60 = vrot.slane %v1110_v44, 4  ;;  %v729_v61 = vrot.slane %v3106_v2, 5 }
  0x48   : > { %v726_v19 = vsel %vm3220_vm7, %v724_v10, %v725_v5  ;;  %v1474_v59 = vunpack.c.l.b16 %v1424_v48  ;;  %v1282_v0 = vpack.c.b16 %v1267_v47, %v1266_v46  ;;  %v1116_v6 = vshll.u32 %v2677_v33, 16  ;;  %v695_v44 = vld [vmem:[%s3056_s15 + $0x18] sm:$0xe] }
  0x49   : > { %v723_v26 = vsel %vm3220_vm7, %v2596_v9, %v722_v56  ;;  %v779_v31 = vunpack.c.l.b16 %v726_v19  ;;  %v1099_v56 = vrot.slane %v1097_v41, 4  ;;  %v1113_v5 = vor.u32 %v1112_v60, %v1108_v58  ;;  %v2680_v19 = vld [vmem:[%s3056_s15 + $0x2c] sm:$0x1] }
  0x4a   : > { %v778_v30 = vunpack.c.l.b16 %v723_v26  ;;  %v2597_v20 = vrot.slane %v694_v62, 9  ;;  %v731_v7 = vrot.slane %v729_v61, 4  ;;  %v732_v9 = vrot.slane %v3111_v8, 5  ;;  %v2678_v8 = vld [vmem:[%s3056_s15 + $0x24] sm:$0xf] }
  0x4b   : > { %v1103_v3 = vor.u32 %v1102_v57, %v1099_v56  ;;  %v1114_v14 = vrot.slane %v1113_v5, 4  ;;  %v1430_v17 = vrot.slane %v2679_v11, 5  ;;  %v1433_v24 = vrot.slane %v2680_v19, 5 }
  0x4c   : > { %v794_v45 = vpack.c.b16 %v779_v31, %v778_v30  ;;  %v733_v26 = vsel %vm3220_vm7, %v731_v7, %v732_v9  ;;  %v1121_v31 = vshrl.u32 %v2678_v8, 16  ;;  %v1124_v32 = vshll.u32 %v2678_v8, 16 }
  0x4d   : > { %v1104_v2 = vrot.slane %v1103_v3, 4  ;;  %v1432_v23 = vrot.slane %v1430_v17, 4  ;;  %v781_v28 = vunpack.c.l.b16 %v733_v26  ;;  %v1130_v33 = vshll.u32 %v2679_v11, 16  ;;  %v2682_v3 = vld [vmem:[%s3056_s15 + $0x34] sm:$0xf] }
  0x4e   : > { %v1134_v35 = vshrl.u32 %v2679_v11, 16  ;;  %v736_v43 = vrot.slane %v3134_v49, 5  ;;  %v1126_v46 = vrot.slane %v1124_v32, 5  ;;  %v2598_v60 = vrot.slane %v695_v44, 9  ;;  %v2683_v11 = vld [vmem:[%s3056_s15 + $0x38] sm:$0x1] }
  0x4f   : > { %v1109_v29 = vsel %vm3088_vm4, %v1104_v2, %v1108_v58  ;;  %v1434_v39 = vsel %vm3220_vm7, %v1432_v23, %v1433_v24  ;;  %v1132_v47 = vrot.slane %v1130_v33, 5  ;;  %v2868_v58 = vld [vmem:[%s3056_s15 + $0x24] sm:$0xff]  ;;  %v1440_v26 = vrot.slane %v2683_v11, 5 }
  0x50   : > { %v1268_v41 = vunpack.c.l.b16 %v1109_v29  ;;  %v1136_v48 = vrot.slane %v1134_v35, 4  ;;  %v1477_v56 = vunpack.c.l.b16 %v1434_v39  ;;  %v738_v62 = vrot.slane %v736_v43, 4  ;;  %v696_v39 = vld [vmem:[%s3056_s15 + $0x24] sm:$0xe] }
  0x51   : > { %v737_v5 = vsel %vm3220_vm7, %v2598_v60, %v736_v43  ;;  %v743_v24 = vrot.slane %v3167_v34, 5  ;;  %v2599_v43 = vrot.slane %v696_v39, 9 }
  0x52   : > { %v1137_v49 = vor.u32 %v1136_v48, %v1132_v47  ;;  %v782_v8 = vunpack.c.l.b16 %v737_v5  ;;  %v2869_v48 = vld [vmem:[%s3056_s15 + $0x30] sm:$0xff] }
  0x53   : > { %2555 = vmatmul.msk.bf16.gmra.mxu2 %vm499_vm1, %v498_v63  ;;  %v1475_v63 = vunpack.c.l.b16 %v1427_v53  ;;  %v745_v44 = vrot.slane %v743_v24, 4 }
  0x54   : > { %v1138_v9 = vrot.slane %v1137_v49, 4 }
  0x55   : > { %v1489_v10 = vpack.c.b16 %v1475_v63, %v1474_v59  ;;  %v1140_v63 = vshll.u32 %v2680_v19, 16 }
  0x56   : > { %2551 = vmatmul.msk.bf16.gmra.mxu0 %vm499_vm1, %v494_v15  ;;  %2664 = vmatmul.msk.bf16.vlgmr.msrb.gmra.mxu3 %vm499_vm1, %v2866_v16  ;;  %v1118_v15 = vrot.slane %v1116_v6, 5  ;;  %v2707_v16 = vld [vmem:[%s3056_s15 + $0x24] sm:$0xe]  ;;  %v2708_v6 = vld [vmem:[%s3056_s15 + $0x30] sm:$0xe] }
  0x57   : > { %2722 = vmatmul.msk.bf16.vlgmr.msrb.gmra.mxu1 %vm499_vm1, %v1488_v18  ;;  %v730_v18 = vsel %vm3220_vm7, %v2597_v20, %v729_v61  ;;  %v2715_v22 = vrot.slane %v2707_v16, 9  ;;  %v739_v61 = vrot.slane %v3147_v4, 5  ;;  %v1437_v20 = vrot.slane %v2682_v3, 5 }
  0x58   : > { %v780_v25 = vunpack.c.l.b16 %v730_v18  ;;  %v1119_v30 = vsel %vm3088_vm4, %v1114_v14, %v1118_v15  ;;  %v1154_v15 = vshll.u32 %v2682_v3, 16  ;;  %v1158_v16 = vshrl.u32 %v2682_v3, 16  ;;  %v2709_v3 = vld [vmem:[%s3056_s15 + $0x3c] sm:$0xe] }
  0x59   : > { %v1431_v38 = vsel %vm3220_vm7, %v2715_v22, %v1430_v17  ;;  %v1269_v42 = vunpack.c.l.b16 %v1119_v30  ;;  %v740_v4 = vsel %vm3220_vm7, %v738_v62, %v739_v61  ;;  %v2716_v17 = vrot.slane %v2708_v6, 9  ;;  %v2685_v61 = vld [vmem:[%s3056_s15 + $0x40] sm:$0xf]  ;;  %v2684_v62 = vld [vmem:[%s3056_s15 + $0x3c] sm:$0xf] }
  0x5a   : > { %v795_v40 = vpack.c.b16 %v781_v28, %v780_v25  ;;  %v1476_v53 = vunpack.c.l.b16 %v1431_v38  ;;  %v1439_v18 = vrot.slane %v1437_v20, 4  ;;  %v783_v19 = vunpack.c.l.b16 %v740_v4 }
  0x5b   : > { %v1283_v57 = vpack.c.b16 %v1269_v42, %v1268_v41  ;;  %v1156_v29 = vrot.slane %v1154_v15, 5  ;;  %v1160_v30 = vrot.slane %v1158_v16, 4  ;;  %v2717_v6 = vrot.slane %v2709_v3, 9 }
  0x5c   : > { %v1441_v32 = vsel %vm3220_vm7, %v1439_v18, %v1440_v26  ;;  %v796_v33 = vpack.c.b16 %v783_v19, %v782_v8  ;;  %v750_v16 = vrot.slane %v3061_v12, 5  ;;  %v697_v26 = vld [vmem:[%s3056_s15 + $0x30] sm:$0xe]  ;;  %v2870_v12 = vld [vmem:[%s3056_s15 + $0x3c] sm:$0xff] }
  0x5d   : > { %v1479_v34 = vunpack.c.l.b16 %v1441_v32 }
  0x63   : > { %2605 = vmatmul.msk.bf16.vlgmr.msrb.gmra.mxu2 %vm499_vm1, %v794_v45  ;;  %v1123_v45 = vrot.slane %v1121_v31, 4  ;;  %v1438_v31 = vsel %vm3220_vm7, %v2716_v17, %v1437_v20 }
  0x64   : > { %v1478_v42 = vunpack.c.l.b16 %v1438_v31  ;;  %v753_v31 = vrot.slane %v3064_v13, 5  ;;  %v2688_v13 = vld [vmem:[%s3056_s15 + $0x4c] sm:$0xf] }
  0x65   : > { %v1127_v59 = vor.u32 %v1126_v46, %v1123_v45  ;;  %v1161_v45 = vor.u32 %v1160_v30, %v1156_v29  ;;  %v1164_v46 = vshll.u32 %v2683_v11, 16  ;;  %v1182_v11 = vshrl.u32 %v2685_v61, 16 }
  0x66   : > { %2697 = vmatmul.msk.bf16.vlgmr.msrb.gmra.mxu0 %vm499_vm1, %v1282_v0  ;;  %2665 = vmatmul.msk.bf16.gmra.mxu3 %vm499_vm1, %v2867_v1  ;;  %v1490_v0 = vpack.c.b16 %v1477_v56, %v1476_v53  ;;  %v2681_v1 = vld [vmem:[%s3056_s15 + $0x30] sm:$0xf]  ;;  %v1491_v56 = vpack.c.b16 %v1479_v34, %v1478_v42  ;;  %v752_v30 = vrot.slane %v750_v16, 4 }
  0x67   : > { %2723 = vmatmul.msk.bf16.gmra.mxu1 %vm499_vm1, %v1489_v10  ;;  %v1128_v7 = vrot.slane %v1127_v59, 4  ;;  %v1142_v10 = vrot.slane %v1140_v63, 5  ;;  %v1145_v2 = vshrl.u32 %v2681_v1, 16  ;;  %v1148_v14 = vshll.u32 %v2681_v1, 16  ;;  %v2686_v1 = vld [vmem:[%s3056_s15 + $0x44] sm:$0x1] }
  0x68   : > { %v1166_v60 = vrot.slane %v1164_v46, 5  ;;  %v1444_v59 = vrot.slane %v2685_v61, 5  ;;  %v1447_v4 = vrot.slane %v2686_v1, 5 }
  0x69   : > { %v1133_v22 = vsel %vm3088_vm4, %v1128_v7, %v1132_v47  ;;  %v1143_v23 = vsel %vm3088_vm4, %v1138_v9, %v1142_v10  ;;  %v1147_v25 = vrot.slane %v1145_v2, 4  ;;  %v1150_v28 = vrot.slane %v1148_v14, 5 }
  0x6a   : > { %v1270_v35 = vunpack.c.l.b16 %v1133_v22  ;;  %v1271_v38 = vunpack.c.l.b16 %v1143_v23  ;;  %v1446_v20 = vrot.slane %v1444_v59, 4  ;;  %v1169_v7 = vshrl.u32 %v2684_v62, 16 }
  0x6b   : > { %v1151_v41 = vor.u32 %v1150_v28, %v1147_v25  ;;  %v1172_v9 = vshll.u32 %v2684_v62, 16  ;;  %v1178_v10 = vshll.u32 %v2685_v61, 16  ;;  %v1445_v17 = vsel %vm3220_vm7, %v2717_v6, %v1444_v59 }
  0x6c   : > { %v1284_v47 = vpack.c.b16 %v1271_v38, %v1270_v35  ;;  %v1448_v18 = vsel %vm3220_vm7, %v1446_v20, %v1447_v4  ;;  %v1171_v8 = vrot.slane %v1169_v7, 4  ;;  %v1184_v23 = vrot.slane %v1182_v11, 4  ;;  %v698_v20 = vld [vmem:[%s3056_s15 + $0x3c] sm:$0xe] }
  0x6d   : > { %v1152_v53 = vrot.slane %v1151_v41, 4  ;;  %v1174_v19 = vrot.slane %v1172_v9, 5  ;;  %v1180_v22 = vrot.slane %v1178_v10, 5  ;;  %v1481_v25 = vunpack.c.l.b16 %v1448_v18 }
  0x6e   : > { %v1188_v35 = vshll.u32 %v2686_v1, 16  ;;  %v757_v4 = vrot.slane %v3084_v36, 5  ;;  %v2601_v18 = vrot.slane %v698_v20, 9 }
  0x6f   : > { %v1175_v32 = vor.u32 %v1174_v19, %v1171_v8  ;;  %v760_v19 = vrot.slane %v3098_v52, 5 }
  0x70   : > { %v1190_v34 = vrot.slane %v1188_v35, 5  ;;  %v759_v8 = vrot.slane %v757_v4, 4 }
  0x71   : > { %v1176_v41 = vrot.slane %v1175_v32, 4 }
  0x72   : > { %v761_v52 = vsel %vm3220_vm7, %v759_v8, %v760_v19 }
  0x73   : > { %2606 = vmatmul.msk.bf16.gmra.mxu2 %vm499_vm1, %v795_v40  ;;  %v746_v40 = vrot.slane %v3180_v54, 5  ;;  %v744_v54 = vsel %vm3220_vm7, %v2599_v43, %v743_v24  ;;  %v1480_v24 = vunpack.c.l.b16 %v1445_v17 }
  0x74   : > { %v784_v49 = vunpack.c.l.b16 %v744_v54 }
  0x75   : > { %v1492_v38 = vpack.c.b16 %v1481_v25, %v1480_v24 }
  0x76   : > { %2698 = vmatmul.msk.bf16.gmra.mxu0 %vm499_vm1, %v1283_v57  ;;  %2666 = vmatmul.msk.bf16.gmra.mxu3 %vm499_vm1, %v2868_v58  ;;  %v747_v57 = vsel %vm3220_vm7, %v745_v44, %v746_v40  ;;  %v1162_v58 = vrot.slane %v1161_v45, 4  ;;  %v754_v40 = vsel %vm3220_vm7, %v752_v30, %v753_v31  ;;  %v2687_v44 = vld [vmem:[%s3056_s15 + $0x48] sm:$0xf]  ;;  %v1451_v45 = vrot.slane %v2688_v13, 5  ;;  %v2691_v31 = vld [vmem:[%s3056_s15 + $0x58] sm:$0xf] }
  0x77   : > { %2724 = vmatmul.msk.bf16.gmra.mxu1 %vm499_vm1, %v1490_v0  ;;  %v785_v63 = vunpack.c.l.b16 %v747_v57  ;;  %v1157_v0 = vsel %vm3088_vm4, %v1152_v53, %v1156_v29  ;;  %v2600_v29 = vrot.slane %v697_v26, 9  ;;  %v1193_v62 = vshrl.u32 %v2687_v44, 16  ;;  %v2871_v26 = vld [vmem:[%s3056_s15 + $0x48] sm:$0xff] }
  0x78   : > { %v1167_v5 = vsel %vm3088_vm4, %v1162_v58, %v1166_v60  ;;  %v1272_v14 = vunpack.c.l.b16 %v1157_v0  ;;  %v1453_v57 = vrot.slane %v1451_v45, 4  ;;  %v1181_v60 = vsel %vm3088_vm4, %v1176_v41, %v1180_v22 }
  0x79   : > { %v797_v2 = vpack.c.b16 %v785_v63, %v784_v49  ;;  %v1273_v15 = vunpack.c.l.b16 %v1167_v5  ;;  %v751_v39 = vsel %vm3220_vm7, %v2600_v29, %v750_v16  ;;  %v1196_v59 = vshll.u32 %v2687_v44, 16  ;;  %v2690_v29 = vld [vmem:[%s3056_s15 + $0x54] sm:$0xf] }
  0x7a   : > { %v786_v46 = vunpack.c.l.b16 %v751_v39  ;;  %v1202_v49 = vshll.u32 %v2688_v13, 16  ;;  %v1206_v63 = vshrl.u32 %v2688_v13, 16  ;;  %v1274_v0 = vunpack.c.l.b16 %v1181_v60 }
  0x7b   : > { %v1285_v28 = vpack.c.b16 %v1273_v15, %v1272_v14  ;;  %v1195_v7 = vrot.slane %v1193_v62, 4  ;;  %v1198_v9 = vrot.slane %v1196_v59, 5  ;;  %v1217_v39 = vshrl.u32 %v2690_v29, 16  ;;  %v699_v59 = vld [vmem:[%s3056_s15 + $0x48] sm:$0xe] }
  0x7c   : > { %v1204_v10 = vrot.slane %v1202_v49, 5  ;;  %v1208_v11 = vrot.slane %v1206_v63, 4  ;;  %v1458_v41 = vrot.slane %v2691_v31, 5  ;;  %v1230_v13 = vshrl.u32 %v2691_v31, 16 }
  0x7d   : > { %v1199_v36 = vor.u32 %v1198_v9, %v1195_v7  ;;  %v764_v60 = vrot.slane %v3121_v27, 5  ;;  %v2602_v7 = vrot.slane %v699_v59, 9  ;;  %v767_v9 = vrot.slane %v3139_v51, 5 }
  0x7e   : > { %v1209_v24 = vor.u32 %v1208_v11, %v1204_v10  ;;  %v1232_v63 = vrot.slane %v1230_v13, 4 }
  0x7f   : > { %v766_v27 = vrot.slane %v764_v60, 4  ;;  %v765_v19 = vsel %vm3220_vm7, %v2602_v7, %v764_v60 }
  0x81   : > { %v768_v51 = vsel %vm3220_vm7, %v766_v27, %v767_v9 }
  0x83   : > { %2607 = vmatmul.msk.bf16.gmra.mxu2 %vm499_vm1, %v796_v33  ;;  %v1185_v33 = vor.u32 %v1184_v23, %v1180_v22 }
  0x85   : > { %v1186_v42 = vrot.slane %v1185_v33, 4  ;;  %v1200_v33 = vrot.slane %v1199_v36, 4 }
  0x86   : > { %2699 = vmatmul.msk.bf16.gmra.mxu0 %vm499_vm1, %v1284_v47  ;;  %2667 = vmatmul.msk.bf16.gmra.mxu3 %vm499_vm1, %v2869_v48  ;;  %v2689_v47 = vld [vmem:[%s3056_s15 + $0x50] sm:$0x1]  ;;  %v2710_v48 = vld [vmem:[%s3056_s15 + $0x48] sm:$0xe] }
  0x87   : > { %2725 = vmatmul.msk.bf16.gmra.mxu1 %vm499_vm1, %v1491_v56  ;;  %v787_v56 = vunpack.c.l.b16 %v754_v40  ;;  %v2718_v54 = vrot.slane %v2710_v48, 9  ;;  %v1454_v58 = vrot.slane %v2689_v47, 5  ;;  %v1191_v61 = vsel %vm3088_vm4, %v1186_v42, %v1190_v34  ;;  %v2692_v42 = vld [vmem:[%s3056_s15 + $0x5c] sm:$0x1] }
  0x88   : > { %v1275_v1 = vunpack.c.l.b16 %v1191_v61  ;;  %v1212_v22 = vshll.u32 %v2689_v47, 16  ;;  %v1220_v40 = vshll.u32 %v2690_v29, 16  ;;  %v1226_v34 = vshll.u32 %v2691_v31, 16  ;;  %v2693_v29 = vld [vmem:[%s3056_s15 + $0x60] sm:$0xf] }
  0x89   : > { %v1452_v3 = vsel %vm3220_vm7, %v2718_v54, %v1451_v45  ;;  %v1455_v5 = vsel %vm3220_vm7, %v1453_v57, %v1454_v58  ;;  %v798_v6 = vpack.c.b16 %v787_v56, %v786_v46  ;;  %v1460_v46 = vrot.slane %v1458_v41, 4  ;;  %v2694_v31 = vld [vmem:[%s3056_s15 + $0x64] sm:$0xf] }
  0x8a   : > { %v1483_v14 = vunpack.c.l.b16 %v1455_v5  ;;  %v1286_v15 = vpack.c.b16 %v1275_v1, %v1274_v0  ;;  %v1214_v35 = vrot.slane %v1212_v22, 5  ;;  %v1461_v47 = vrot.slane %v2692_v42, 5 }
  0x8b   : > { %v1205_v56 = vsel %vm3088_vm4, %v1200_v33, %v1204_v10  ;;  %v1219_v61 = vrot.slane %v1217_v39, 4  ;;  %v1222_v62 = vrot.slane %v1220_v40, 5  ;;  %v1228_v49 = vrot.slane %v1226_v34, 5 }
  0x8c   : > { %v1276_v20 = vunpack.c.l.b16 %v1205_v56  ;;  %v790_v33 = vunpack.c.l.b16 %v765_v19  ;;  %v1241_v39 = vshrl.u32 %v2693_v29, 16  ;;  %v1244_v40 = vshll.u32 %v2693_v29, 16 }
  0x8d   : > { %v1223_v10 = vor.u32 %v1222_v62, %v1219_v61  ;;  %v1233_v11 = vor.u32 %v1232_v63, %v1228_v49 }
  0x8f   : > { %v1224_v36 = vrot.slane %v1223_v10, 4 }
  0x91   : > { %v1229_v34 = vsel %vm3088_vm4, %v1224_v36, %v1228_v49 }
  0x92   : > { %v1278_v49 = vunpack.c.l.b16 %v1229_v34 }
  0x93   : > { %2608 = vmatmul.msk.bf16.gmra.mxu2 %vm499_vm1, %v797_v2  ;;  %v653_v43 = vpop.f32.mrf.mxu1  ;;  %v1482_v2 = vunpack.c.l.b16 %v1452_v3  ;;  %v1462_v3 = vsel %vm3220_vm7, %v1460_v46, %v1461_v47  ;;  %v2712_v46 = vld [vmem:[%s3056_s15 + $0x60] sm:$0xe] }
  0x96   : > { %2700 = vmatmul.msk.bf16.gmra.mxu0 %vm499_vm1, %v1285_v28  ;;  %2668 = vmatmul.msk.bf16.gmra.mxu3 %vm499_vm1, %v2870_v12  ;;  %v1493_v28 = vpack.c.b16 %v1483_v14, %v1482_v2  ;;  %v758_v12 = vsel %vm3220_vm7, %v2601_v18, %v757_v4  ;;  %v1236_v2 = vshll.u32 %v2692_v42, 16  ;;  %v1465_v42 = vrot.slane %v2694_v31, 5 }
  0x97   : > { %2726 = vmatmul.msk.bf16.gmra.mxu1 %vm499_vm1, %v1492_v38  ;;  %v1210_v38 = vrot.slane %v1209_v24, 4  ;;  %v788_v48 = vunpack.c.l.b16 %v758_v12 }
  0x98   : > { %v1238_v24 = vrot.slane %v1236_v2, 5  ;;  %v1467_v56 = vrot.slane %v1465_v42, 4 }
  0x99   : > { %v673_v53 = vpop.f32.mrf.mxu3  ;;  %v1215_v58 = vsel %vm3088_vm4, %v1210_v38, %v1214_v35  ;;  %v2789_v35 = vld [vmem:[%s3056_s15 + $0x18] sm:$0xf]  ;;  %v791_v38 = vunpack.c.l.b16 %v768_v51 }
  0x9a   : > { %v1277_v4 = vunpack.c.l.b16 %v1215_v58  ;;  %v1770_v58 = vshll.u32 %v2789_v35, 16 }
  0x9b   : > { %v3350_v17 = vpop.f32.mrf.mxu1  ;;  %v800_v59 = vpack.c.b16 %v791_v38, %v790_v33 }
  0x9c   : > { %v1772_v2 = vrot.slane %v1770_v58, 5 }
  0xa1   : > { %v675_v16 = vpop.f32.mrf.mxu3 }
  0xa3   : > { %2609 = vmatmul.msk.bf16.gmra.mxu2 %vm499_vm1, %v798_v6  ;;  %v537_v23 = vpop.f32.mrf.mxu0 }
  0xa4   : > { %v3355_v25 = vadd.f32 %v653_v43, %v537_v23  ;;  %v2711_v43 = vld [vmem:[%s3056_s15 + $0x54] sm:$0xe]  ;;  %v658_v57 = vpop.f32.mrf.mxu1  ;;  %v1234_v23 = vrot.slane %v1233_v11, 4 }
  0xa5   : > { %v2719_v45 = vrot.slane %v2711_v43, 9  ;;  %v2695_v43 = vld [vmem:[%s3056_s15 + $0x68] sm:$0x1] }
  0xa6   : > { %v557_v30 = vpop.f32.mrf.mxu2  ;;  %2701 = vmatmul.msk.bf16.gmra.mxu0 %vm499_vm1, %v1286_v15  ;;  %2669 = vmatmul.msk.bf16.gmra.mxu3 %vm499_vm1, %v2871_v26  ;;  %v1485_v15 = vunpack.c.l.b16 %v1462_v3  ;;  %v1287_v26 = vpack.c.b16 %v1277_v4, %v1276_v20  ;;  %v1239_v13 = vsel %vm3088_vm4, %v1234_v23, %v1238_v24  ;;  %v1246_v3 = vrot.slane %v1244_v40, 5  ;;  %v700_v4 = vld [vmem:[%s3056_s15 + $0x54] sm:$0xe] }
  0xa7   : > { %v3362_v32 = vadd.f32 %v673_v53, %v557_v30  ;;  %2727 = vmatmul.msk.bf16.gmra.mxu1 %vm499_vm1, %v1493_v28  ;;  %v789_v53 = vunpack.c.l.b16 %v761_v52  ;;  %v1459_v1 = vsel %vm3220_vm7, %v2719_v45, %v1458_v41  ;;  %v3403_v41 = vld [vmem:[%s3056_s15 + $0x1c] sm:$0xf]  ;;  %v1254_v45 = vshrl.u32 %v2694_v31, 16 }
  0xa8   : > { %v1484_v14 = vunpack.c.l.b16 %v1459_v1  ;;  %v1776_v60 = vshll.u32 %v3403_v41, 16  ;;  %v1780_v61 = vshrl.u32 %v3403_v41, 16  ;;  %v1279_v63 = vunpack.c.l.b16 %v1239_v13 }
  0xa9   : > { %v678_v44 = vpop.f32.mrf.mxu3  ;;  %v799_v6 = vpack.c.b16 %v789_v53, %v788_v48  ;;  %v1767_v48 = vshrl.u32 %v2789_v35, 16  ;;  %v2720_v53 = vrot.slane %v2712_v46, 9  ;;  %v1243_v1 = vrot.slane %v1241_v39, 4 }
  0xaa   : > { %v1494_v28 = vpack.c.b16 %v1485_v15, %v1484_v14  ;;  %v1256_v7 = vrot.slane %v1254_v45, 4  ;;  %v1778_v14 = vrot.slane %v1776_v60, 5  ;;  %v1782_v15 = vrot.slane %v1780_v61, 4 }
  0xab   : > { %v3372_v54 = vpop.f32.mrf.mxu0  ;;  %v1769_v27 = vrot.slane %v1767_v48, 4  ;;  %v1466_v9 = vsel %vm3220_vm7, %v2720_v53, %v1465_v42  ;;  %v774_v23 = vrot.slane %v3177_v50, 5  ;;  %v1247_v24 = vor.u32 %v1246_v3, %v1243_v1 }
  0xac   : > { %v3394_v12 = vpop.f32.mrf.mxu1  ;;  %v1486_v19 = vunpack.c.l.b16 %v1466_v9  ;;  %v1260_v29 = vshll.u32 %v2695_v43, 16  ;;  %v1783_v33 = vor.u32 %v1782_v15, %v1778_v14 }
  0xad   : > { %v1248_v13 = vrot.slane %v1247_v24, 4 }
  0xae   : > { %v559_v0 = vpop.f32.mrf.mxu2  ;;  %v1784_v48 = vrot.slane %v1783_v33, 4 }
  0xaf   : > { %v3382_v5 = vadd.f32 %v675_v16, %v559_v0  ;;  %v2872_v16 = vld [vmem:[%s3056_s15 + $0x54] sm:$0xff]  ;;  %v771_v0 = vrot.slane %v3155_v21, 5 }
  0xb1   : > { %v680_v18 = vpop.f32.mrf.mxu3 }
  0xb3   : > { %2610 = vmatmul.msk.bf16.gmra.mxu2 %vm499_vm1, %v799_v6  ;;  %v542_v8 = vpop.f32.mrf.mxu0 }
  0xb4   : > { %v3391_v22 = vadd.f32 %v658_v57, %v542_v8  ;;  %v1468_v57 = vrot.slane %v2695_v43, 5  ;;  %v663_v21 = vpop.f32.mrf.mxu1  ;;  %v773_v8 = vrot.slane %v771_v0, 4 }
  0xb6   : > { %v562_v30 = vpop.f32.mrf.mxu2  ;;  %2702 = vmatmul.msk.bf16.gmra.mxu0 %vm499_vm1, %v1287_v26  ;;  %2670 = vmatmul.msk.bf16.gmra.mxu3 %vm499_vm1, %v2872_v16  ;;  %v1469_v10 = vsel %vm3220_vm7, %v1467_v56, %v1468_v57  ;;  %v3425_v26 = vld [vmem:[%s3056_s15 + $0x20] sm:$0x1]  ;;  %v2603_v16 = vrot.slane %v700_v4, 9  ;;  %v775_v34 = vsel %vm3220_vm7, %v773_v8, %v774_v23  ;;  %v2792_v56 = vld [vmem:[%s3056_s15 + $0x24] sm:$0xf] }
  0xb7   : > { %v3398_v52 = vadd.f32 %v678_v44, %v562_v30  ;;  %2728 = vmatmul.msk.bf16.gmra.mxu1 %vm499_vm1, %v1494_v28  ;;  %v1250_v44 = vshll.u32 %v2694_v31, 16  ;;  %v1487_v51 = vunpack.c.l.b16 %v1469_v10  ;;  %v2873_v30 = vld [vmem:[%s3056_s15 + $0x60] sm:$0xff]  ;;  %v1773_v31 = vor.u32 %v1772_v2, %v1769_v27  ;;  %v3444_v57 = vld [vmem:[%s3056_s15 + $0x28] sm:$0xf] }
  0xb8   : > { %v1786_v35 = vshll.u32 %v3425_v26, 16  ;;  %v772_v40 = vsel %vm3220_vm7, %v2603_v16, %v771_v0  ;;  %v1791_v3 = vshrl.u32 %v2792_v56, 16  ;;  %v1800_v4 = vshll.u32 %v3444_v57, 16 }
  0xb9   : > { %v683_v47 = vpop.f32.mrf.mxu3  ;;  %v1252_v6 = vrot.slane %v1250_v44, 5  ;;  %v1495_v50 = vpack.c.b16 %v1487_v51, %v1486_v19  ;;  %v1262_v44 = vrot.slane %v1260_v29, 5  ;;  %v1774_v46 = vrot.slane %v1773_v31, 4  ;;  %v3463_v51 = vld [vmem:[%s3056_s15 + $0x2c] sm:$0x1] }
  0xba   : > { %v1788_v53 = vrot.slane %v1786_v35, 5  ;;  %v792_v61 = vunpack.c.l.b16 %v772_v40  ;;  %v1802_v8 = vrot.slane %v1800_v4, 5  ;;  %v2822_v29 = vld [vmem:[%s3056_s15 + $0x18] sm:$0xe]  ;;  %v1810_v35 = vshll.u32 %v3463_v51, 16 }
  0xbb   : > { %v3414_v62 = vpop.f32.mrf.mxu0  ;;  %v1257_v28 = vor.u32 %v1256_v7, %v1252_v6  ;;  %v1804_v7 = vshrl.u32 %v3444_v57, 16  ;;  %v2342_v4 = vld [vmem:[%s3791_s3] sm:$0xf] }
  0xbc   : > { %v3446_v58 = vpop.f32.mrf.mxu1  ;;  %v1789_v0 = vsel %vm3088_vm4, %v1784_v48, %v1788_v53  ;;  %v1812_v48 = vrot.slane %v1810_v35, 5 }
  0xbd   : > { %v1258_v43 = vrot.slane %v1257_v28, 4  ;;  %v1961_v15 = vunpack.c.l.b16 %v1789_v0  ;;  %v1806_v19 = vrot.slane %v1804_v7, 4 }
  0xbe   : > { %v564_v20 = vpop.f32.mrf.mxu2 }
  0xbf   : > { %v3422_v11 = vadd.f32 %v680_v18, %v564_v20  ;;  %v1288_v18 = vpack.c.b16 %v1279_v63, %v1278_v49  ;;  %v1253_v49 = vsel %vm3088_vm4, %v1248_v13, %v1252_v6  ;;  %v1779_v63 = vsel %vm3088_vm4, %v1774_v46, %v1778_v14 }
  0xc0   : > { %v1794_v20 = vshll.u32 %v2792_v56, 16  ;;  %v1280_v9 = vunpack.c.l.b16 %v1253_v49  ;;  %v1960_v14 = vunpack.c.l.b16 %v1779_v63  ;;  %v1807_v33 = vor.u32 %v1806_v19, %v1802_v8  ;;  %v3499_v19 = vld [vmem:[%s3056_s15 + $0x38] sm:$0x1] }
  0xc1   : > { %v685_v36 = vpop.f32.mrf.mxu3 }
  0xc2   : > { %v1796_v16 = vrot.slane %v1794_v20, 5  ;;  %v1976_v28 = vpack.c.b16 %v1961_v15, %v1960_v14  ;;  %v1808_v46 = vrot.slane %v1807_v33, 4  ;;  %v2874_v15 = vld [vmem:[%s3056_s15 + $0x18] sm:$0xff] }
  0xc3   : > { %2611 = vmatmul.msk.bf16.gmra.mxu2 %vm499_vm1, %v800_v59  ;;  %v547_v38 = vpop.f32.mrf.mxu0  ;;  %v793_v59 = vunpack.c.l.b16 %v775_v34 }
  0xc4   : > { %v3431_v39 = vadd.f32 %v663_v21, %v547_v38  ;;  %v1793_v21 = vrot.slane %v1791_v3, 4  ;;  %v1813_v0 = vsel %vm3088_vm4, %v1808_v46, %v1812_v48  ;;  %v2798_v46 = vld [vmem:[%s3056_s15 + $0x3c] sm:$0xf]  ;;  %v3511_v48 = vld [vmem:[%s3056_s15 + $0x40] sm:$0xf] }
  0xc5   : > { %v801_v6 = vpack.c.b16 %v793_v59, %v792_v61 }
  0xc6   : > { %v567_v42 = vpop.f32.mrf.mxu2  ;;  %2703 = vmatmul.msk.bf16.gmra.mxu0 %vm499_vm1, %v1288_v18  ;;  %2671 = vmatmul.msk.bf16.gmra.mxu3 %vm499_vm1, %v2873_v30  ;;  %v668_v30 = vpop.f32.mrf.mxu1  ;;  %v1797_v31 = vor.u32 %v1796_v16, %v1793_v21 }
  0xc7   : > { %v3438_v45 = vadd.f32 %v683_v47, %v567_v42  ;;  %2729 = vmatmul.msk.bf16.gmra.mxu1 %vm499_vm1, %v1495_v50  ;;  %v1263_v47 = vsel %vm3088_vm4, %v1258_v43, %v1262_v44  ;;  %v2830_v50 = vrot.slane %v2822_v29, 9  ;;  %v2795_v42 = vld [vmem:[%s3056_s15 + $0x30] sm:$0xf]  ;;  %v3477_v43 = vld [vmem:[%s3056_s15 + $0x34] sm:$0xf] }
  0xc8   : > { %v1281_v2 = vunpack.c.l.b16 %v1263_v47  ;;  %v1798_v44 = vrot.slane %v1797_v31, 4  ;;  %v1815_v53 = vshrl.u32 %v2795_v42, 16  ;;  %v1818_v59 = vshll.u32 %v2795_v42, 16  ;;  %v2823_v29 = vld [vmem:[%s3056_s15 + $0x24] sm:$0xe] }
  0xc9   : > { %v688_v60 = vpop.f32.mrf.mxu3  ;;  %v1824_v49 = vshll.u32 %v3477_v43, 16  ;;  %v2831_v35 = vrot.slane %v2823_v29, 9  ;;  %v2120_v42 = vrot.slane %v3463_v51, 5  ;;  %v3529_v29 = vld [vmem:[%s3056_s15 + $0x44] sm:$0x1] }
  0xca   : > { %v1289_v24 = vpack.c.b16 %v1281_v2, %v1280_v9  ;;  %v1817_v20 = vrot.slane %v1815_v53, 4  ;;  %v2374_v2 = vsel %vm2372_vm8, %v2342_v4, 0 }
  0xcb   : > { %v3456_v1 = vpop.f32.mrf.mxu0  ;;  %2383 = vmatpush.bf16.msra.mxu1 %v2374_v2 }
  0xce   : > { %v569_v27 = vpop.f32.mrf.mxu2 }
  0xcf   : > { %v3460_v10 = vadd.f32 %v685_v36, %v569_v27  ;;  %v2110_v36 = vrot.slane %v3403_v41, 5  ;;  %v2113_v41 = vrot.slane %v3425_v26, 5  ;;  %v1803_v26 = vsel %vm3088_vm4, %v1798_v44, %v1802_v8 }
  0xd0   : > { %v1820_v27 = vrot.slane %v1818_v59, 5  ;;  %v1962_v16 = vunpack.c.l.b16 %v1803_v26  ;;  %v1963_v8 = vunpack.c.l.b16 %v1813_v0  ;;  %v1842_v26 = vshll.u32 %v2798_v46, 16 }
  0xd1   : > { %v690_v23 = vpop.f32.mrf.mxu3  ;;  %v2112_v13 = vrot.slane %v2110_v36, 4  ;;  %v2111_v61 = vsel %vm3220_vm7, %v2830_v50, %v2110_v36  ;;  %v1852_v0 = vshrl.u32 %v3511_v48, 16 }
  0xd2   : > { %v2166_v3 = vunpack.c.l.b16 %v2111_v61  ;;  %v1821_v36 = vor.u32 %v1820_v27, %v1817_v20  ;;  %v1977_v31 = vpack.c.b16 %v1963_v8, %v1962_v16  ;;  %v656_v20 = vadd.f32 %v3350_v17, %v3372_v54 }
  0xd3   : > { %2612 = vmatmul.msk.bf16.gmra.mxu2 %vm499_vm1, %v801_v6  ;;  %v552_v18 = vpop.f32.mrf.mxu0  ;;  %v2114_v63 = vsel %vm3220_vm7, %v2112_v13, %v2113_v41  ;;  %v1826_v6 = vrot.slane %v1824_v49, 5  ;;  %v1844_v16 = vrot.slane %v1842_v26, 5  ;;  %v2124_v17 = vrot.slane %v3477_v43, 5 }
  0xd4   : > { %v3469_v38 = vadd.f32 %v668_v30, %v552_v18  ;;  %v2167_v21 = vunpack.c.l.b16 %v2114_v63  ;;  %v1834_v30 = vshll.u32 %v3499_v19, 16  ;;  %v1822_v13 = vrot.slane %v1821_v36, 4 }
  0xd6   : > { %v572_v40 = vpop.f32.mrf.mxu2  ;;  %2704 = vmatmul.msk.bf16.gmra.mxu0 %vm499_vm1, %v1289_v24  ;;  %2814 = vmatmul.msk.bf16.vlgmr.msra.gmra.mxu3 %vm499_vm1, %v1976_v28  ;;  %v2117_v24 = vrot.slane %v3444_v57, 5  ;;  %v1836_v41 = vrot.slane %v1834_v30, 5  ;;  %v1827_v49 = vsel %vm3088_vm4, %v1822_v13, %v1826_v6 }
  0xd7   : > { %v3473_v34 = vadd.f32 %v688_v60, %v572_v40  ;;  %v1828_v60 = vshrl.u32 %v3477_v43, 16 }
  0xd8   : > { %v2119_v40 = vrot.slane %v2117_v24, 4  ;;  %v2118_v61 = vsel %vm3220_vm7, %v2831_v35, %v2117_v24  ;;  %v1854_v24 = vrot.slane %v1852_v0, 4 }
  0xd9   : > { %v992_v56 = vpop.f32.mrf.mxu3  ;;  %v1830_v9 = vrot.slane %v1828_v60, 4  ;;  %v1839_v60 = vshrl.u32 %v2798_v46, 16  ;;  %v2168_v4 = vunpack.c.l.b16 %v2118_v61  ;;  %v2801_v61 = vld [vmem:[%s3056_s15 + $0x48] sm:$0xf] }
  0xda   : > { %v2121_v51 = vsel %vm3220_vm7, %v2119_v40, %v2120_v42  ;;  %v1858_v40 = vshll.u32 %v3529_v29, 16  ;;  %v1866_v0 = vshll.u32 %v2801_v61, 16 }
  0xdb   : > { %v3484_v47 = vpop.f32.mrf.mxu0  ;;  %v1831_v18 = vor.u32 %v1830_v9, %v1826_v6  ;;  %v2169_v27 = vunpack.c.l.b16 %v2121_v51  ;;  %v1964_v6 = vunpack.c.l.b16 %v1827_v49  ;;  %v1841_v2 = vrot.slane %v1839_v60, 4  ;;  %v3543_v51 = vld [vmem:[%s3056_s15 + $0x4c] sm:$0xf] }
  0xdc   : > { %v1860_v46 = vrot.slane %v1858_v40, 5 }
  0xdd   : > { %v1832_v57 = vrot.slane %v1831_v18, 4  ;;  %v2183_v18 = vpack.c.b16 %v2169_v27, %v2168_v4  ;;  %v661_v4 = vadd.f32 %v3394_v12, %v3414_v62 }
  0xde   : > { %v574_v7 = vpop.f32.mrf.mxu2 }
  0xdf   : > { %v3495_v14 = vadd.f32 %v690_v23, %v574_v7  ;;  %v2182_v23 = vpack.c.b16 %v2167_v21, %v2166_v3  ;;  %v2875_v21 = vld [vmem:[%s3056_s15 + $0x24] sm:$0xff] }
  0xe1   : > { %v994_v28 = vpop.f32.mrf.mxu3 }
  0xe3   : > { %2781 = vmatmul.msk.bf16.vlgmr.msra.gmra.mxu2 %vm499_vm1, %v2874_v15  ;;  %v1326_v33 = vpop.f32.mrf.mxu0 }
  0xe6   : > { %v838_v50 = vpop.f32.mrf.mxu2  ;;  %2839 = vmatmul.msk.bf16.vlgmr.msra.gmra.mxu0 %vm499_vm1, %v2182_v23  ;;  %2815 = vmatmul.msk.bf16.gmra.mxu3 %vm499_vm1, %v1977_v31  ;;  %v2824_v31 = vld [vmem:[%s3056_s15 + $0x30] sm:$0xe] }
  0xe7   : > { %v878_v44 = vadd.f32 %v838_v50, %v3355_v25  ;;  %v1837_v25 = vsel %vm3088_vm4, %v1832_v57, %v1836_v41  ;;  %v2832_v13 = vrot.slane %v2824_v31, 9  ;;  %v2127_v57 = vrot.slane %v3499_v19, 5  ;;  %v2825_v31 = vld [vmem:[%s3056_s15 + $0x3c] sm:$0xe] }
  0xe8   : > { %v1965_v9 = vunpack.c.l.b16 %v1837_v25 }
  0xe9   : > { %v1032_v53 = vadd.f32 %v992_v56, %v878_v44  ;;  %v997_v59 = vpop.f32.mrf.mxu3  ;;  %v1848_v56 = vshll.u32 %v3511_v48, 16  ;;  %v2125_v25 = vsel %vm3220_vm7, %v2832_v13, %v2124_v17 }
  0xea   : > { %v1978_v23 = vpack.c.b16 %v1965_v9, %v1964_v6  ;;  %v2170_v27 = vunpack.c.l.b16 %v2125_v25  ;;  %v2876_v9 = vld [vmem:[%s3056_s15 + $0x30] sm:$0xff] }
  0xeb   : > { %v3521_v63 = vadd.f32 %v1326_v33, %v1032_v53  ;;  %v1328_v3 = vpop.f32.mrf.mxu0  ;;  %v1850_v8 = vrot.slane %v1848_v56, 5  ;;  %v1845_v33 = vor.u32 %v1844_v16, %v1841_v2  ;;  %v1863_v56 = vshrl.u32 %v2801_v61, 16 }
  0xed   : > { %v1855_v35 = vor.u32 %v1854_v24, %v1850_v8  ;;  %v1846_v41 = vrot.slane %v1845_v33, 4  ;;  %v1865_v16 = vrot.slane %v1863_v56, 4 }
  0xee   : > { %v840_v7 = vpop.f32.mrf.mxu2 }
  0xef   : > { %v879_v15 = vadd.f32 %v840_v7, %v656_v20  ;;  %v1856_v44 = vrot.slane %v1855_v35, 4  ;;  %v1876_v20 = vshrl.u32 %v3543_v51, 16  ;;  %v2131_v35 = vrot.slane %v3511_v48, 5 }
  0xf1   : > { %v1033_v36 = vadd.f32 %v994_v28, %v879_v15  ;;  %v999_v30 = vpop.f32.mrf.mxu3  ;;  %v2126_v28 = vrot.slane %v2124_v17, 4  ;;  %v1861_v26 = vsel %vm3088_vm4, %v1856_v44, %v1860_v46  ;;  %v3574_v44 = vld [vmem:[%s3056_s15 + $0x58] sm:$0xf]  ;;  %v2134_v46 = vrot.slane %v3529_v29, 5 }
  0xf2   : > { %v1900_v56 = vshrl.u32 %v3574_v44, 16 }
  0xf3   : > { %2782 = vmatmul.msk.bf16.gmra.mxu2 %vm499_vm1, %v2875_v21  ;;  %v3533_v54 = vadd.f32 %v1328_v3, %v1033_v36  ;;  %v1331_v50 = vpop.f32.mrf.mxu0  ;;  %v2128_v19 = vsel %vm3220_vm7, %v2126_v28, %v2127_v57  ;;  %v1872_v3 = vshll.u32 %v3543_v51, 16  ;;  %v1967_v21 = vunpack.c.l.b16 %v1861_v26 }
  0xf4   : > { %v2171_v2 = vunpack.c.l.b16 %v2128_v19  ;;  %v1878_v36 = vrot.slane %v1876_v20, 4 }
  0xf5   : > { %v1874_v24 = vrot.slane %v1872_v3, 5 }
  0xf6   : > { %v843_v42 = vpop.f32.mrf.mxu2  ;;  %2840 = vmatmul.msk.bf16.gmra.mxu0 %vm499_vm1, %v2183_v18  ;;  %2816 = vmatmul.msk.bf16.gmra.mxu3 %vm499_vm1, %v1978_v23  ;;  %v3561_v23 = vld [vmem:[%s3056_s15 + $0x50] sm:$0x1]  ;;  %v2184_v62 = vpack.c.b16 %v2171_v2, %v2170_v27 }
  0xf7   : > { %v880_v43 = vadd.f32 %v843_v42, %v3391_v22  ;;  %v1851_v22 = vsel %vm3088_vm4, %v1846_v41, %v1850_v8  ;;  %v1868_v8 = vrot.slane %v1866_v0, 5  ;;  %v1879_v42 = vor.u32 %v1878_v36, %v1874_v24  ;;  %v2804_v41 = vld [vmem:[%s3056_s15 + $0x54] sm:$0xf] }
  0xf8   : > { %v1966_v15 = vunpack.c.l.b16 %v1851_v22  ;;  %v1882_v13 = vshll.u32 %v3561_v23, 16  ;;  %v1887_v26 = vshrl.u32 %v2804_v41, 16 }
  0xf9   : > { %v1034_v53 = vadd.f32 %v997_v59, %v880_v43  ;;  %v1002_v49 = vpop.f32.mrf.mxu3  ;;  %v2133_v43 = vrot.slane %v2131_v35, 4 }
  0xfa   : > { %v1979_v33 = vpack.c.b16 %v1967_v21, %v1966_v15  ;;  %v1884_v61 = vrot.slane %v1882_v13, 5  ;;  %v1902_v15 = vrot.slane %v1900_v56, 4 }
  0xfb   : > { %v3547_v60 = vadd.f32 %v1331_v50, %v1034_v53  ;;  %v1333_v59 = vpop.f32.mrf.mxu0  ;;  %v1869_v50 = vor.u32 %v1868_v8, %v1865_v16  ;;  %v1880_v53 = vrot.slane %v1879_v42, 4  ;;  %v2135_v29 = vsel %vm3220_vm7, %v2133_v43, %v2134_v46  ;;  %v2877_v16 = vld [vmem:[%s3056_s15 + $0x3c] sm:$0xff] }
  0xfc   : > { %v2173_v8 = vunpack.c.l.b16 %v2135_v29 }
  0xfd   : > { %v1870_v48 = vrot.slane %v1869_v50, 4  ;;  %v1885_v20 = vsel %vm3088_vm4, %v1880_v53, %v1884_v61  ;;  %v2807_v53 = vld [vmem:[%s3056_s15 + $0x60] sm:$0xf]  ;;  %v3607_v61 = vld [vmem:[%s3056_s15 + $0x64] sm:$0xf] }
  0xfe   : > { %v845_v7 = vpop.f32.mrf.mxu2  ;;  %v1911_v56 = vshrl.u32 %v2807_v53, 16  ;;  %v1914_v29 = vshll.u32 %v2807_v53, 16 }
  0xff   : > { %v881_v6 = vadd.f32 %v845_v7, %v661_v4  ;;  %v666_v4 = vadd.f32 %v3446_v58, %v3456_v1 }
 0x101   : > { %v1035_v18 = vadd.f32 %v999_v30, %v881_v6  ;;  %v1004_v17 = vpop.f32.mrf.mxu3  ;;  %v2833_v30 = vrot.slane %v2825_v31, 9  ;;  %v1889_v6 = vrot.slane %v1887_v26, 4  ;;  %v3593_v31 = vld [vmem:[%s3056_s15 + $0x5c] sm:$0x1]  ;;  %v670_v26 = vpop.f32.mrf.mxu1 }
 0x103   : > { %2783 = vmatmul.msk.bf16.gmra.mxu2 %vm499_vm1, %v2876_v9  ;;  %v3565_v12 = vadd.f32 %v1333_v59, %v1035_v18  ;;  %v1336_v40 = vpop.f32.mrf.mxu0  ;;  %v2132_v19 = vsel %vm3220_vm7, %v2833_v30, %v2131_v35  ;;  %v1890_v59 = vshll.u32 %v2804_v41, 16  ;;  %v1969_v18 = vunpack.c.l.b16 %v1885_v20  ;;  %v2826_v35 = vld [vmem:[%s3056_s15 + $0x48] sm:$0xe] }
 0x104   : > { %v2172_v7 = vunpack.c.l.b16 %v2132_v19 }
 0x105   : > { %v1892_v9 = vrot.slane %v1890_v59, 5 }
 0x106   : > { %v848_v28 = vpop.f32.mrf.mxu2  ;;  %2841 = vmatmul.msk.bf16.gmra.mxu0 %vm499_vm1, %v2184_v62  ;;  %2817 = vmatmul.msk.bf16.gmra.mxu3 %vm499_vm1, %v1979_v33  ;;  %v2138_v62 = vrot.slane %v3543_v51, 5  ;;  %v2185_v42 = vpack.c.b16 %v2173_v8, %v2172_v7  ;;  %v2141_v51 = vrot.slane %v3561_v23, 5  ;;  %v1916_v8 = vrot.slane %v1914_v29, 5 }
 0x107   : > { %v882_v57 = vadd.f32 %v848_v28, %v3431_v39  ;;  %v1896_v39 = vshll.u32 %v3574_v44, 16  ;;  %v1893_v58 = vor.u32 %v1892_v9, %v1889_v6  ;;  %v2834_v28 = vrot.slane %v2826_v35, 9 }
 0x109   : > { %v1036_v25 = vadd.f32 %v1002_v49, %v882_v57  ;;  %v1007_v22 = vpop.f32.mrf.mxu3  ;;  %v1875_v49 = vsel %vm3088_vm4, %v1870_v48, %v1874_v24  ;;  %v1898_v2 = vrot.slane %v1896_v39, 5  ;;  %v2140_v57 = vrot.slane %v2138_v62, 4 }
 0x10a   : > { %v1968_v36 = vunpack.c.l.b16 %v1875_v49  ;;  %v1894_v43 = vrot.slane %v1893_v58, 4  ;;  %v2139_v19 = vsel %vm3220_vm7, %v2834_v28, %v2138_v62  ;;  %v1924_v49 = vshrl.u32 %v3607_v61, 16 }
 0x10b   : > { %v3581_v0 = vadd.f32 %v1336_v40, %v1036_v25  ;;  %v1338_v3 = vpop.f32.mrf.mxu0  ;;  %v1903_v1 = vor.u32 %v1902_v15, %v1898_v2  ;;  %v1906_v40 = vshll.u32 %v3593_v31, 16  ;;  %v2142_v23 = vsel %vm3220_vm7, %v2140_v57, %v2141_v51 }
 0x10c   : > { %v1980_v13 = vpack.c.b16 %v1969_v18, %v1968_v36  ;;  %v1899_v39 = vsel %vm3088_vm4, %v1894_v43, %v1898_v2  ;;  %v2174_v7 = vunpack.c.l.b16 %v2139_v19  ;;  %v2175_v6 = vunpack.c.l.b16 %v2142_v23  ;;  %v3638_v19 = vld [vmem:[%s3056_s15 + $0x70] sm:$0xf] }
 0x10d   : > { %v1904_v41 = vrot.slane %v1903_v1, 4  ;;  %v1908_v46 = vrot.slane %v1906_v40, 5  ;;  %v1970_v9 = vunpack.c.l.b16 %v1899_v39  ;;  %v1913_v15 = vrot.slane %v1911_v56, 4 }
 0x10e   : > { %v850_v27 = vpop.f32.mrf.mxu2  ;;  %v1926_v18 = vrot.slane %v1924_v49, 4  ;;  %v2186_v35 = vpack.c.b16 %v2175_v6, %v2174_v7  ;;  %v2148_v43 = vrot.slane %v3593_v31, 5  ;;  %v1948_v49 = vshrl.u32 %v3638_v19, 16 }
 0x10f   : > { %v883_v21 = vadd.f32 %v850_v27, %v666_v4  ;;  %v671_v4 = vadd.f32 %v670_v26, %v3484_v47  ;;  %v2145_v47 = vrot.slane %v3574_v44, 5 }
 0x111   : > { %v1037_v24 = vadd.f32 %v1004_v17, %v883_v21  ;;  %v1009_v33 = vpop.f32.mrf.mxu3 }
 0x113   : > { %2784 = vmatmul.msk.bf16.gmra.mxu2 %vm499_vm1, %v2877_v16  ;;  %v3599_v50 = vadd.f32 %v1338_v3, %v1037_v24  ;;  %v1341_v30 = vpop.f32.mrf.mxu0  ;;  %v2878_v16 = vld [vmem:[%s3056_s15 + $0x48] sm:$0xff] }
 0x114   : > { %v3624_v24 = vld [vmem:[%s3056_s15 + $0x68] sm:$0x1] }
 0x115   : > { %v1930_v28 = vshll.u32 %v3624_v24, 16 }
 0x116   : > { %v853_v17 = vpop.f32.mrf.mxu2  ;;  %2842 = vmatmul.msk.bf16.gmra.mxu0 %vm499_vm1, %v2185_v42  ;;  %2818 = vmatmul.msk.bf16.gmra.mxu3 %vm499_vm1, %v1980_v13  ;;  %v2827_v42 = vld [vmem:[%s3056_s15 + $0x54] sm:$0xe]  ;;  %v1917_v13 = vor.u32 %v1916_v8, %v1913_v15  ;;  %v1950_v8 = vrot.slane %v1948_v49, 4 }
 0x117   : > { %v884_v48 = vadd.f32 %v853_v17, %v3469_v38  ;;  %v1909_v38 = vsel %vm3088_vm4, %v1904_v41, %v1908_v46  ;;  %v2835_v51 = vrot.slane %v2827_v42, 9 }
 0x118   : > { %v1971_v2 = vunpack.c.l.b16 %v1909_v38  ;;  %v1918_v41 = vrot.slane %v1917_v13, 4  ;;  %v2828_v13 = vld [vmem:[%s3056_s15 + $0x60] sm:$0xe] }
 0x119   : > { %v1038_v25 = vadd.f32 %v1007_v22, %v884_v48  ;;  %v1012_v59 = vpop.f32.mrf.mxu3  ;;  %v1920_v22 = vshll.u32 %v3607_v61, 16  ;;  %v1932_v48 = vrot.slane %v1930_v28, 5  ;;  %v2146_v23 = vsel %vm3220_vm7, %v2835_v51, %v2145_v47 }
 0x11a   : > { %v1981_v1 = vpack.c.b16 %v1971_v2, %v1970_v9  ;;  %v2836_v51 = vrot.slane %v2828_v13, 9 }
 0x11b   : > { %v3617_v3 = vadd.f32 %v1341_v30, %v1038_v25  ;;  %v1343_v20 = vpop.f32.mrf.mxu0  ;;  %v1922_v36 = vrot.slane %v1920_v22, 5  ;;  %v2810_v25 = vld [vmem:[%s3056_s15 + $0x6c] sm:$0xf]  ;;  %v1944_v22 = vshll.u32 %v3638_v19, 16 }
 0x11c   : > { %v1935_v56 = vshrl.u32 %v2810_v25, 16  ;;  %v1938_v29 = vshll.u32 %v2810_v25, 16 }
 0x11d   : > { %v1927_v30 = vor.u32 %v1926_v18, %v1922_v36  ;;  %v2812_v18 = vld [vmem:[%s3056_s15 + $0x74] sm:$0x1] }
 0x11e   : > { %v855_v27 = vpop.f32.mrf.mxu2  ;;  %v1937_v15 = vrot.slane %v1935_v56, 4 }
 0x11f   : > { %v885_v21 = vadd.f32 %v855_v27, %v671_v4  ;;  %v1928_v46 = vrot.slane %v1927_v30, 4  ;;  %v2176_v4 = vunpack.c.l.b16 %v2146_v23  ;;  %v2879_v27 = vld [vmem:[%s3056_s15 + $0x54] sm:$0xff] }
 0x121   : > { %v1039_v62 = vadd.f32 %v1009_v33, %v885_v21  ;;  %v1014_v58 = vpop.f32.mrf.mxu3  ;;  %v2147_v33 = vrot.slane %v2145_v47, 4  ;;  %v1933_v38 = vsel %vm3088_vm4, %v1928_v46, %v1932_v48  ;;  %v1940_v21 = vrot.slane %v1938_v29, 5 }
 0x122   : > { %v1973_v2 = vunpack.c.l.b16 %v1933_v38 }
 0x123   : > { %2785 = vmatmul.msk.bf16.gmra.mxu2 %vm499_vm1, %v2878_v16  ;;  %v3628_v40 = vadd.f32 %v1343_v20, %v1039_v62  ;;  %v1346_v57 = vpop.f32.mrf.mxu0  ;;  %v2149_v31 = vsel %vm3220_vm7, %v2147_v33, %v2148_v43  ;;  %v1946_v16 = vrot.slane %v1944_v22, 5  ;;  %v1941_v30 = vor.u32 %v1940_v21, %v1937_v15 }
 0x124   : > { %v2177_v6 = vunpack.c.l.b16 %v2149_v31  ;;  %v2155_v43 = vrot.slane %v3624_v24, 5 }
 0x125   : > { %v1951_v28 = vor.u32 %v1950_v8, %v1946_v16  ;;  %v2162_v8 = vrot.slane %v2812_v18, 5 }
 0x126   : > { %v858_v17 = vpop.f32.mrf.mxu2  ;;  %2843 = vmatmul.msk.bf16.gmra.mxu0 %vm499_vm1, %v2186_v35  ;;  %2819 = vmatmul.msk.bf16.gmra.mxu3 %vm499_vm1, %v1981_v1  ;;  %v2187_v1 = vpack.c.b16 %v2177_v6, %v2176_v4  ;;  %v1532_v6 = vpop.f32.mrf.mxu1 }
 0x127   : > { %v886_v44 = vadd.f32 %v858_v17, %v3362_v32  ;;  %v1923_v32 = vsel %vm3088_vm4, %v1918_v41, %v1922_v36  ;;  %v1952_v41 = vrot.slane %v1951_v28, 4 }
 0x128   : > { %v1972_v9 = vunpack.c.l.b16 %v1923_v32 }
 0x129   : > { %v1040_v53 = vadd.f32 %v1012_v59, %v886_v44  ;;  %v1017_v26 = vpop.f32.mrf.mxu3  ;;  %v1942_v44 = vrot.slane %v1941_v30, 4  ;;  %v2881_v30 = vld [vmem:[%s3056_s15 + $0x6c] sm:$0xff] }
 0x12a   : > { %v1982_v47 = vpack.c.b16 %v1973_v2, %v1972_v9  ;;  %v2159_v9 = vrot.slane %v3638_v19, 5  ;;  %v2829_v2 = vld [vmem:[%s3056_s15 + $0x6c] sm:$0xe] }
 0x12b   : > { %v3642_v39 = vadd.f32 %v1346_v57, %v1040_v53  ;;  %v1348_v59 = vpop.f32.mrf.mxu0  ;;  %v1954_v57 = vshll.u32 %v2812_v18, 16  ;;  %v1947_v31 = vsel %vm3088_vm4, %v1942_v44, %v1946_v16  ;;  %v2837_v21 = vrot.slane %v2829_v2, 9 }
 0x12c   : > { %v1974_v29 = vunpack.c.l.b16 %v1947_v31  ;;  %v2161_v16 = vrot.slane %v2159_v9, 4 }
 0x12d   : > { %v2160_v19 = vsel %vm3220_vm7, %v2837_v21, %v2159_v9 }
 0x12e   : > { %v860_v20 = vpop.f32.mrf.mxu2  ;;  %v2180_v28 = vunpack.c.l.b16 %v2160_v19 }
 0x12f   : > { %v887_v7 = vadd.f32 %v860_v20, %v3382_v5  ;;  %v2152_v5 = vrot.slane %v3607_v61, 5  ;;  %v1956_v61 = vrot.slane %v1954_v57, 5 }
 0x131   : > { %v1041_v36 = vadd.f32 %v1014_v58, %v887_v7  ;;  %v1019_v62 = vpop.f32.mrf.mxu3  ;;  %v2154_v33 = vrot.slane %v2152_v5, 4  ;;  %v2153_v25 = vsel %vm3220_vm7, %v2836_v51, %v2152_v5  ;;  %v1957_v24 = vsel %vm3088_vm4, %v1952_v41, %v1956_v61 }
 0x132   : > { %v2178_v38 = vunpack.c.l.b16 %v2153_v25  ;;  %v1975_v22 = vunpack.c.l.b16 %v1957_v24  ;;  %v2163_v5 = vsel %vm3220_vm7, %v2161_v16, %v2162_v8 }
 0x133   : > { %2786 = vmatmul.msk.bf16.gmra.mxu2 %vm499_vm1, %v2879_v27  ;;  %v3656_v35 = vadd.f32 %v1348_v59, %v1041_v36  ;;  %v1351_v42 = vpop.f32.mrf.mxu0  ;;  %v2880_v59 = vld [vmem:[%s3056_s15 + $0x60] sm:$0xff]  ;;  %v2181_v57 = vunpack.c.l.b16 %v2163_v5 }
 0x134   : > { %v1983_v27 = vpack.c.b16 %v1975_v22, %v1974_v29 }
 0x135   : > { %v2189_v51 = vpack.c.b16 %v2181_v57, %v2180_v28 }
 0x136   : > { %v863_v17 = vpop.f32.mrf.mxu2  ;;  %2844 = vmatmul.msk.bf16.gmra.mxu0 %vm499_vm1, %v2187_v1  ;;  %2820 = vmatmul.msk.bf16.gmra.mxu3 %vm499_vm1, %v1982_v47 }
 0x137   : > { %v888_v58 = vadd.f32 %v863_v17, %v3398_v52  ;;  %v2156_v52 = vsel %vm3220_vm7, %v2154_v33, %v2155_v43 }
 0x138   : > { %v2179_v56 = vunpack.c.l.b16 %v2156_v52 }
 0x139   : > { %v1042_v46 = vadd.f32 %v1017_v26, %v888_v58  ;;  %v1022_v48 = vpop.f32.mrf.mxu3 }
 0x13a   : > { %v2188_v7 = vpack.c.b16 %v2179_v56, %v2178_v38  ;;  %v1572_v38 = vadd.f32 %v1532_v6, %v3521_v63 }
 0x13b   : > { %v3664_v53 = vadd.f32 %v1351_v42, %v1042_v46  ;;  %v1353_v23 = vpop.f32.mrf.mxu0  ;;  %v1534_v42 = vpop.f32.mrf.mxu1 }
 0x13e   : > { %v865_v32 = vpop.f32.mrf.mxu2 }
 0x13f   : > { %v889_v26 = vadd.f32 %v865_v32, %v3422_v11 }
 0x141   : > { %v1043_v49 = vadd.f32 %v1019_v62, %v889_v26  ;;  %v1024_v20 = vpop.f32.mrf.mxu3 }
 0x143   : > { %2787 = vmatmul.msk.bf16.gmra.mxu2 %vm499_vm1, %v2880_v59  ;;  %v3677_v4 = vadd.f32 %v1353_v23, %v1043_v49  ;;  %v1356_v37 = vpop.f32.mrf.mxu0  ;;  %v1537_v44 = vpop.f32.mrf.mxu1  ;;  %v1573_v49 = vadd.f32 %v1534_v42, %v3533_v54 }
 0x146   : > { %v868_v15 = vpop.f32.mrf.mxu2  ;;  %2845 = vmatmul.msk.bf16.gmra.mxu0 %vm499_vm1, %v2188_v7  ;;  %2821 = vmatmul.msk.bf16.gmra.mxu3 %vm499_vm1, %v1983_v27 }
 0x147   : > { %v890_v11 = vadd.f32 %v868_v15, %v3438_v45  ;;  %v1574_v15 = vadd.f32 %v1537_v44, %v3547_v60 }
 0x149   : > { %v1044_v36 = vadd.f32 %v1022_v48, %v890_v11  ;;  %v1027_v62 = vpop.f32.mrf.mxu3 }
 0x14b   : > { %v3684_v1 = vadd.f32 %v1356_v37, %v1044_v36  ;;  %v1358_v47 = vpop.f32.mrf.mxu0  ;;  %v1539_v52 = vpop.f32.mrf.mxu1 }
 0x14e   : > { %v870_v13 = vpop.f32.mrf.mxu2 }
 0x14f   : > { %v891_v45 = vadd.f32 %v870_v13, %v3460_v10 }
 0x151   : > { %v1045_v17 = vadd.f32 %v1024_v20, %v891_v45  ;;  %v1029_v18 = vpop.f32.mrf.mxu3  ;;  %v1575_v45 = vadd.f32 %v1539_v52, %v3565_v12 }
 0x153   : > { %2788 = vmatmul.msk.bf16.gmra.mxu2 %vm499_vm1, %v2881_v30  ;;  %v3693_v58 = vadd.f32 %v1358_v47, %v1045_v17  ;;  %v1361_v33 = vpop.f32.mrf.mxu0  ;;  %v1542_v29 = vpop.f32.mrf.mxu1 }
 0x156   : > { %v873_v43 = vpop.f32.mrf.mxu2  ;;  %2846 = vmatmul.msk.bf16.gmra.mxu0 %vm499_vm1, %v2189_v51 }
 0x157   : > { %v892_v55 = vadd.f32 %v873_v43, %v3473_v34 }
 0x159   : > { %v1046_v41 = vadd.f32 %v1027_v62, %v892_v55  ;;  %v2020_v61 = vpop.f32.mrf.mxu3  ;;  %v1576_v55 = vadd.f32 %v1542_v29, %v3581_v0 }
 0x15b   : > { %v3697_v10 = vadd.f32 %v1361_v33, %v1046_v41  ;;  %v1363_v46 = vpop.f32.mrf.mxu0  ;;  %v1544_v54 = vpop.f32.mrf.mxu1 }
 0x15e   : > { %v875_v48 = vpop.f32.mrf.mxu2 }
 0x15f   : > { %v893_v25 = vadd.f32 %v875_v48, %v3495_v14  ;;  %v3707_v14 = vld [vmem:[%s3790_s2] ss:$0 sm:$0xff] }
 0x161   : > { %v1047_v23 = vadd.f32 %v1029_v18, %v893_v25  ;;  %v2022_v31 = vpop.f32.mrf.mxu3 }
 0x163   : > { %v3700_v24 = vadd.f32 %v1363_v46, %v1047_v23  ;;  %v2226_v32 = vpop.f32.mrf.mxu0  ;;  %v1547_v57 = vpop.f32.mrf.mxu1 }
 0x166   : > { %v1686_v26 = vpop.f32.mrf.mxu2 }
 0x167   : > { %v1726_v59 = vadd.f32 %v1686_v26, %v1572_v38  ;;  %v1577_v26 = vadd.f32 %v1544_v54, %v3599_v50 }
 0x169   : > { %v2060_v34 = vadd.f32 %v2020_v61, %v1726_v59  ;;  %v2025_v56 = vpop.f32.mrf.mxu3 }
 0x16b   : > { %v2228_v22 = vpop.f32.mrf.mxu0  ;;  %v2266_v20 = vadd.f32 %v2226_v32, %v2060_v34  ;;  %v1549_v52 = vpop.f32.mrf.mxu1 }
 0x16d   : > { %v2286_v37 = vadd.f32 %v3707_v14, %v2266_v20 }
 0x16e   : > { %v1688_v7 = vpop.f32.mrf.mxu2 }
 0x16f   : > { %v1727_v27 = vadd.f32 %v1688_v7, %v1573_v49  ;;  %v2302_v11 = vmul.f32 0.2, %v2286_v37 }
 0x171   : > { %v2061_v9 = vadd.f32 %v2022_v31, %v1727_v27  ;;  %v2027_v63 = vpop.f32.mrf.mxu3  ;;  %v2318_v62 = vmax.f32 %v2286_v37, %v2302_v11  ;;  %v1578_v27 = vadd.f32 %v1547_v57, %v3617_v3 }
 0x173   : > { %v2267_v6 = vadd.f32 %v2228_v22, %v2061_v9  ;;  %v2231_v2 = vpop.f32.mrf.mxu0  ;;  %v1552_v20 = vpop.f32.mrf.mxu1 }
 0x175   : > { %v2287_v21 = vadd.f32 %v3707_v14, %v2267_v6 }
 0x176   : > { %v1691_v16 = vpop.f32.mrf.mxu2 }
 0x177   : > { %v2303_v8 = vmul.f32 0.2, %v2287_v21  ;;  %v1728_v36 = vadd.f32 %v1691_v16, %v1574_v15 }
 0x179   : > { %v2319_v47 = vmax.f32 %v2287_v21, %v2303_v8  ;;  %v2062_v19 = vadd.f32 %v2025_v56, %v1728_v36  ;;  %v2030_v5 = vpop.f32.mrf.mxu3  ;;  %v1579_v8 = vadd.f32 %v1549_v52, %v3628_v40 }
 0x17b   : > { %v2334_v42 = vpack.c.bf16 %v2319_v47, %v2318_v62  ;;  %v2233_v13 = vpop.f32.mrf.mxu0  ;;  %v2268_v30 = vadd.f32 %v2231_v2, %v2062_v19  ;;  %v1554_v62 = vpop.f32.mrf.mxu1 }
 0x17d   : > { %2847 = vmatmul.msk.bf16.vlgmr.msra.gmra.mxu1 %vm2347_vm9, %v2334_v42  ;;  %v2288_v17 = vadd.f32 %v3707_v14, %v2268_v30  ;;  %v1580_v30 = vadd.f32 %v1552_v20, %v3642_v39 }
 0x17e   : > { %v1693_v60 = vpop.f32.mrf.mxu2 }
 0x17f   : > { %v1729_v28 = vadd.f32 %v1693_v60, %v1575_v45  ;;  %v2304_v44 = vmul.f32 0.2, %v2288_v17 }
 0x181   : > { %v2063_v18 = vadd.f32 %v2027_v63, %v1729_v28  ;;  %v2032_v51 = vpop.f32.mrf.mxu3  ;;  %v2320_v48 = vmax.f32 %v2288_v17, %v2304_v44 }
 0x183   : > { %v2269_v33 = vadd.f32 %v2233_v13, %v2063_v18  ;;  %v2236_v43 = vpop.f32.mrf.mxu0  ;;  %v1557_v18 = vpop.f32.mrf.mxu1 }
 0x185   : > { %v2289_v41 = vadd.f32 %v3707_v14, %v2269_v33 }
 0x186   : > { %v1696_v61 = vpop.f32.mrf.mxu2 }
 0x187   : > { %v2305_v46 = vmul.f32 0.2, %v2289_v41  ;;  %v1730_v12 = vadd.f32 %v1696_v61, %v1576_v55 }
 0x189   : > { %v2321_v25 = vmax.f32 %v2289_v41, %v2305_v46  ;;  %v2064_v23 = vadd.f32 %v2030_v5, %v1730_v12  ;;  %v2035_v31 = vpop.f32.mrf.mxu3  ;;  %v1581_v41 = vadd.f32 %v1554_v62, %v3656_v35 }
 0x18b   : > { %v2335_v32 = vpack.c.bf16 %v2321_v25, %v2320_v48  ;;  %v2238_v38 = vpop.f32.mrf.mxu0  ;;  %v2270_v59 = vadd.f32 %v2236_v43, %v2064_v23  ;;  %v1559_v23 = vpop.f32.mrf.mxu1 }
 0x18d   : > { %2848 = vmatmul.msk.bf16.gmra.mxu1 %vm2347_vm9, %v2335_v32  ;;  %v2290_v56 = vadd.f32 %v3707_v14, %v2270_v59  ;;  %v1582_v32 = vadd.f32 %v1557_v18, %v3664_v53 }
 0x18e   : > { %v1698_v34 = vpop.f32.mrf.mxu2 }
 0x18f   : > { %v1731_v0 = vadd.f32 %v1698_v34, %v1577_v26  ;;  %v2306_v37 = vmul.f32 0.2, %v2290_v56 }
 0x191   : > { %v2065_v29 = vadd.f32 %v2032_v51, %v1731_v0  ;;  %v2037_v22 = vpop.f32.mrf.mxu3  ;;  %v2322_v2 = vmax.f32 %v2290_v56, %v2306_v37 }
 0x193   : > { %v2271_v49 = vadd.f32 %v2238_v38, %v2065_v29  ;;  %v2241_v7 = vpop.f32.mrf.mxu0  ;;  %v1562_v20 = vpop.f32.mrf.mxu1 }
 0x195   : > { %v2291_v9 = vadd.f32 %v3707_v14, %v2271_v49 }
 0x196   : > { %v1701_v63 = vpop.f32.mrf.mxu2 }
 0x197   : > { %v2307_v6 = vmul.f32 0.2, %v2291_v9  ;;  %v1732_v50 = vadd.f32 %v1701_v63, %v1578_v27  ;;  %v1583_v27 = vadd.f32 %v1559_v23, %v3677_v4 }
 0x199   : > { %v2323_v15 = vmax.f32 %v2291_v9, %v2307_v6  ;;  %v2066_v11 = vadd.f32 %v2035_v31, %v1732_v50  ;;  %v2040_v21 = vpop.f32.mrf.mxu3 }
 0x19b   : > { %v2336_v54 = vpack.c.bf16 %v2323_v15, %v2322_v2  ;;  %v2243_v16 = vpop.f32.mrf.mxu0  ;;  %v2272_v36 = vadd.f32 %v2241_v7, %v2066_v11  ;;  %v1584_v11 = vadd.f32 %v1562_v20, %v3684_v1 }
 0x19d   : > { %2849 = vmatmul.msk.bf16.gmra.mxu1 %vm2347_vm9, %v2336_v54  ;;  %v2292_v19 = vadd.f32 %v3707_v14, %v2272_v36 }
 0x19e   : > { %v1703_v47 = vpop.f32.mrf.mxu2 }
 0x19f   : > { %v1733_v3 = vadd.f32 %v1703_v47, %v1579_v8  ;;  %v2308_v60 = vmul.f32 0.2, %v2292_v19 }
 0x1a1   : > { %v2067_v5 = vadd.f32 %v2037_v22, %v1733_v3  ;;  %v2042_v45 = vpop.f32.mrf.mxu3  ;;  %v2324_v51 = vmax.f32 %v2292_v19, %v2308_v60 }
 0x1a3   : > { %v2273_v42 = vadd.f32 %v2243_v16, %v2067_v5  ;;  %v2246_v13 = vpop.f32.mrf.mxu0  ;;  %v1564_v16 = vpop.f32.mrf.mxu1 }
 0x1a5   : > { %v2293_v28 = vadd.f32 %v3707_v14, %v2273_v42  ;;  %v1585_v42 = vadd.f32 %v1564_v16, %v3693_v58 }
 0x1a6   : > { %v1706_v57 = vpop.f32.mrf.mxu2 }
 0x1a7   : > { %v2309_v17 = vmul.f32 0.2, %v2293_v28  ;;  %v1734_v40 = vadd.f32 %v1706_v57, %v1580_v30 }
 0x1a9   : > { %v2325_v33 = vmax.f32 %v2293_v28, %v2309_v17  ;;  %v2068_v43 = vadd.f32 %v2040_v21, %v1734_v40  ;;  %v2045_v12 = vpop.f32.mrf.mxu3 }
 0x1ab   : > { %v2337_v55 = vpack.c.bf16 %v2325_v33, %v2324_v51  ;;  %v2248_v44 = vpop.f32.mrf.mxu0  ;;  %v2274_v61 = vadd.f32 %v2246_v13, %v2068_v43  ;;  %v1567_v60 = vpop.f32.mrf.mxu1 }
 0x1ac   : > { %v1586_v40 = vadd.f32 %v1567_v60, %v3697_v10 }
 0x1ad   : > { %2850 = vmatmul.msk.bf16.gmra.mxu1 %vm2347_vm9, %v2337_v55  ;;  %v2294_v48 = vadd.f32 %v3707_v14, %v2274_v61 }
 0x1ae   : > { %v1708_v46 = vpop.f32.mrf.mxu2 }
 0x1af   : > { %v1735_v39 = vadd.f32 %v1708_v46, %v1581_v41  ;;  %v2310_v38 = vmul.f32 0.2, %v2294_v48 }
 0x1b1   : > { %v2069_v25 = vadd.f32 %v2042_v45, %v1735_v39  ;;  %v2047_v0 = vpop.f32.mrf.mxu3  ;;  %v2326_v56 = vmax.f32 %v2294_v48, %v2310_v38 }
 0x1b3   : > { %v2275_v52 = vadd.f32 %v2248_v44, %v2069_v25  ;;  %v2251_v31 = vpop.f32.mrf.mxu0 }
 0x1b5   : > { %v2295_v26 = vadd.f32 %v3707_v14, %v2275_v52 }
 0x1b6   : > { %v1711_v59 = vpop.f32.mrf.mxu2 }
 0x1b7   : > { %v2311_v34 = vmul.f32 0.2, %v2295_v26  ;;  %v1736_v35 = vadd.f32 %v1711_v59, %v1582_v32 }
 0x1b9   : > { %v2327_v29 = vmax.f32 %v2295_v26, %v2311_v34  ;;  %v2070_v22 = vadd.f32 %v2045_v12, %v1736_v35  ;;  %v2050_v50 = vpop.f32.mrf.mxu3  ;;  %v1569_v12 = vpop.f32.mrf.mxu1 }
 0x1ba   : > { %v1587_v48 = vadd.f32 %v1569_v12, %v3700_v24 }
 0x1bb   : > { %v2338_v49 = vpack.c.bf16 %v2327_v29, %v2326_v56  ;;  %v2253_v7 = vpop.f32.mrf.mxu0  ;;  %v2276_v37 = vadd.f32 %v2251_v31, %v2070_v22  ;;  %v2926_v29 = vld [vmem:[%s3792_s4] ss:$0 sm:$0xff] }
 0x1bd   : > { %2851 = vmatmul.msk.bf16.gmra.mxu1 %vm2347_vm9, %v2338_v49  ;;  %v2296_v63 = vadd.f32 %v3707_v14, %v2276_v37 }
 0x1be   : > { %v1713_v9 = vpop.f32.mrf.mxu2 }
 0x1bf   : > { %v1737_v53 = vadd.f32 %v1713_v9, %v1583_v27  ;;  %v2312_v21 = vmul.f32 0.2, %v2296_v63 }
 0x1c1   : > { %v2071_v6 = vadd.f32 %v2047_v0, %v1737_v53  ;;  %v2328_v62 = vmax.f32 %v2296_v63, %v2312_v21  ;;  %v2052_v5 = vpop.f32.mrf.mxu3 }
 0x1c3   : > { %v2277_v2 = vadd.f32 %v2253_v7, %v2071_v6  ;;  %v2256_v15 = vpop.f32.mrf.mxu0 }
 0x1c5   : > { %v2297_v54 = vadd.f32 %v3707_v14, %v2277_v2 }
 0x1c6   : > { %v1716_v8 = vpop.f32.mrf.mxu2 }
 0x1c7   : > { %v2313_v36 = vmul.f32 0.2, %v2297_v54  ;;  %v1738_v4 = vadd.f32 %v1716_v8, %v1584_v11 }
 0x1c9   : > { %v2329_v47 = vmax.f32 %v2297_v54, %v2313_v36  ;;  %v2072_v3 = vadd.f32 %v2050_v50, %v1738_v4  ;;  %v2055_v33 = vpop.f32.mrf.mxu3 }
 0x1cb   : > { %v2339_v19 = vpack.c.bf16 %v2329_v47, %v2328_v62  ;;  %v2278_v13 = vadd.f32 %v2256_v15, %v2072_v3  ;;  %v2258_v45 = vpop.f32.mrf.mxu0 }
 0x1cd   : > { %2852 = vmatmul.msk.bf16.gmra.mxu1 %vm2347_vm9, %v2339_v19  ;;  %v2298_v28 = vadd.f32 %v3707_v14, %v2278_v13 }
 0x1ce   : > { %v1718_v30 = vpop.f32.mrf.mxu2 }
 0x1cf   : > { %v1739_v1 = vadd.f32 %v1718_v30, %v1585_v42  ;;  %v2314_v18 = vmul.f32 0.2, %v2298_v28 }
 0x1d1   : > { %v2073_v57 = vadd.f32 %v2052_v5, %v1739_v1  ;;  %v2330_v41 = vmax.f32 %v2298_v28, %v2314_v18  ;;  %v2057_v52 = vpop.f32.mrf.mxu3 }
 0x1d3   : > { %v2279_v17 = vadd.f32 %v2258_v45, %v2073_v57  ;;  %v2261_v44 = vpop.f32.mrf.mxu0 }
 0x1d5   : > { %v2299_v51 = vadd.f32 %v3707_v14, %v2279_v17 }
 0x1d6   : > { %v1721_v43 = vpop.f32.mrf.mxu2 }
 0x1d7   : > { %v2315_v55 = vmul.f32 0.2, %v2299_v51  ;;  %v1740_v58 = vadd.f32 %v1721_v43, %v1586_v40 }
 0x1d9   : > { %v2331_v61 = vmax.f32 %v2299_v51, %v2315_v55  ;;  %v2074_v46 = vadd.f32 %v2055_v33, %v1740_v58 }
 0x1db   : > { %v2340_v39 = vpack.c.bf16 %v2331_v61, %v2330_v41  ;;  %v2280_v25 = vadd.f32 %v2261_v44, %v2074_v46  ;;  %v2263_v38 = vpop.f32.mrf.mxu0 }
 0x1dd   : > { %2853 = vmatmul.msk.bf16.gmra.mxu1 %vm2347_vm9, %v2340_v39  ;;  %v2300_v31 = vadd.f32 %v3707_v14, %v2280_v25 }
 0x1de   : > { %v1723_v10 = vpop.f32.mrf.mxu2 }
 0x1df   : > { %v1741_v23 = vadd.f32 %v1723_v10, %v1587_v48  ;;  %v2316_v59 = vmul.f32 0.2, %v2300_v31 }
 0x1e1   : > { %v2075_v32 = vadd.f32 %v2057_v52, %v1741_v23  ;;  %v2332_v0 = vmax.f32 %v2300_v31, %v2316_v59 }
 0x1e3   : > { %v2281_v26 = vadd.f32 %v2263_v38, %v2075_v32 }
 0x1e5   : > { %v2301_v34 = vadd.f32 %v3707_v14, %v2281_v26 }
 0x1e7   : > { %v2317_v35 = vmul.f32 0.2, %v2301_v34 }
 0x1e9   : > { %v2333_v56 = vmax.f32 %v2301_v34, %v2317_v35 }
 0x1eb   : > { %v2341_v24 = vpack.c.bf16 %v2333_v56, %v2332_v0 }
 0x1ed   : > { %2854 = vmatmul.msk.bf16.gmra.mxu1 %vm2347_vm9, %v2341_v24 }
 0x1fa   : > { %v2385_v14 = vpop.f32.mrf.mxu1 }
 0x1fb   : > { %v2386_v22 = vadd.f32 %v2926_v29, %v2385_v14 }
 0x1fd   : > { %2425 = vst [vmem:[%s3755_s25] sm:$0xff] %v2386_v22 }
 0x202   : > { %v2387_v49 = vpop.f32.mrf.mxu1 }
 0x203   : > { %v2388_v20 = vadd.f32 %v2926_v29, %v2387_v49 }
 0x205   : > { %2426 = vst [vmem:[%s3755_s25 + $0x8] sm:$0xff] %v2388_v20 }
 0x20a   : > { %v2390_v7 = vpop.f32.mrf.mxu1 }
 0x20b   : > { %v2391_v27 = vadd.f32 %v2926_v29, %v2390_v7 }
 0x20d   : > { %2427 = vst [vmem:[%s3755_s25 + $0x10] sm:$0xff] %v2391_v27 }
 0x212   : > { %v2392_v37 = vpop.f32.mrf.mxu1 }
 0x213   : > { %v2393_v9 = vadd.f32 %v2926_v29, %v2392_v37 }
 0x215   : > { %2428 = vst [vmem:[%s3755_s25 + $0x18] sm:$0xff] %v2393_v9 }
 0x21a   : > { %v2395_v53 = vpop.f32.mrf.mxu1 }
 0x21b   : > { %v2396_v63 = vadd.f32 %v2926_v29, %v2395_v53 }
 0x21d   : > { %2429 = vst [vmem:[%s3755_s25 + $0x20] sm:$0xff] %v2396_v63 }
 0x222   : > { %v2397_v6 = vpop.f32.mrf.mxu1 }
 0x223   : > { %v2398_v50 = vadd.f32 %v2926_v29, %v2397_v6 }
 0x225   : > { %2430 = vst [vmem:[%s3755_s25 + $0x28] sm:$0xff] %v2398_v50 }
 0x22a   : > { %v2400_v2 = vpop.f32.mrf.mxu1 }
 0x22b   : > { %v2401_v15 = vadd.f32 %v2926_v29, %v2400_v2 }
 0x22d   : > { %2431 = vst [vmem:[%s3755_s25 + $0x30] sm:$0xff] %v2401_v15 }
 0x232   : > { %v2402_v11 = vpop.f32.mrf.mxu1 }
 0x233   : > { %v2403_v21 = vadd.f32 %v2926_v29, %v2402_v11 }
 0x235   : > { %2432 = vst [vmem:[%s3755_s25 + $0x38] sm:$0xff] %v2403_v21 }
 0x23a   : > { %v2405_v54 = vpop.f32.mrf.mxu1 }
 0x23b   : > { %v2406_v16 = vadd.f32 %v2926_v29, %v2405_v54 }
 0x23d   : > { %2433 = vst [vmem:[%s3755_s25 + $0x40] sm:$0xff] %v2406_v16 }
 0x242   : > { %v2407_v8 = vpop.f32.mrf.mxu1 }
 0x243   : > { %v2408_v36 = vadd.f32 %v2926_v29, %v2407_v8 }
 0x245   : > { %2434 = vst [vmem:[%s3755_s25 + $0x48] sm:$0xff] %v2408_v36 }
 0x24a   : > { %v2410_v4 = vpop.f32.mrf.mxu1 }
 0x24b   : > { %v2411_v62 = vadd.f32 %v2926_v29, %v2410_v4 }
 0x24d   : > { %2435 = vst [vmem:[%s3755_s25 + $0x50] sm:$0xff] %v2411_v62 }
 0x252   : > { %v2412_v47 = vpop.f32.mrf.mxu1 }
 0x253   : > { %v2413_v3 = vadd.f32 %v2926_v29, %v2412_v47 }
 0x255   : > { %2436 = vst [vmem:[%s3755_s25 + $0x58] sm:$0xff] %v2413_v3 }
 0x25a   : > { %v2415_v19 = vpop.f32.mrf.mxu1 }
 0x25b   : > { %v2416_v5 = vadd.f32 %v2926_v29, %v2415_v19 }
 0x25d   : > { %2437 = vst [vmem:[%s3755_s25 + $0x60] sm:$0xff] %v2416_v5 }
 0x262   : > { %v2417_v42 = vpop.f32.mrf.mxu1 }
 0x263   : > { %v2418_v13 = vadd.f32 %v2926_v29, %v2417_v42 }
 0x265   : > { %2438 = vst [vmem:[%s3755_s25 + $0x68] sm:$0xff] %v2418_v13 }
 0x26a   : > { %v2420_v45 = vpop.f32.mrf.mxu1 }
 0x26b   : > { %v2421_v30 = vadd.f32 %v2926_v29, %v2420_v45 }
 0x26d   : > { %2439 = vst [vmem:[%s3755_s25 + $0x70] sm:$0xff] %v2421_v30 }
 0x272   : > { %v2422_v1 = vpop.f32.mrf.mxu1 }
 0x273   : > { %v2423_v60 = vadd.f32 %v2926_v29, %v2422_v1 }
 0x275   : > { %2440 = vst [vmem:[%s3755_s25 + $0x78] sm:$0xff] %v2423_v60 }
 0x276 PF: > { %s15_s22 = sadd.s32 1, %s2965_s22   ;;  %s3798_s18 = smov %s2957_s20 }
 0x277   : > { %p12_p7 = scmp.ge.s32.totalorder %s15_s22, 6   ;;  %s3799_s19 = smov %s2961_s21 }
 0x278   : > { %s3800_s20 = smov %s3803_s23  ;;  %s3801_s21 = smov %s3807_s24 }
 0x279   :  { %14 = sbr.rel (!%p12_p7) target bundleno = 3 (0x3), region = 81 }

</bundles_post_ra>
